<compile_context>
chip_gen: v6e
topology: v6e:2x2x1
jax: 0.10.0
libtpu: 0.0.40
codegen_flags: <defaults>
</compile_context>

<pallas_src>
import functools

import numpy as np
import jax
import jax.numpy as jnp
from jax.experimental import pallas as pl
from jax.experimental.pallas import tpu as pltpu

LANE = 128


# ------------------------- Pascal (binomial) kernel ------------------------- #
def _unpack_2d_ks(kernel_size):
    if isinstance(kernel_size, int):
        ky = kx = kernel_size
    else:
        assert len(kernel_size) == 2
        ky, kx = kernel_size
    return int(ky), int(kx)


def get_pascal_kernel_1d(kernel_size):
    pre, cur = [], []
    for i in range(kernel_size):
        cur = [1.0] * (i + 1)
        for j in range(1, i // 2 + 1):
            value = pre[j - 1] + pre[j]
            cur[j] = value
            if i != 2 * j:
                cur[-j - 1] = value
        pre = cur
    return np.asarray(cur, dtype=np.float64)


def _ds(start, size, stride):
    if stride == 1:
        return pl.ds(start, size)
    return pl.ds(start, size, stride)


# ------------------------------- Pallas kernel ------------------------------ #
def _max_blur_pool_kernel(x_ref, o_ref, padx_ref, tmpx_ref, *,
                          mp, ky, kx, py, px, s, wy, wx,
                          Hp, Wp, Ho, Wo, Wpad, Hpad):
    """x_ref: (H, W, TG, 128) -> o_ref: (Ho, Wo, TG, 128) (strided output)."""
    _, _, TG, L = x_ref.shape

    # ---- 0) zero the constant halo regions of the persistent scratch ONCE ----
    # (scratch_shapes persist across grid iterations; the interior is rewritten
    #  every step, the halos never change)
    rw = Wpad - (px + Wp)
    rh = Hpad - (py + Hp)
    if px > 0 or rw > 0 or py > 0 or rh > 0:
        @pl.when(pl.program_id(0) == 0)
        def _zero_halos():
            if px > 0:
                padx_ref[:, 0:px] = jnp.zeros((Hp, px, TG, L), jnp.float32)
            if rw > 0:
                padx_ref[:, px + Wp:Wpad] = jnp.zeros((Hp, rw, TG, L), jnp.float32)
            if py > 0:
                tmpx_ref[0:py] = jnp.zeros((py, Wo, TG, L), jnp.float32)
            if rh > 0:
                tmpx_ref[py + Hp:Hpad] = jnp.zeros((rh, Wo, TG, L), jnp.float32)

    # ---- 1) stride-1 max pool over an (mp x mp) VALID window, separable ----
    colmax = x_ref[:, 0:Wp]                              # (H, Wp, TG, L)
    for dx in range(1, mp):
        colmax = jnp.maximum(colmax, x_ref[:, dx:dx + Wp])
    pooled = colmax[0:Hp]                                # (Hp, Wp, TG, L)
    for dy in range(1, mp):
        pooled = jnp.maximum(pooled, colmax[dy:dy + Hp])

    # ---- 2) pooled map into the W-padded f32 plane (single f32 cast) ----
    padx_ref[:, px:px + Wp] = pooled.astype(jnp.float32)

    # ---- 3) separable blur along W, evaluated only at stride-s output columns ----
    acc = wx[0] * padx_ref[:, _ds(0, Wo, s)]
    for dx in range(1, kx):
        acc = acc + wx[dx] * padx_ref[:, _ds(dx, Wo, s)]

    # ---- 4) stash into the H-padded plane ----
    tmpx_ref[py:py + Hp] = acc

    # ---- 5) blur along H, evaluated only at stride-s output rows ----
    out = wy[0] * tmpx_ref[_ds(0, Ho, s)]
    for dy in range(1, ky):
        out = out + wy[dy] * tmpx_ref[_ds(dy, Ho, s)]

    o_ref[...] = out.astype(o_ref.dtype)


# --------------------------------- Wrapper ---------------------------------- #
def max_blur_pool2d(x, kernel_size=3, stride=2, max_pool_size=2, ceil_mode=False):
    """Pallas TPU implementation of MaxBlurPool2D.forward.  x is NCHW."""
    B, C, H, W = x.shape
    ky, kx = _unpack_2d_ks(kernel_size)
    py, px = (ky - 1) // 2, (kx - 1) // 2
    mp = int(max_pool_size)
    s = int(stride)
    # ceil_mode is a no-op: the max pool runs with stride=1, padding=0, so ceil
    # and floor output sizes coincide (exactly as in the PyTorch reference).
    del ceil_mode

    Hp, Wp = H - mp + 1, W - mp + 1                 # stride-1 max-pool output
    Ho = (Hp + 2 * py - ky) // s + 1                # final output size (== F.conv2d)
    Wo = (Wp + 2 * px - kx) // s + 1
    assert Hp >= 1 and Wp >= 1 and Ho >= 1 and Wo >= 1

    # Padded-scratch extents.  Over-allocate to (k-1) + n_out*s so the strided tap
    # reads stay in bounds under any slice-extent convention; extra rows/cols are
    # zeroed together with the blur halo.
    Wpad = max(Wp + 2 * px, (kx - 1) + Wo * s)
    Hpad = max(Hp + 2 * py, (ky - 1) + Ho * s)

    # Separable normalized Pascal weights: outer(wy, wx) == normalized 2-D kernel.
    ay = get_pascal_kernel_1d(ky)
    ax = get_pascal_kernel_1d(kx)
    wy = tuple(float(v) for v in (ay / ay.sum()))
    wx = tuple(float(v) for v in (ax / ax.sum()))

    # ---- channels-last, lane-dense layout: (H, W, G, 128) ----
    BC = B * C
    G = -(-BC // LANE)

    # Channel-group tile from a conservative VMEM budget:
    # double-buffered in/out blocks + two f32 scratch planes + the two largest
    # in-kernel temporaries (colmax, acc) that Mosaic may materialize in VMEM.
    in_b = jnp.dtype(x.dtype).itemsize
    bytes_per_group = LANE * (
        in_b * (2 * H * W + 2 * Ho * Wo)
        + 4 * (Hp * Wpad + Hpad * Wo + H * Wp + Hp * Wo))
    budget = 20 * 1024 * 1024
    TG = max(1, budget // bytes_per_group)
    if TG >= G:
        TG = G
    else:
        TG = max(8, (TG // 8) * 8)      # keep the block's sublane dim 8-aligned
    Gt = -(-G // TG) * TG               # pad #groups to a multiple of TG
    BCp = Gt * LANE

    xt = jnp.transpose(x, (2, 3, 0, 1)).reshape(H, W, BC)   # layout plumbing only
    if BCp != BC:
        xt = jnp.pad(xt, ((0, 0), (0, 0), (0, BCp - BC)))
    xt = xt.reshape(H, W, Gt, LANE)

    kernel = functools.partial(
        _max_blur_pool_kernel, mp=mp, ky=ky, kx=kx, py=py, px=px, s=s,
        wy=wy, wx=wx, Hp=Hp, Wp=Wp, Ho=Ho, Wo=Wo, Wpad=Wpad, Hpad=Hpad)

    # TODO(synk): for very large H*W a single channel-group block can exceed the
    # VMEM budget; add H-tiling with an (mp-1)+(ky-1) row halo.
    out4 = pl.pallas_call(
        kernel,
        out_shape=jax.ShapeDtypeStruct((Ho, Wo, Gt, LANE), x.dtype),
        grid_spec=pltpu.PrefetchScalarGridSpec(
            num_scalar_prefetch=0,
            grid=(Gt // TG,),
            in_specs=[pl.BlockSpec((H, W, TG, LANE), lambda g: (0, 0, g, 0))],
            out_specs=pl.BlockSpec((Ho, Wo, TG, LANE), lambda g: (0, 0, g, 0)),
            scratch_shapes=[
                pltpu.VMEM((Hp, Wpad, TG, LANE), jnp.float32),   # W-padded pooled map
                pltpu.VMEM((Hpad, Wo, TG, LANE), jnp.float32),   # H-padded x-blur
            ],
        ),
        compiler_params=pltpu.CompilerParams(
            dimension_semantics=("parallel",),
            vmem_limit_bytes=32 * 1024 * 1024,
        ),
    )(xt)

    out = out4.reshape(Ho, Wo, BCp)[:, :, :BC]
    return jnp.transpose(out.reshape(Ho, Wo, B, C), (2, 3, 0, 1))


# -------------------------- pure-JAX reference check ------------------------- #
def _reference(x, kernel_size, stride, max_pool_size):
    ky, kx = _unpack_2d_ks(kernel_size)
    py, px = (ky - 1) // 2, (kx - 1) // 2
    pooled = jax.lax.reduce_window(
        x, -jnp.inf, jax.lax.max,
        window_dimensions=(1, 1, max_pool_size, max_pool_size),
        window_strides=(1, 1, 1, 1), padding="VALID",
    )
    C = x.shape[1]
    ay = get_pascal_kernel_1d(ky)
    ax = get_pascal_kernel_1d(kx)
    k2d = np.outer(ay, ax)
    k2d = k2d / k2d.sum()
    w = jnp.broadcast_to(jnp.asarray(k2d, x.dtype)[None, None], (C, 1, ky, kx))
    return jax.lax.conv_general_dilated(
        pooled, w, window_strides=(stride, stride),
        padding=((py, py), (px, px)), feature_group_count=C,
        dimension_numbers=("NCHW", "OIHW", "NCHW"),
    )


if __name__ == "__main__":
    key = jax.random.PRNGKey(0)
    B, C, H, W = 2, 4, 16, 16
    x = jax.random.normal(key, (B, C, H, W), dtype=jnp.float32)

    out = max_blur_pool2d(x, kernel_size=3, stride=2, max_pool_size=2, ceil_mode=False)
    out = jax.block_until_ready(out)
    ref = _reference(x, 3, 2, 2)
    assert out.shape == ref.shape, (out.shape, ref.shape)
    assert jnp.allclose(out, ref, atol=1e-5, rtol=1e-5), float(jnp.max(jnp.abs(out - ref)))

    # second config: 5x5 blur, 3x3 max pool (exercises wider halos / more taps)
    out2 = max_blur_pool2d(x, kernel_size=5, stride=2, max_pool_size=3, ceil_mode=True)
    out2 = jax.block_until_ready(out2)
    ref2 = _reference(x, 5, 2, 3)
    assert out2.shape == ref2.shape, (out2.shape, ref2.shape)
    assert jnp.allclose(out2, ref2, atol=1e-5, rtol=1e-5), float(jnp.max(jnp.abs(out2 - ref2)))

    print("KERNEL_OK")
</pallas_src>

<mosaic_0001>
module attributes {stable_mosaic.version = 11 : i64} {
  func.func @_max_blur_pool_kernel(%arg0: i32, %arg1: memref<16x16x1x128xf32, #tpu.memory_space<vmem>>, %arg2: memref<8x8x1x128xf32, #tpu.memory_space<vmem>>, %arg3: memref<15x18x1x128xf32, #tpu.memory_space<vmem>>, %arg4: memref<18x8x1x128xf32, #tpu.memory_space<vmem>>) attributes {dimension_semantics = [#tpu.dimension_semantics<parallel>], iteration_bounds = array<i64: 1>, scalar_prefetch = 0 : i64, scratch_operands = 2 : i64, tpu.core_type = #tpu.core_type<tc>, window_params = [{transform_indices = @transform_0, window_bounds = array<i64: 16, 16, 1, 128>}, {transform_indices = @transform_1, window_bounds = array<i64: 8, 8, 1, 128>}]} {
    %c0_i32 = arith.constant 0 : i32
    %0 = arith.cmpi eq, %arg0, %c0_i32 : i32
    %1 = arith.extui %0 : i1 to i32
    %c0_i32_0 = arith.constant 0 : i32
    %2 = arith.cmpi ne, %1, %c0_i32_0 : i32
    scf.if %2 {
      %cst_47 = arith.constant 0.000000e+00 : f32
      %34 = vector.broadcast %cst_47 : f32 to vector<15x1x1x128xf32>
      %c0_48 = arith.constant 0 : index
      %c0_49 = arith.constant 0 : index
      %c0_50 = arith.constant 0 : index
      %c0_51 = arith.constant 0 : index
      %35 = vector.load %arg3[%c0_48, %c0_49, %c0_50, %c0_51] : memref<15x18x1x128xf32, #tpu.memory_space<vmem>>, vector<15x1x1x128xf32>
      tpu.vector_store %arg3[%c0_48, %c0_49, %c0_50, %c0_51], %34 {strides = array<i32>} : memref<15x18x1x128xf32, #tpu.memory_space<vmem>>, vector<15x1x1x128xf32>,
      %cst_52 = arith.constant 0.000000e+00 : f32
      %36 = vector.broadcast %cst_52 : f32 to vector<15x2x1x128xf32>
      %c0_53 = arith.constant 0 : index
      %c16 = arith.constant 16 : index
      %c0_54 = arith.constant 0 : index
      %c0_55 = arith.constant 0 : index
      %37 = vector.load %arg3[%c0_53, %c16, %c0_54, %c0_55] : memref<15x18x1x128xf32, #tpu.memory_space<vmem>>, vector<15x2x1x128xf32>
      tpu.vector_store %arg3[%c0_53, %c16, %c0_54, %c0_55], %36 {strides = array<i32>} : memref<15x18x1x128xf32, #tpu.memory_space<vmem>>, vector<15x2x1x128xf32>,
      %cst_56 = arith.constant 0.000000e+00 : f32
      %38 = vector.broadcast %cst_56 : f32 to vector<1x8x1x128xf32>
      %c0_57 = arith.constant 0 : index
      %c0_58 = arith.constant 0 : index
      %c0_59 = arith.constant 0 : index
      %c0_60 = arith.constant 0 : index
      %39 = vector.load %arg4[%c0_57, %c0_58, %c0_59, %c0_60] : memref<18x8x1x128xf32, #tpu.memory_space<vmem>>, vector<1x8x1x128xf32>
      tpu.vector_store %arg4[%c0_57, %c0_58, %c0_59, %c0_60], %38 {strides = array<i32>} : memref<18x8x1x128xf32, #tpu.memory_space<vmem>>, vector<1x8x1x128xf32>,
      %cst_61 = arith.constant 0.000000e+00 : f32
      %40 = vector.broadcast %cst_61 : f32 to vector<2x8x1x128xf32>
      %c16_62 = arith.constant 16 : index
      %c0_63 = arith.constant 0 : index
      %c0_64 = arith.constant 0 : index
      %c0_65 = arith.constant 0 : index
      %41 = vector.load %arg4[%c16_62, %c0_63, %c0_64, %c0_65] : memref<18x8x1x128xf32, #tpu.memory_space<vmem>>, vector<2x8x1x128xf32>
      tpu.vector_store %arg4[%c16_62, %c0_63, %c0_64, %c0_65], %40 {strides = array<i32>} : memref<18x8x1x128xf32, #tpu.memory_space<vmem>>, vector<2x8x1x128xf32>,
    } else {
    }
    %c0 = arith.constant 0 : index
    %c0_1 = arith.constant 0 : index
    %c0_2 = arith.constant 0 : index
    %c0_3 = arith.constant 0 : index
    %3 = vector.load %arg1[%c0, %c0_1, %c0_2, %c0_3] : memref<16x16x1x128xf32, #tpu.memory_space<vmem>>, vector<16x15x1x128xf32>
    %c0_4 = arith.constant 0 : index
    %c1 = arith.constant 1 : index
    %c0_5 = arith.constant 0 : index
    %c0_6 = arith.constant 0 : index
    %4 = vector.load %arg1[%c0_4, %c1, %c0_5, %c0_6] : memref<16x16x1x128xf32, #tpu.memory_space<vmem>>, vector<16x15x1x128xf32>
    %5 = arith.maximumf %3, %4 : vector<16x15x1x128xf32>
    %6 = vector.extract_strided_slice %5 {offsets = [0, 0, 0, 0], sizes = [15, 15, 1, 128], strides = [1, 1, 1, 1]} : vector<16x15x1x128xf32> to vector<15x15x1x128xf32>
    %7 = vector.extract_strided_slice %5 {offsets = [1, 0, 0, 0], sizes = [15, 15, 1, 128], strides = [1, 1, 1, 1]} : vector<16x15x1x128xf32> to vector<15x15x1x128xf32>
    %8 = arith.maximumf %6, %7 : vector<15x15x1x128xf32>
    %c0_7 = arith.constant 0 : index
    %c1_8 = arith.constant 1 : index
    %c0_9 = arith.constant 0 : index
    %c0_10 = arith.constant 0 : index
    %9 = vector.load %arg3[%c0_7, %c1_8, %c0_9, %c0_10] : memref<15x18x1x128xf32, #tpu.memory_space<vmem>>, vector<15x15x1x128xf32>
    tpu.vector_store %arg3[%c0_7, %c1_8, %c0_9, %c0_10], %8 {strides = array<i32>} : memref<15x18x1x128xf32, #tpu.memory_space<vmem>>, vector<15x15x1x128xf32>,
    %c0_11 = arith.constant 0 : index
    %c0_12 = arith.constant 0 : index
    %c0_13 = arith.constant 0 : index
    %c0_14 = arith.constant 0 : index
    %10 = tpu.strided_load %arg3[%c0_11, %c0_12, %c0_13, %c0_14] {strides = array<i32: 1, 2, 1, 1>} : memref<15x18x1x128xf32, #tpu.memory_space<vmem>>, vector<15x8x1x128xf32>
    %cst = arith.constant 2.500000e-01 : f32
    %11 = vector.broadcast %cst : f32 to vector<15x8x1x128xf32>
    %12 = arith.mulf %11, %10 : vector<15x8x1x128xf32>
    %c0_15 = arith.constant 0 : index
    %c1_16 = arith.constant 1 : index
    %c0_17 = arith.constant 0 : index
    %c0_18 = arith.constant 0 : index
    %13 = tpu.strided_load %arg3[%c0_15, %c1_16, %c0_17, %c0_18] {strides = array<i32: 1, 2, 1, 1>} : memref<15x18x1x128xf32, #tpu.memory_space<vmem>>, vector<15x8x1x128xf32>
    %cst_19 = arith.constant 5.000000e-01 : f32
    %14 = vector.broadcast %cst_19 : f32 to vector<15x8x1x128xf32>
    %15 = arith.mulf %14, %13 : vector<15x8x1x128xf32>
    %16 = arith.addf %12, %15 : vector<15x8x1x128xf32>
    %c0_20 = arith.constant 0 : index
    %c2 = arith.constant 2 : index
    %c0_21 = arith.constant 0 : index
    %c0_22 = arith.constant 0 : index
    %17 = tpu.strided_load %arg3[%c0_20, %c2, %c0_21, %c0_22] {strides = array<i32: 1, 2, 1, 1>} : memref<15x18x1x128xf32, #tpu.memory_space<vmem>>, vector<15x8x1x128xf32>
    %cst_23 = arith.constant 2.500000e-01 : f32
    %18 = vector.broadcast %cst_23 : f32 to vector<15x8x1x128xf32>
    %19 = arith.mulf %18, %17 : vector<15x8x1x128xf32>
    %20 = arith.addf %16, %19 : vector<15x8x1x128xf32>
    %c1_24 = arith.constant 1 : index
    %c0_25 = arith.constant 0 : index
    %c0_26 = arith.constant 0 : index
    %c0_27 = arith.constant 0 : index
    %21 = vector.load %arg4[%c1_24, %c0_25, %c0_26, %c0_27] : memref<18x8x1x128xf32, #tpu.memory_space<vmem>>, vector<15x8x1x128xf32>
    tpu.vector_store %arg4[%c1_24, %c0_25, %c0_26, %c0_27], %20 {strides = array<i32>} : memref<18x8x1x128xf32, #tpu.memory_space<vmem>>, vector<15x8x1x128xf32>,
    %c0_28 = arith.constant 0 : index
    %c0_29 = arith.constant 0 : index
    %c0_30 = arith.constant 0 : index
    %c0_31 = arith.constant 0 : index
    %22 = tpu.strided_load %arg4[%c0_28, %c0_29, %c0_30, %c0_31] {strides = array<i32: 2, 1, 1, 1>} : memref<18x8x1x128xf32, #tpu.memory_space<vmem>>, vector<8x8x1x128xf32>
    %cst_32 = arith.constant 2.500000e-01 : f32
    %23 = vector.broadcast %cst_32 : f32 to vector<8x8x1x128xf32>
    %24 = arith.mulf %23, %22 : vector<8x8x1x128xf32>
    %c1_33 = arith.constant 1 : index
    %c0_34 = arith.constant 0 : index
    %c0_35 = arith.constant 0 : index
    %c0_36 = arith.constant 0 : index
    %25 = tpu.strided_load %arg4[%c1_33, %c0_34, %c0_35, %c0_36] {strides = array<i32: 2, 1, 1, 1>} : memref<18x8x1x128xf32, #tpu.memory_space<vmem>>, vector<8x8x1x128xf32>
    %cst_37 = arith.constant 5.000000e-01 : f32
    %26 = vector.broadcast %cst_37 : f32 to vector<8x8x1x128xf32>
    %27 = arith.mulf %26, %25 : vector<8x8x1x128xf32>
    %28 = arith.addf %24, %27 : vector<8x8x1x128xf32>
    %c2_38 = arith.constant 2 : index
    %c0_39 = arith.constant 0 : index
    %c0_40 = arith.constant 0 : index
    %c0_41 = arith.constant 0 : index
    %29 = tpu.strided_load %arg4[%c2_38, %c0_39, %c0_40, %c0_41] {strides = array<i32: 2, 1, 1, 1>} : memref<18x8x1x128xf32, #tpu.memory_space<vmem>>, vector<8x8x1x128xf32>
    %cst_42 = arith.constant 2.500000e-01 : f32
    %30 = vector.broadcast %cst_42 : f32 to vector<8x8x1x128xf32>
    %31 = arith.mulf %30, %29 : vector<8x8x1x128xf32>
    %32 = arith.addf %28, %31 : vector<8x8x1x128xf32>
    %c0_43 = arith.constant 0 : index
    %c0_44 = arith.constant 0 : index
    %c0_45 = arith.constant 0 : index
    %c0_46 = arith.constant 0 : index
    %33 = vector.load %arg2[%c0_43, %c0_44, %c0_45, %c0_46] : memref<8x8x1x128xf32, #tpu.memory_space<vmem>>, vector<8x8x1x128xf32>
    tpu.vector_store %arg2[%c0_43, %c0_44, %c0_45, %c0_46], %32 {strides = array<i32>} : memref<8x8x1x128xf32, #tpu.memory_space<vmem>>, vector<8x8x1x128xf32>,
    return
  }
  func.func @transform_0(%arg0: i32) -> (i32, i32, i32, i32) {
    %c0_i32 = arith.constant 0 : i32
    %c0_i32_0 = arith.constant 0 : i32
    %c0_i32_1 = arith.constant 0 : i32
    %c0_i32_2 = arith.constant 0 : i32
    return %c0_i32, %c0_i32_0, %arg0, %c0_i32_1 : i32, i32, i32, i32
  }
  func.func @transform_1(%arg0: i32) -> (i32, i32, i32, i32) {
    %c0_i32 = arith.constant 0 : i32
    %c0_i32_0 = arith.constant 0 : i32
    %c0_i32_1 = arith.constant 0 : i32
    %c0_i32_2 = arith.constant 0 : i32
    return %c0_i32, %c0_i32_0, %arg0, %c0_i32_1 : i32, i32, i32, i32
  }
}

</mosaic_0001>

<bundles_post_ra>
// kernel: tpu_custom_call.1
= control target key start
LH: loop header
LB: loop body
LE: loop exit
PB: predicated region body
PF: predicated region fallthrough
CT: control target
= control target key end

     0   :  { %6 = vsyncpa [#allocation5], 0  ;;  %s3862_s0 = inlined_call_operand.hbm [shape: f32[16,16,1,128], index: 0, kind: input, shape index: {}]   ;;  %s3863_s1 = inlined_call_operand.hbm [shape: f32[8,8,1,128], index: 1, kind: output, shape index: {}]  }
   0x1   :  { %7 = vsyncpa [#allocation6], 0  ;;  %s2995_s6 = smov [#allocation4]  }
   0x2   :  { %s13_s7 = sshll.u32 %s2995_s6, 4  ;;  %s14_s7 = int_to_ptr.vmem [resolvable:$true] %s13_s7 }
   0x3   :  { %s2959_s8 = scalar_lea.vmem %s14_s7, 4096  ;;  %p2964_p1 = scmp.lt.s32.totalorder %s14_s7, %s14_s7 }
   0x4   :  { %p2960_p0 = scmp.ne.s32.totalorder %s14_s7, %s2959_s8  ;;  %p2965_p2 = scmp.lt.s32.totalorder %s2959_s8, %s2959_s8 }
   0x6   :  { %p2966_p3 = por %p2965_p2, %p2964_p1 }
   0x8   :  { %p2967_p4 = pnand %p2966_p3, %p2960_p0 }
   0xa   :  { %2970 = shalt.err (!%p2967_p4)
}
   0xb   :  { %s2996_s9 = smov 16   ;;  %s2997_s10 = smov 1  }
   0xc   :  { %19 = dma.hbm_to_vmem [thread:$0]  %s3862_s0, 4096, %s14_s7, [#allocation5], %s2996_s9, %s2996_s9, %s2997_s10  }
   0xd   :  { %2991 = dma.done.wait [#allocation5], 4096  }
   0xe   :  { %2992 = vsyncadd [#allocation5], 4294963200  ;;  %v2998_v0 = vmov 0.0   ;;  %v98_v1 = vld [vmem:[#allocation4] sm:$0x1]  ;;  %s2999_s0 = smov [#allocation7]  }
   0xf   :  { %27 = vst [vmem:[#allocation2] sm:$0x1] %v2998_v0  ;;  %28 = vst [vmem:[#allocation2 + $0x12] sm:$0x1] %v2998_v0  ;;  %v113_v2 = vld [vmem:[#allocation4 + $0x10] sm:$0x1] }
  0x10   :  { %29 = vst [vmem:[#allocation2 + $0x24] sm:$0x1] %v2998_v0  ;;  %30 = vst [vmem:[#allocation2 + $0x36] sm:$0x1] %v2998_v0  ;;  %v339_v3 = vld [vmem:[#allocation4 + $0x1] sm:$0x1] }
  0x11   :  { %31 = vst [vmem:[#allocation2 + $0x48] sm:$0x1] %v2998_v0  ;;  %32 = vst [vmem:[#allocation2 + $0x5a] sm:$0x1] %v2998_v0  ;;  %v354_v4 = vld [vmem:[#allocation4 + $0x11] sm:$0x1]  ;;  %v579_v5 = vmax.f32 %v98_v1, %v339_v3 }
  0x12   :  { %33 = vst [vmem:[#allocation2 + $0x6c] sm:$0x1] %v2998_v0  ;;  %34 = vst [vmem:[#allocation2 + $0x7e] sm:$0x1] %v2998_v0  ;;  %v99_v6 = vld [vmem:[#allocation4 + $0x1] sm:$0x1]  ;;  %v3016_v8 = vmax.f32 %v113_v2, %v354_v4 }
  0x13   :  { %35 = vst [vmem:[#allocation2 + $0x90] sm:$0x1] %v2998_v0  ;;  %36 = vst [vmem:[#allocation2 + $0xa2] sm:$0x1] %v2998_v0  ;;  %v114_v7 = vld [vmem:[#allocation4 + $0x11] sm:$0x1] }
  0x14   :  { %37 = vst [vmem:[#allocation2 + $0xb4] sm:$0x1] %v2998_v0  ;;  %38 = vst [vmem:[#allocation2 + $0xc6] sm:$0x1] %v2998_v0  ;;  %v340_v9 = vld [vmem:[#allocation4 + $0x2] sm:$0x1]  ;;  %v819_v17 = vmax.f32 %v579_v5, %v3016_v8 }
  0x15   :  { %39 = vst [vmem:[#allocation2 + $0xd8] sm:$0x1] %v2998_v0  ;;  %40 = vst [vmem:[#allocation2 + $0xea] sm:$0x1] %v2998_v0  ;;  %v355_v10 = vld [vmem:[#allocation4 + $0x12] sm:$0x1]  ;;  %v580_v12 = vmax.f32 %v99_v6, %v340_v9 }
  0x16   :  { %41 = vst [vmem:[#allocation2 + $0xfc] sm:$0x1] %v2998_v0  ;;  %43 = vst [vmem:[#allocation2 + $0x10] sm:$0x1] %v2998_v0  ;;  %v100_v11 = vld [vmem:[#allocation4 + $0x2] sm:$0x1]  ;;  %v3018_v13 = vmax.f32 %v114_v7, %v355_v10 }
  0x17   :  { %45 = vst [vmem:[#allocation2 + $0x22] sm:$0x1] %v2998_v0  ;;  %47 = vst [vmem:[#allocation2 + $0x34] sm:$0x1] %v2998_v0  ;;  %v115_v14 = vld [vmem:[#allocation4 + $0x12] sm:$0x1] }
  0x18   :  { %49 = vst [vmem:[#allocation2 + $0x46] sm:$0x1] %v2998_v0  ;;  %51 = vst [vmem:[#allocation2 + $0x58] sm:$0x1] %v2998_v0  ;;  %v341_v15 = vld [vmem:[#allocation4 + $0x3] sm:$0x1]  ;;  %v820_v23 = vmax.f32 %v580_v12, %v3018_v13 }
  0x19   :  { %53 = vst [vmem:[#allocation2 + $0x6a] sm:$0x1] %v2998_v0  ;;  %55 = vst [vmem:[#allocation2 + $0x7c] sm:$0x1] %v2998_v0  ;;  %v356_v16 = vld [vmem:[#allocation4 + $0x13] sm:$0x1]  ;;  %v581_v18 = vmax.f32 %v100_v11, %v341_v15 }
  0x1a   :  { %57 = vst [vmem:[#allocation2 + $0x8e] sm:$0x1] %v2998_v0  ;;  %59 = vst [vmem:[#allocation2 + $0xa0] sm:$0x1] %v2998_v0  ;;  %v3021_v19 = vmax.f32 %v115_v14, %v356_v16  ;;  %v101_v20 = vld [vmem:[#allocation4 + $0x3] sm:$0x1] }
  0x1b   :  { %61 = vst [vmem:[#allocation2 + $0xb2] sm:$0x1] %v2998_v0  ;;  %63 = vst [vmem:[#allocation2 + $0xc4] sm:$0x1] %v2998_v0  ;;  %v116_v21 = vld [vmem:[#allocation4 + $0x13] sm:$0x1] }
  0x1c   :  { %65 = vst [vmem:[#allocation2 + $0xd6] sm:$0x1] %v2998_v0  ;;  %67 = vst [vmem:[#allocation2 + $0xe8] sm:$0x1] %v2998_v0  ;;  %v342_v22 = vld [vmem:[#allocation4 + $0x4] sm:$0x1]  ;;  %v821_v28 = vmax.f32 %v581_v18, %v3021_v19 }
  0x1d   :  { %69 = vst [vmem:[#allocation2 + $0xfa] sm:$0x1] %v2998_v0  ;;  %71 = vst [vmem:[#allocation2 + $0x10c] sm:$0x1] %v2998_v0  ;;  %v357_v24 = vld [vmem:[#allocation4 + $0x14] sm:$0x1]  ;;  %v582_v25 = vmax.f32 %v101_v20, %v342_v22 }
  0x1e   :  { %73 = vst [vmem:[#allocation3] sm:$0x1] %v2998_v0  ;;  %74 = vst [vmem:[#allocation3 + $0x1] sm:$0x1] %v2998_v0  ;;  %v102_v26 = vld [vmem:[#allocation4 + $0x4] sm:$0x1]  ;;  %v3025_v29 = vmax.f32 %v116_v21, %v357_v24 }
  0x1f   :  { %75 = vst [vmem:[#allocation3 + $0x2] sm:$0x1] %v2998_v0  ;;  %76 = vst [vmem:[#allocation3 + $0x3] sm:$0x1] %v2998_v0  ;;  %v117_v27 = vld [vmem:[#allocation4 + $0x14] sm:$0x1] }
  0x20   :  { %77 = vst [vmem:[#allocation3 + $0x4] sm:$0x1] %v2998_v0  ;;  %78 = vst [vmem:[#allocation3 + $0x5] sm:$0x1] %v2998_v0  ;;  %v343_v30 = vld [vmem:[#allocation4 + $0x5] sm:$0x1]  ;;  %v822_v38 = vmax.f32 %v582_v25, %v3025_v29 }
  0x21   :  { %79 = vst [vmem:[#allocation3 + $0x6] sm:$0x1] %v2998_v0  ;;  %80 = vst [vmem:[#allocation3 + $0x7] sm:$0x1] %v2998_v0  ;;  %v358_v31 = vld [vmem:[#allocation4 + $0x15] sm:$0x1]  ;;  %v583_v33 = vmax.f32 %v102_v26, %v343_v30 }
  0x22   :  { %82 = vst [vmem:[#allocation3 + $0x80] sm:$0x1] %v2998_v0  ;;  %83 = vst [vmem:[#allocation3 + $0x81] sm:$0x1] %v2998_v0  ;;  %v103_v32 = vld [vmem:[#allocation4 + $0x5] sm:$0x1]  ;;  %v3027_v34 = vmax.f32 %v117_v27, %v358_v31 }
  0x23   :  { %84 = vst [vmem:[#allocation3 + $0x82] sm:$0x1] %v2998_v0  ;;  %85 = vst [vmem:[#allocation3 + $0x83] sm:$0x1] %v2998_v0  ;;  %v118_v35 = vld [vmem:[#allocation4 + $0x15] sm:$0x1] }
  0x24   :  { %86 = vst [vmem:[#allocation3 + $0x84] sm:$0x1] %v2998_v0  ;;  %87 = vst [vmem:[#allocation3 + $0x85] sm:$0x1] %v2998_v0  ;;  %v344_v36 = vld [vmem:[#allocation4 + $0x6] sm:$0x1]  ;;  %v823_v44 = vmax.f32 %v583_v33, %v3027_v34 }
  0x25   :  { %88 = vst [vmem:[#allocation3 + $0x86] sm:$0x1] %v2998_v0  ;;  %89 = vst [vmem:[#allocation3 + $0x87] sm:$0x1] %v2998_v0  ;;  %v359_v37 = vld [vmem:[#allocation4 + $0x16] sm:$0x1]  ;;  %v584_v39 = vmax.f32 %v103_v32, %v344_v36 }
  0x26   :  { %1045 = vst [vmem:[#allocation2 + $0x1] sm:$0x1] %v819_v17  ;;  %1046 = vst [vmem:[#allocation2 + $0x2] sm:$0x1] %v820_v23  ;;  %v3030_v40 = vmax.f32 %v118_v35, %v359_v37  ;;  %v104_v41 = vld [vmem:[#allocation4 + $0x6] sm:$0x1] }
  0x27   :  { %1047 = vst [vmem:[#allocation2 + $0x3] sm:$0x1] %v821_v28  ;;  %v119_v42 = vld [vmem:[#allocation4 + $0x16] sm:$0x1]  ;;  %v345_v43 = vld [vmem:[#allocation4 + $0x7] sm:$0x1] }
  0x28   :  { %v360_v45 = vld [vmem:[#allocation4 + $0x17] sm:$0x1]  ;;  %v585_v46 = vmax.f32 %v104_v41, %v345_v43  ;;  %v105_v47 = vld [vmem:[#allocation4 + $0x7] sm:$0x1]  ;;  %1048 = vst [vmem:[#allocation2 + $0x4] sm:$0x1] %v822_v38  ;;  %v824_v49 = vmax.f32 %v584_v39, %v3030_v40 }
  0x29   :  { %v120_v48 = vld [vmem:[#allocation4 + $0x17] sm:$0x1]  ;;  %v3034_v50 = vmax.f32 %v119_v42, %v360_v45  ;;  %v346_v51 = vld [vmem:[#allocation4 + $0x8] sm:$0x1]  ;;  %v361_v52 = vld [vmem:[#allocation4 + $0x18] sm:$0x1] }
  0x2a   :  { %v106_v53 = vld [vmem:[#allocation4 + $0x8] sm:$0x1]  ;;  %1049 = vst [vmem:[#allocation2 + $0x5] sm:$0x1] %v823_v44  ;;  %v586_v54 = vmax.f32 %v105_v47, %v346_v51  ;;  %v3036_v55 = vmax.f32 %v120_v48, %v361_v52  ;;  %v121_v56 = vld [vmem:[#allocation4 + $0x18] sm:$0x1] }
  0x2b   :  { %v347_v57 = vld [vmem:[#allocation4 + $0x9] sm:$0x1]  ;;  %v362_v58 = vld [vmem:[#allocation4 + $0x19] sm:$0x1]  ;;  %1050 = vst [vmem:[#allocation2 + $0x6] sm:$0x1] %v824_v49  ;;  %v825_v59 = vmax.f32 %v585_v46, %v3034_v50 }
  0x2c   :  { %v587_v60 = vmax.f32 %v106_v53, %v347_v57  ;;  %v3039_v61 = vmax.f32 %v121_v56, %v362_v58  ;;  %v107_v62 = vld [vmem:[#allocation4 + $0x9] sm:$0x1]  ;;  %v122_v63 = vld [vmem:[#allocation4 + $0x19] sm:$0x1]  ;;  %v348_v0 = vld [vmem:[#allocation4 + $0xa] sm:$0x1]  ;;  %v826_v1 = vmax.f32 %v586_v54, %v3036_v55 }
  0x2d   :  { %v363_v2 = vld [vmem:[#allocation4 + $0x1a] sm:$0x1]  ;;  %v588_v3 = vmax.f32 %v107_v62, %v348_v0  ;;  %v108_v4 = vld [vmem:[#allocation4 + $0xa] sm:$0x1]  ;;  %1051 = vst [vmem:[#allocation2 + $0x7] sm:$0x1] %v825_v59 }
  0x2e   :  { %v123_v5 = vld [vmem:[#allocation4 + $0x1a] sm:$0x1]  ;;  %v827_v6 = vmax.f32 %v587_v60, %v3039_v61  ;;  %v3043_v7 = vmax.f32 %v122_v63, %v363_v2  ;;  %v349_v9 = vld [vmem:[#allocation4 + $0xb] sm:$0x1]  ;;  %v364_v10 = vld [vmem:[#allocation4 + $0x1b] sm:$0x1] }
  0x2f   :  { %v109_v11 = vld [vmem:[#allocation4 + $0xb] sm:$0x1]  ;;  %1052 = vst [vmem:[#allocation2 + $0x8] sm:$0x1] %v826_v1  ;;  %v589_v12 = vmax.f32 %v108_v4, %v349_v9  ;;  %v3045_v14 = vmax.f32 %v123_v5, %v364_v10  ;;  %v124_v15 = vld [vmem:[#allocation4 + $0x1b] sm:$0x1] }
  0x30   :  { %v350_v16 = vld [vmem:[#allocation4 + $0xc] sm:$0x1]  ;;  %v365_v17 = vld [vmem:[#allocation4 + $0x1c] sm:$0x1]  ;;  %1053 = vst [vmem:[#allocation2 + $0x9] sm:$0x1] %v827_v6  ;;  %v828_v18 = vmax.f32 %v588_v3, %v3043_v7 }
  0x31   :  { %v590_v20 = vmax.f32 %v109_v11, %v350_v16  ;;  %v3048_v21 = vmax.f32 %v124_v15, %v365_v17  ;;  %v110_v22 = vld [vmem:[#allocation4 + $0xc] sm:$0x1]  ;;  %v125_v23 = vld [vmem:[#allocation4 + $0x1c] sm:$0x1]  ;;  %v351_v24 = vld [vmem:[#allocation4 + $0xd] sm:$0x1]  ;;  %v829_v25 = vmax.f32 %v589_v12, %v3045_v14 }
  0x32   :  { %v366_v26 = vld [vmem:[#allocation4 + $0x1d] sm:$0x1]  ;;  %v591_v27 = vmax.f32 %v110_v22, %v351_v24  ;;  %v111_v28 = vld [vmem:[#allocation4 + $0xd] sm:$0x1]  ;;  %1054 = vst [vmem:[#allocation2 + $0xa] sm:$0x1] %v828_v18 }
  0x33   :  { %v126_v30 = vld [vmem:[#allocation4 + $0x1d] sm:$0x1]  ;;  %v830_v31 = vmax.f32 %v590_v20, %v3048_v21  ;;  %v3052_v32 = vmax.f32 %v125_v23, %v366_v26  ;;  %v352_v33 = vld [vmem:[#allocation4 + $0xe] sm:$0x1]  ;;  %v367_v35 = vld [vmem:[#allocation4 + $0x1e] sm:$0x1] }
  0x34   :  { %v112_v36 = vld [vmem:[#allocation4 + $0xe] sm:$0x1]  ;;  %1055 = vst [vmem:[#allocation2 + $0xb] sm:$0x1] %v829_v25  ;;  %v592_v37 = vmax.f32 %v111_v28, %v352_v33  ;;  %v3054_v38 = vmax.f32 %v126_v30, %v367_v35  ;;  %v127_v39 = vld [vmem:[#allocation4 + $0x1e] sm:$0x1] }
  0x35   :  { %v353_v41 = vld [vmem:[#allocation4 + $0xf] sm:$0x1]  ;;  %v368_v42 = vld [vmem:[#allocation4 + $0x1f] sm:$0x1]  ;;  %1056 = vst [vmem:[#allocation2 + $0xc] sm:$0x1] %v830_v31  ;;  %v831_v43 = vmax.f32 %v591_v27, %v3052_v32 }
  0x36   :  { %v593_v44 = vmax.f32 %v112_v36, %v353_v41  ;;  %v3057_v45 = vmax.f32 %v127_v39, %v368_v42  ;;  %v128_v46 = vld [vmem:[#allocation4 + $0x20] sm:$0x1]  ;;  %v369_v47 = vld [vmem:[#allocation4 + $0x21] sm:$0x1]  ;;  %v832_v49 = vmax.f32 %v592_v37, %v3054_v38  ;;  %v370_v52 = vld [vmem:[#allocation4 + $0x22] sm:$0x1] }
  0x37   :  { %v129_v48 = vld [vmem:[#allocation4 + $0x21] sm:$0x1]  ;;  %v3060_v51 = vmax.f32 %v128_v46, %v369_v47  ;;  %v130_v53 = vld [vmem:[#allocation4 + $0x22] sm:$0x1]  ;;  %v371_v54 = vld [vmem:[#allocation4 + $0x23] sm:$0x1] }
  0x38   :  { %1057 = vst [vmem:[#allocation2 + $0xd] sm:$0x1] %v831_v43  ;;  %v833_v56 = vmax.f32 %v593_v44, %v3057_v45  ;;  %v3063_v57 = vmax.f32 %v129_v48, %v370_v52  ;;  %v3065_v58 = vmax.f32 %v130_v53, %v371_v54  ;;  %v131_v59 = vld [vmem:[#allocation4 + $0x23] sm:$0x1]  ;;  %v372_v60 = vld [vmem:[#allocation4 + $0x24] sm:$0x1] }
  0x39   :  { %v132_v62 = vld [vmem:[#allocation4 + $0x24] sm:$0x1]  ;;  %1058 = vst [vmem:[#allocation2 + $0xe] sm:$0x1] %v832_v49  ;;  %v834_v63 = vmax.f32 %v3016_v8, %v3060_v51  ;;  %v3069_v0 = vmax.f32 %v131_v59, %v372_v60  ;;  %v373_v1 = vld [vmem:[#allocation4 + $0x25] sm:$0x1] }
  0x3a   :  { %v133_v2 = vld [vmem:[#allocation4 + $0x25] sm:$0x1]  ;;  %v374_v3 = vld [vmem:[#allocation4 + $0x26] sm:$0x1]  ;;  %1059 = vst [vmem:[#allocation2 + $0xf] sm:$0x1] %v833_v56  ;;  %v835_v4 = vmax.f32 %v3018_v13, %v3063_v57  ;;  %v836_v5 = vmax.f32 %v3021_v19, %v3065_v58  ;;  %v3075_v6 = vmax.f32 %v132_v62, %v373_v1 }
  0x3b   :  { %v3077_v9 = vmax.f32 %v133_v2, %v374_v3  ;;  %v134_v10 = vld [vmem:[#allocation4 + $0x26] sm:$0x1]  ;;  %v375_v11 = vld [vmem:[#allocation4 + $0x27] sm:$0x1]  ;;  %1060 = vst [vmem:[#allocation2 + $0x13] sm:$0x1] %v834_v63  ;;  %v837_v8 = vmax.f32 %v3025_v29, %v3069_v0 }
  0x3c   :  { %v135_v12 = vld [vmem:[#allocation4 + $0x27] sm:$0x1]  ;;  %v3081_v15 = vmax.f32 %v134_v10, %v375_v11  ;;  %v376_v16 = vld [vmem:[#allocation4 + $0x28] sm:$0x1]  ;;  %v377_v18 = vld [vmem:[#allocation4 + $0x29] sm:$0x1]  ;;  %v838_v13 = vmax.f32 %v3027_v34, %v3075_v6 }
  0x3d   :  { %v136_v17 = vld [vmem:[#allocation4 + $0x28] sm:$0x1]  ;;  %1061 = vst [vmem:[#allocation2 + $0x14] sm:$0x1] %v835_v4  ;;  %1062 = vst [vmem:[#allocation2 + $0x15] sm:$0x1] %v836_v5  ;;  %v839_v19 = vmax.f32 %v3030_v40, %v3077_v9  ;;  %v3087_v20 = vmax.f32 %v135_v12, %v376_v16 }
  0x3e   :  { %v3089_v22 = vmax.f32 %v136_v17, %v377_v18  ;;  %v137_v23 = vld [vmem:[#allocation4 + $0x29] sm:$0x1]  ;;  %v378_v24 = vld [vmem:[#allocation4 + $0x2a] sm:$0x1]  ;;  %1063 = vst [vmem:[#allocation2 + $0x16] sm:$0x1] %v837_v8  ;;  %v840_v25 = vmax.f32 %v3034_v50, %v3081_v15 }
  0x3f   :  { %v138_v29 = vld [vmem:[#allocation4 + $0x2a] sm:$0x1]  ;;  %v3093_v26 = vmax.f32 %v137_v23, %v378_v24  ;;  %v379_v27 = vld [vmem:[#allocation4 + $0x2b] sm:$0x1]  ;;  %v380_v30 = vld [vmem:[#allocation4 + $0x2c] sm:$0x1]  ;;  %v841_v34 = vmax.f32 %v3036_v55, %v3087_v20 }
  0x40   :  { %v139_v28 = vld [vmem:[#allocation4 + $0x2b] sm:$0x1]  ;;  %1064 = vst [vmem:[#allocation2 + $0x17] sm:$0x1] %v838_v13  ;;  %1065 = vst [vmem:[#allocation2 + $0x18] sm:$0x1] %v839_v19  ;;  %v842_v40 = vmax.f32 %v3039_v61, %v3089_v22  ;;  %v3099_v31 = vmax.f32 %v138_v29, %v379_v27 }
  0x41   :  { %v3101_v33 = vmax.f32 %v139_v28, %v380_v30  ;;  %v140_v35 = vld [vmem:[#allocation4 + $0x2c] sm:$0x1]  ;;  %v381_v36 = vld [vmem:[#allocation4 + $0x2d] sm:$0x1]  ;;  %1066 = vst [vmem:[#allocation2 + $0x19] sm:$0x1] %v840_v25  ;;  %v843_v37 = vmax.f32 %v3043_v7, %v3093_v26 }
  0x42   :  { %v141_v50 = vld [vmem:[#allocation4 + $0x2d] sm:$0x1]  ;;  %v3105_v39 = vmax.f32 %v140_v35, %v381_v36  ;;  %v382_v41 = vld [vmem:[#allocation4 + $0x2e] sm:$0x1]  ;;  %v383_v43 = vld [vmem:[#allocation4 + $0x2f] sm:$0x1]  ;;  %v844_v55 = vmax.f32 %v3045_v14, %v3099_v31 }
  0x43   :  { %v142_v42 = vld [vmem:[#allocation4 + $0x2e] sm:$0x1]  ;;  %1067 = vst [vmem:[#allocation2 + $0x1a] sm:$0x1] %v841_v34  ;;  %1068 = vst [vmem:[#allocation2 + $0x1b] sm:$0x1] %v842_v40  ;;  %v845_v61 = vmax.f32 %v3048_v21, %v3101_v33  ;;  %v3111_v44 = vmax.f32 %v141_v50, %v382_v41 }
  0x44   :  { %v3113_v46 = vmax.f32 %v142_v42, %v383_v43  ;;  %v143_v47 = vld [vmem:[#allocation4 + $0x30] sm:$0x1]  ;;  %v384_v48 = vld [vmem:[#allocation4 + $0x31] sm:$0x1]  ;;  %1069 = vst [vmem:[#allocation2 + $0x1c] sm:$0x1] %v843_v37  ;;  %v846_v49 = vmax.f32 %v3052_v32, %v3105_v39 }
  0x45   :  { %v144_v7 = vld [vmem:[#allocation4 + $0x31] sm:$0x1]  ;;  %v3117_v52 = vmax.f32 %v143_v47, %v384_v48  ;;  %v385_v53 = vld [vmem:[#allocation4 + $0x32] sm:$0x1]  ;;  %v386_v56 = vld [vmem:[#allocation4 + $0x33] sm:$0x1]  ;;  %v847_v14 = vmax.f32 %v3054_v38, %v3111_v44 }
  0x46   :  { %v145_v54 = vld [vmem:[#allocation4 + $0x32] sm:$0x1]  ;;  %1070 = vst [vmem:[#allocation2 + $0x1d] sm:$0x1] %v844_v55  ;;  %1071 = vst [vmem:[#allocation2 + $0x1e] sm:$0x1] %v845_v61  ;;  %v848_v21 = vmax.f32 %v3057_v45, %v3113_v46  ;;  %v3123_v59 = vmax.f32 %v144_v7, %v385_v53 }
  0x47   :  { %v3125_v60 = vmax.f32 %v145_v54, %v386_v56  ;;  %v146_v62 = vld [vmem:[#allocation4 + $0x33] sm:$0x1]  ;;  %v387_v63 = vld [vmem:[#allocation4 + $0x34] sm:$0x1]  ;;  %1072 = vst [vmem:[#allocation2 + $0x1f] sm:$0x1] %v846_v49  ;;  %v849_v1 = vmax.f32 %v3060_v51, %v3117_v52 }
  0x48   :  { %v147_v32 = vld [vmem:[#allocation4 + $0x34] sm:$0x1]  ;;  %v3129_v2 = vmax.f32 %v146_v62, %v387_v63  ;;  %v388_v3 = vld [vmem:[#allocation4 + $0x35] sm:$0x1]  ;;  %v389_v5 = vld [vmem:[#allocation4 + $0x36] sm:$0x1]  ;;  %v850_v38 = vmax.f32 %v3063_v57, %v3123_v59 }
  0x49   :  { %v148_v4 = vld [vmem:[#allocation4 + $0x35] sm:$0x1]  ;;  %1073 = vst [vmem:[#allocation2 + $0x20] sm:$0x1] %v847_v14  ;;  %1074 = vst [vmem:[#allocation2 + $0x21] sm:$0x1] %v848_v21  ;;  %v851_v45 = vmax.f32 %v3065_v58, %v3125_v60  ;;  %v3135_v10 = vmax.f32 %v147_v32, %v388_v3 }
  0x4a   :  { %v3137_v11 = vmax.f32 %v148_v4, %v389_v5  ;;  %v149_v12 = vld [vmem:[#allocation4 + $0x36] sm:$0x1]  ;;  %v390_v8 = vld [vmem:[#allocation4 + $0x37] sm:$0x1]  ;;  %1075 = vst [vmem:[#allocation2 + $0x25] sm:$0x1] %v849_v1  ;;  %v852_v16 = vmax.f32 %v3069_v0, %v3129_v2 }
  0x4b   :  { %v150_v51 = vld [vmem:[#allocation4 + $0x37] sm:$0x1]  ;;  %v3141_v17 = vmax.f32 %v149_v12, %v390_v8  ;;  %v391_v18 = vld [vmem:[#allocation4 + $0x38] sm:$0x1]  ;;  %v392_v19 = vld [vmem:[#allocation4 + $0x39] sm:$0x1]  ;;  %v853_v57 = vmax.f32 %v3075_v6, %v3135_v10 }
  0x4c   :  { %v151_v13 = vld [vmem:[#allocation4 + $0x38] sm:$0x1]  ;;  %1076 = vst [vmem:[#allocation2 + $0x26] sm:$0x1] %v850_v38  ;;  %1077 = vst [vmem:[#allocation2 + $0x27] sm:$0x1] %v851_v45  ;;  %v854_v58 = vmax.f32 %v3077_v9, %v3137_v11  ;;  %v3147_v23 = vmax.f32 %v150_v51, %v391_v18 }
  0x4d   :  { %v3149_v24 = vmax.f32 %v151_v13, %v392_v19  ;;  %v152_v29 = vld [vmem:[#allocation4 + $0x39] sm:$0x1]  ;;  %v393_v25 = vld [vmem:[#allocation4 + $0x3a] sm:$0x1]  ;;  %1078 = vst [vmem:[#allocation2 + $0x28] sm:$0x1] %v852_v16  ;;  %v855_v27 = vmax.f32 %v3081_v15, %v3141_v17 }
  0x4e   :  { %v153_v0 = vld [vmem:[#allocation4 + $0x3a] sm:$0x1]  ;;  %v3153_v28 = vmax.f32 %v152_v29, %v393_v25  ;;  %v394_v30 = vld [vmem:[#allocation4 + $0x3b] sm:$0x1]  ;;  %v395_v40 = vld [vmem:[#allocation4 + $0x3c] sm:$0x1]  ;;  %v856_v6 = vmax.f32 %v3087_v20, %v3147_v23 }
  0x4f   :  { %v154_v34 = vld [vmem:[#allocation4 + $0x3b] sm:$0x1]  ;;  %1079 = vst [vmem:[#allocation2 + $0x29] sm:$0x1] %v853_v57  ;;  %1080 = vst [vmem:[#allocation2 + $0x2a] sm:$0x1] %v854_v58  ;;  %v857_v9 = vmax.f32 %v3089_v22, %v3149_v24  ;;  %v3159_v35 = vmax.f32 %v153_v0, %v394_v30 }
  0x50   :  { %v3161_v36 = vmax.f32 %v154_v34, %v395_v40  ;;  %v155_v50 = vld [vmem:[#allocation4 + $0x3c] sm:$0x1]  ;;  %v396_v37 = vld [vmem:[#allocation4 + $0x3d] sm:$0x1]  ;;  %1081 = vst [vmem:[#allocation2 + $0x2b] sm:$0x1] %v855_v27  ;;  %v858_v41 = vmax.f32 %v3093_v26, %v3153_v28 }
  0x51   :  { %v156_v15 = vld [vmem:[#allocation4 + $0x3d] sm:$0x1]  ;;  %v3165_v42 = vmax.f32 %v155_v50, %v396_v37  ;;  %v397_v43 = vld [vmem:[#allocation4 + $0x3e] sm:$0x1]  ;;  %v398_v61 = vld [vmem:[#allocation4 + $0x3f] sm:$0x1]  ;;  %v859_v20 = vmax.f32 %v3099_v31, %v3159_v35 }
  0x52   :  { %v157_v55 = vld [vmem:[#allocation4 + $0x3e] sm:$0x1]  ;;  %1082 = vst [vmem:[#allocation2 + $0x2c] sm:$0x1] %v856_v6  ;;  %1083 = vst [vmem:[#allocation2 + $0x2d] sm:$0x1] %v857_v9  ;;  %v860_v22 = vmax.f32 %v3101_v33, %v3161_v36  ;;  %v3171_v47 = vmax.f32 %v156_v15, %v397_v43 }
  0x53   :  { %v3173_v48 = vmax.f32 %v157_v55, %v398_v61  ;;  %v158_v7 = vld [vmem:[#allocation4 + $0x40] sm:$0x1]  ;;  %v399_v49 = vld [vmem:[#allocation4 + $0x41] sm:$0x1]  ;;  %1084 = vst [vmem:[#allocation2 + $0x2e] sm:$0x1] %v858_v41  ;;  %v861_v53 = vmax.f32 %v3105_v39, %v3165_v42 }
  0x54   :  { %v159_v26 = vld [vmem:[#allocation4 + $0x41] sm:$0x1]  ;;  %v3177_v54 = vmax.f32 %v158_v7, %v399_v49  ;;  %v400_v56 = vld [vmem:[#allocation4 + $0x42] sm:$0x1]  ;;  %v401_v21 = vld [vmem:[#allocation4 + $0x43] sm:$0x1]  ;;  %v862_v31 = vmax.f32 %v3111_v44, %v3171_v47 }
  0x55   :  { %v160_v14 = vld [vmem:[#allocation4 + $0x42] sm:$0x1]  ;;  %1085 = vst [vmem:[#allocation2 + $0x2f] sm:$0x1] %v859_v20  ;;  %1086 = vst [vmem:[#allocation2 + $0x30] sm:$0x1] %v860_v22  ;;  %v863_v33 = vmax.f32 %v3113_v46, %v3173_v48  ;;  %v3183_v62 = vmax.f32 %v159_v26, %v400_v56 }
  0x56   :  { %v3185_v63 = vmax.f32 %v160_v14, %v401_v21  ;;  %v161_v32 = vld [vmem:[#allocation4 + $0x43] sm:$0x1]  ;;  %v402_v1 = vld [vmem:[#allocation4 + $0x44] sm:$0x1]  ;;  %1087 = vst [vmem:[#allocation2 + $0x31] sm:$0x1] %v861_v53  ;;  %v864_v3 = vmax.f32 %v3117_v52, %v3177_v54 }
  0x57   :  { %v162_v39 = vld [vmem:[#allocation4 + $0x44] sm:$0x1]  ;;  %v3189_v4 = vmax.f32 %v161_v32, %v402_v1  ;;  %v403_v5 = vld [vmem:[#allocation4 + $0x45] sm:$0x1]  ;;  %v404_v45 = vld [vmem:[#allocation4 + $0x46] sm:$0x1]  ;;  %v865_v44 = vmax.f32 %v3123_v59, %v3183_v62 }
  0x58   :  { %v163_v38 = vld [vmem:[#allocation4 + $0x45] sm:$0x1]  ;;  %1088 = vst [vmem:[#allocation2 + $0x32] sm:$0x1] %v862_v31  ;;  %1089 = vst [vmem:[#allocation2 + $0x33] sm:$0x1] %v863_v33  ;;  %v866_v46 = vmax.f32 %v3125_v60, %v3185_v63  ;;  %v3195_v12 = vmax.f32 %v162_v39, %v403_v5 }
  0x59   :  { %v3197_v8 = vmax.f32 %v163_v38, %v404_v45  ;;  %v164_v51 = vld [vmem:[#allocation4 + $0x46] sm:$0x1]  ;;  %v405_v16 = vld [vmem:[#allocation4 + $0x47] sm:$0x1]  ;;  %1090 = vst [vmem:[#allocation2 + $0x37] sm:$0x1] %v864_v3  ;;  %v867_v18 = vmax.f32 %v3129_v2, %v3189_v4 }
  0x5a   :  { %v165_v52 = vld [vmem:[#allocation4 + $0x47] sm:$0x1]  ;;  %v3201_v13 = vmax.f32 %v164_v51, %v405_v16  ;;  %v406_v19 = vld [vmem:[#allocation4 + $0x48] sm:$0x1]  ;;  %v407_v58 = vld [vmem:[#allocation4 + $0x49] sm:$0x1]  ;;  %v868_v59 = vmax.f32 %v3135_v10, %v3195_v12 }
  0x5b   :  { %v166_v57 = vld [vmem:[#allocation4 + $0x48] sm:$0x1]  ;;  %1091 = vst [vmem:[#allocation2 + $0x38] sm:$0x1] %v865_v44  ;;  %1092 = vst [vmem:[#allocation2 + $0x39] sm:$0x1] %v866_v46  ;;  %v869_v60 = vmax.f32 %v3137_v11, %v3197_v8  ;;  %v3207_v29 = vmax.f32 %v165_v52, %v406_v19 }
  0x5c   :  { %v3209_v25 = vmax.f32 %v166_v57, %v407_v58  ;;  %v167_v0 = vld [vmem:[#allocation4 + $0x49] sm:$0x1]  ;;  %v408_v27 = vld [vmem:[#allocation4 + $0x4a] sm:$0x1]  ;;  %1093 = vst [vmem:[#allocation2 + $0x3a] sm:$0x1] %v867_v18  ;;  %v870_v30 = vmax.f32 %v3141_v17, %v3201_v13 }
  0x5d   :  { %v168_v2 = vld [vmem:[#allocation4 + $0x4a] sm:$0x1]  ;;  %v3213_v34 = vmax.f32 %v167_v0, %v408_v27  ;;  %v409_v40 = vld [vmem:[#allocation4 + $0x4b] sm:$0x1]  ;;  %v410_v9 = vld [vmem:[#allocation4 + $0x4c] sm:$0x1]  ;;  %v871_v10 = vmax.f32 %v3147_v23, %v3207_v29 }
  0x5e   :  { %v169_v6 = vld [vmem:[#allocation4 + $0x4b] sm:$0x1]  ;;  %1094 = vst [vmem:[#allocation2 + $0x3b] sm:$0x1] %v868_v59  ;;  %1095 = vst [vmem:[#allocation2 + $0x3c] sm:$0x1] %v869_v60  ;;  %v872_v11 = vmax.f32 %v3149_v24, %v3209_v25  ;;  %v3219_v50 = vmax.f32 %v168_v2, %v409_v40 }
  0x5f   :  { %v3221_v37 = vmax.f32 %v169_v6, %v410_v9  ;;  %v170_v15 = vld [vmem:[#allocation4 + $0x4c] sm:$0x1]  ;;  %v411_v41 = vld [vmem:[#allocation4 + $0x4d] sm:$0x1]  ;;  %1096 = vst [vmem:[#allocation2 + $0x3d] sm:$0x1] %v870_v30  ;;  %v873_v43 = vmax.f32 %v3153_v28, %v3213_v34 }
  0x60   :  { %v171_v17 = vld [vmem:[#allocation4 + $0x4d] sm:$0x1]  ;;  %v3225_v55 = vmax.f32 %v170_v15, %v411_v41  ;;  %v412_v61 = vld [vmem:[#allocation4 + $0x4e] sm:$0x1]  ;;  %v413_v22 = vld [vmem:[#allocation4 + $0x4f] sm:$0x1]  ;;  %v874_v23 = vmax.f32 %v3159_v35, %v3219_v50 }
  0x61   :  { %v172_v20 = vld [vmem:[#allocation4 + $0x4e] sm:$0x1]  ;;  %1097 = vst [vmem:[#allocation2 + $0x3e] sm:$0x1] %v871_v10  ;;  %1098 = vst [vmem:[#allocation2 + $0x3f] sm:$0x1] %v872_v11  ;;  %v875_v24 = vmax.f32 %v3161_v36, %v3221_v37  ;;  %v3231_v7 = vmax.f32 %v171_v17, %v412_v61 }
  0x62   :  { %v3233_v49 = vmax.f32 %v172_v20, %v413_v22  ;;  %v173_v26 = vld [vmem:[#allocation4 + $0x50] sm:$0x1]  ;;  %v414_v53 = vld [vmem:[#allocation4 + $0x51] sm:$0x1]  ;;  %1099 = vst [vmem:[#allocation2 + $0x40] sm:$0x1] %v873_v43  ;;  %v876_v56 = vmax.f32 %v3165_v42, %v3225_v55 }
  0x63   :  { %v174_v28 = vld [vmem:[#allocation4 + $0x51] sm:$0x1]  ;;  %v3237_v14 = vmax.f32 %v173_v26, %v414_v53  ;;  %v415_v21 = vld [vmem:[#allocation4 + $0x52] sm:$0x1]  ;;  %v416_v33 = vld [vmem:[#allocation4 + $0x53] sm:$0x1]  ;;  %v877_v35 = vmax.f32 %v3171_v47, %v3231_v7 }
  0x64   :  { %v175_v31 = vld [vmem:[#allocation4 + $0x52] sm:$0x1]  ;;  %1100 = vst [vmem:[#allocation2 + $0x41] sm:$0x1] %v874_v23  ;;  %1101 = vst [vmem:[#allocation2 + $0x42] sm:$0x1] %v875_v24  ;;  %v878_v36 = vmax.f32 %v3173_v48, %v3233_v49  ;;  %v3243_v32 = vmax.f32 %v174_v28, %v415_v21 }
  0x65   :  { %v3245_v1 = vmax.f32 %v175_v31, %v416_v33  ;;  %v176_v39 = vld [vmem:[#allocation4 + $0x53] sm:$0x1]  ;;  %v417_v3 = vld [vmem:[#allocation4 + $0x54] sm:$0x1]  ;;  %1102 = vst [vmem:[#allocation2 + $0x43] sm:$0x1] %v876_v56  ;;  %v879_v5 = vmax.f32 %v3177_v54, %v3237_v14 }
  0x66   :  { %v177_v42 = vld [vmem:[#allocation4 + $0x54] sm:$0x1]  ;;  %v3249_v38 = vmax.f32 %v176_v39, %v417_v3  ;;  %v418_v45 = vld [vmem:[#allocation4 + $0x55] sm:$0x1]  ;;  %v419_v46 = vld [vmem:[#allocation4 + $0x56] sm:$0x1]  ;;  %v880_v47 = vmax.f32 %v3183_v62, %v3243_v32 }
  0x67   :  { %v178_v44 = vld [vmem:[#allocation4 + $0x55] sm:$0x1]  ;;  %1103 = vst [vmem:[#allocation2 + $0x44] sm:$0x1] %v877_v35  ;;  %1104 = vst [vmem:[#allocation2 + $0x45] sm:$0x1] %v878_v36  ;;  %v881_v48 = vmax.f32 %v3185_v63, %v3245_v1  ;;  %v3255_v51 = vmax.f32 %v177_v42, %v418_v45 }
  0x68   :  { %v3257_v16 = vmax.f32 %v178_v44, %v419_v46  ;;  %v179_v52 = vld [vmem:[#allocation4 + $0x56] sm:$0x1]  ;;  %v420_v18 = vld [vmem:[#allocation4 + $0x57] sm:$0x1]  ;;  %1105 = vst [vmem:[#allocation2 + $0x49] sm:$0x1] %v879_v5  ;;  %v882_v19 = vmax.f32 %v3189_v4, %v3249_v38 }
  0x69   :  { %v180_v54 = vld [vmem:[#allocation4 + $0x57] sm:$0x1]  ;;  %v3261_v57 = vmax.f32 %v179_v52, %v420_v18  ;;  %v421_v58 = vld [vmem:[#allocation4 + $0x58] sm:$0x1]  ;;  %v422_v60 = vld [vmem:[#allocation4 + $0x59] sm:$0x1]  ;;  %v883_v62 = vmax.f32 %v3195_v12, %v3255_v51 }
  0x6a   :  { %v181_v59 = vld [vmem:[#allocation4 + $0x58] sm:$0x1]  ;;  %1106 = vst [vmem:[#allocation2 + $0x4a] sm:$0x1] %v880_v47  ;;  %1107 = vst [vmem:[#allocation2 + $0x4b] sm:$0x1] %v881_v48  ;;  %v884_v63 = vmax.f32 %v3197_v8, %v3257_v16  ;;  %v3267_v0 = vmax.f32 %v180_v54, %v421_v58 }
  0x6b   :  { %v3269_v27 = vmax.f32 %v181_v59, %v422_v60  ;;  %v182_v2 = vld [vmem:[#allocation4 + $0x59] sm:$0x1]  ;;  %v423_v30 = vld [vmem:[#allocation4 + $0x5a] sm:$0x1]  ;;  %1108 = vst [vmem:[#allocation2 + $0x4c] sm:$0x1] %v882_v19  ;;  %v885_v40 = vmax.f32 %v3201_v13, %v3261_v57 }
  0x6c   :  { %v183_v4 = vld [vmem:[#allocation4 + $0x5a] sm:$0x1]  ;;  %v3273_v6 = vmax.f32 %v182_v2, %v423_v30  ;;  %v424_v9 = vld [vmem:[#allocation4 + $0x5b] sm:$0x1]  ;;  %v425_v11 = vld [vmem:[#allocation4 + $0x5c] sm:$0x1]  ;;  %v886_v12 = vmax.f32 %v3207_v29, %v3267_v0 }
  0x6d   :  { %v184_v10 = vld [vmem:[#allocation4 + $0x5b] sm:$0x1]  ;;  %1109 = vst [vmem:[#allocation2 + $0x4d] sm:$0x1] %v883_v62  ;;  %1110 = vst [vmem:[#allocation2 + $0x4e] sm:$0x1] %v884_v63  ;;  %v887_v8 = vmax.f32 %v3209_v25, %v3269_v27  ;;  %v3279_v15 = vmax.f32 %v183_v4, %v424_v9 }
  0x6e   :  { %v3281_v41 = vmax.f32 %v184_v10, %v425_v11  ;;  %v185_v17 = vld [vmem:[#allocation4 + $0x5c] sm:$0x1]  ;;  %v426_v43 = vld [vmem:[#allocation4 + $0x5d] sm:$0x1]  ;;  %1111 = vst [vmem:[#allocation2 + $0x4f] sm:$0x1] %v885_v40  ;;  %v888_v61 = vmax.f32 %v3213_v34, %v3273_v6 }
  0x6f   :  { %v186_v13 = vld [vmem:[#allocation4 + $0x5d] sm:$0x1]  ;;  %v3285_v20 = vmax.f32 %v185_v17, %v426_v43  ;;  %v427_v22 = vld [vmem:[#allocation4 + $0x5e] sm:$0x1]  ;;  %v428_v24 = vld [vmem:[#allocation4 + $0x5f] sm:$0x1]  ;;  %v889_v29 = vmax.f32 %v3219_v50, %v3279_v15 }
  0x70   :  { %v187_v23 = vld [vmem:[#allocation4 + $0x5e] sm:$0x1]  ;;  %1112 = vst [vmem:[#allocation2 + $0x50] sm:$0x1] %v886_v12  ;;  %1113 = vst [vmem:[#allocation2 + $0x51] sm:$0x1] %v887_v8  ;;  %v890_v25 = vmax.f32 %v3221_v37, %v3281_v41  ;;  %v3291_v26 = vmax.f32 %v186_v13, %v427_v22 }
  0x71   :  { %v3293_v53 = vmax.f32 %v187_v23, %v428_v24  ;;  %v188_v28 = vld [vmem:[#allocation4 + $0x60] sm:$0x1]  ;;  %v429_v56 = vld [vmem:[#allocation4 + $0x61] sm:$0x1]  ;;  %1114 = vst [vmem:[#allocation2 + $0x52] sm:$0x1] %v888_v61  ;;  %v891_v21 = vmax.f32 %v3225_v55, %v3285_v20 }
  0x72   :  { %v189_v34 = vld [vmem:[#allocation4 + $0x61] sm:$0x1]  ;;  %v3297_v31 = vmax.f32 %v188_v28, %v429_v56  ;;  %v430_v33 = vld [vmem:[#allocation4 + $0x62] sm:$0x1]  ;;  %v431_v36 = vld [vmem:[#allocation4 + $0x63] sm:$0x1]  ;;  %v892_v50 = vmax.f32 %v3231_v7, %v3291_v26 }
  0x73   :  { %v190_v35 = vld [vmem:[#allocation4 + $0x62] sm:$0x1]  ;;  %1115 = vst [vmem:[#allocation2 + $0x53] sm:$0x1] %v889_v29  ;;  %1116 = vst [vmem:[#allocation2 + $0x54] sm:$0x1] %v890_v25  ;;  %v893_v37 = vmax.f32 %v3233_v49, %v3293_v53  ;;  %v3303_v39 = vmax.f32 %v189_v34, %v430_v33 }
  0x74   :  { %v3305_v3 = vmax.f32 %v190_v35, %v431_v36  ;;  %v191_v42 = vld [vmem:[#allocation4 + $0x63] sm:$0x1]  ;;  %v432_v5 = vld [vmem:[#allocation4 + $0x64] sm:$0x1]  ;;  %1117 = vst [vmem:[#allocation2 + $0x55] sm:$0x1] %v891_v21  ;;  %v894_v45 = vmax.f32 %v3237_v14, %v3297_v31 }
  0x75   :  { %v192_v55 = vld [vmem:[#allocation4 + $0x64] sm:$0x1]  ;;  %v3309_v44 = vmax.f32 %v191_v42, %v432_v5  ;;  %v433_v46 = vld [vmem:[#allocation4 + $0x65] sm:$0x1]  ;;  %v434_v48 = vld [vmem:[#allocation4 + $0x66] sm:$0x1]  ;;  %v895_v7 = vmax.f32 %v3243_v32, %v3303_v39 }
  0x76   :  { %v193_v47 = vld [vmem:[#allocation4 + $0x65] sm:$0x1]  ;;  %1118 = vst [vmem:[#allocation2 + $0x56] sm:$0x1] %v892_v50  ;;  %1119 = vst [vmem:[#allocation2 + $0x57] sm:$0x1] %v893_v37  ;;  %v896_v49 = vmax.f32 %v3245_v1, %v3305_v3  ;;  %v3315_v52 = vmax.f32 %v192_v55, %v433_v46 }
  0x77   :  { %v3317_v18 = vmax.f32 %v193_v47, %v434_v48  ;;  %v194_v54 = vld [vmem:[#allocation4 + $0x66] sm:$0x1]  ;;  %v435_v19 = vld [vmem:[#allocation4 + $0x67] sm:$0x1]  ;;  %1120 = vst [vmem:[#allocation2 + $0x5b] sm:$0x1] %v894_v45  ;;  %v897_v58 = vmax.f32 %v3249_v38, %v3309_v44 }
  0x78   :  { %v195_v14 = vld [vmem:[#allocation4 + $0x67] sm:$0x1]  ;;  %v3321_v59 = vmax.f32 %v194_v54, %v435_v19  ;;  %v436_v60 = vld [vmem:[#allocation4 + $0x68] sm:$0x1]  ;;  %v437_v63 = vld [vmem:[#allocation4 + $0x69] sm:$0x1]  ;;  %v898_v32 = vmax.f32 %v3255_v51, %v3315_v52 }
  0x79   :  { %v196_v62 = vld [vmem:[#allocation4 + $0x68] sm:$0x1]  ;;  %1121 = vst [vmem:[#allocation2 + $0x5c] sm:$0x1] %v895_v7  ;;  %1122 = vst [vmem:[#allocation2 + $0x5d] sm:$0x1] %v896_v49  ;;  %v899_v1 = vmax.f32 %v3257_v16, %v3317_v18  ;;  %v3327_v2 = vmax.f32 %v195_v14, %v436_v60 }
  0x7a   :  { %v3329_v30 = vmax.f32 %v196_v62, %v437_v63  ;;  %v197_v4 = vld [vmem:[#allocation4 + $0x69] sm:$0x1]  ;;  %v438_v40 = vld [vmem:[#allocation4 + $0x6a] sm:$0x1]  ;;  %1123 = vst [vmem:[#allocation2 + $0x5e] sm:$0x1] %v897_v58  ;;  %v900_v9 = vmax.f32 %v3261_v57, %v3321_v59 }
  0x7b   :  { %v198_v38 = vld [vmem:[#allocation4 + $0x6a] sm:$0x1]  ;;  %v3333_v10 = vmax.f32 %v197_v4, %v438_v40  ;;  %v439_v11 = vld [vmem:[#allocation4 + $0x6b] sm:$0x1]  ;;  %v440_v8 = vld [vmem:[#allocation4 + $0x6c] sm:$0x1]  ;;  %v901_v51 = vmax.f32 %v3267_v0, %v3327_v2 }
  0x7c   :  { %v199_v12 = vld [vmem:[#allocation4 + $0x6b] sm:$0x1]  ;;  %1124 = vst [vmem:[#allocation2 + $0x5f] sm:$0x1] %v898_v32  ;;  %1125 = vst [vmem:[#allocation2 + $0x60] sm:$0x1] %v899_v1  ;;  %v902_v16 = vmax.f32 %v3269_v27, %v3329_v30  ;;  %v3339_v17 = vmax.f32 %v198_v38, %v439_v11 }
  0x7d   :  { %v3341_v43 = vmax.f32 %v199_v12, %v440_v8  ;;  %v200_v13 = vld [vmem:[#allocation4 + $0x6c] sm:$0x1]  ;;  %v441_v61 = vld [vmem:[#allocation4 + $0x6d] sm:$0x1]  ;;  %1126 = vst [vmem:[#allocation2 + $0x61] sm:$0x1] %v900_v9  ;;  %v903_v22 = vmax.f32 %v3273_v6, %v3333_v10 }
  0x7e   :  { %v201_v57 = vld [vmem:[#allocation4 + $0x6d] sm:$0x1]  ;;  %v3345_v23 = vmax.f32 %v200_v13, %v441_v61  ;;  %v442_v24 = vld [vmem:[#allocation4 + $0x6e] sm:$0x1]  ;;  %v443_v25 = vld [vmem:[#allocation4 + $0x6f] sm:$0x1]  ;;  %v904_v0 = vmax.f32 %v3279_v15, %v3339_v17 }
  0x7f   :  { %v202_v29 = vld [vmem:[#allocation4 + $0x6e] sm:$0x1]  ;;  %1127 = vst [vmem:[#allocation2 + $0x62] sm:$0x1] %v901_v51  ;;  %1128 = vst [vmem:[#allocation2 + $0x63] sm:$0x1] %v902_v16  ;;  %v905_v27 = vmax.f32 %v3281_v41, %v3341_v43  ;;  %v3351_v28 = vmax.f32 %v201_v57, %v442_v24 }
  0x80   :  { %v3353_v56 = vmax.f32 %v202_v29, %v443_v25  ;;  %v203_v34 = vld [vmem:[#allocation4 + $0x70] sm:$0x1]  ;;  %v444_v21 = vld [vmem:[#allocation4 + $0x71] sm:$0x1]  ;;  %1129 = vst [vmem:[#allocation2 + $0x64] sm:$0x1] %v903_v22  ;;  %v906_v33 = vmax.f32 %v3285_v20, %v3345_v23 }
  0x81   :  { %v204_v6 = vld [vmem:[#allocation4 + $0x71] sm:$0x1]  ;;  %v3357_v35 = vmax.f32 %v203_v34, %v444_v21  ;;  %v445_v36 = vld [vmem:[#allocation4 + $0x72] sm:$0x1]  ;;  %v446_v37 = vld [vmem:[#allocation4 + $0x73] sm:$0x1]  ;;  %v907_v15 = vmax.f32 %v3291_v26, %v3351_v28 }
  0x82   :  { %v205_v50 = vld [vmem:[#allocation4 + $0x72] sm:$0x1]  ;;  %1130 = vst [vmem:[#allocation2 + $0x65] sm:$0x1] %v904_v0  ;;  %1131 = vst [vmem:[#allocation2 + $0x66] sm:$0x1] %v905_v27  ;;  %v908_v41 = vmax.f32 %v3293_v53, %v3353_v56  ;;  %v3363_v42 = vmax.f32 %v204_v6, %v445_v36 }
  0x83   :  { %v3365_v5 = vmax.f32 %v205_v50, %v446_v37  ;;  %v206_v55 = vld [vmem:[#allocation4 + $0x73] sm:$0x1]  ;;  %v447_v45 = vld [vmem:[#allocation4 + $0x74] sm:$0x1]  ;;  %1132 = vst [vmem:[#allocation2 + $0x67] sm:$0x1] %v906_v33  ;;  %v909_v46 = vmax.f32 %v3297_v31, %v3357_v35 }
  0x84   :  { %v207_v20 = vld [vmem:[#allocation4 + $0x74] sm:$0x1]  ;;  %v3369_v47 = vmax.f32 %v206_v55, %v447_v45  ;;  %v448_v48 = vld [vmem:[#allocation4 + $0x75] sm:$0x1]  ;;  %v449_v49 = vld [vmem:[#allocation4 + $0x76] sm:$0x1]  ;;  %v910_v26 = vmax.f32 %v3303_v39, %v3363_v42 }
  0x85   :  { %v208_v7 = vld [vmem:[#allocation4 + $0x75] sm:$0x1]  ;;  %1133 = vst [vmem:[#allocation2 + $0x68] sm:$0x1] %v907_v15  ;;  %1134 = vst [vmem:[#allocation2 + $0x69] sm:$0x1] %v908_v41  ;;  %v911_v53 = vmax.f32 %v3305_v3, %v3365_v5  ;;  %v3375_v54 = vmax.f32 %v207_v20, %v448_v48 }
  0x86   :  { %v3377_v19 = vmax.f32 %v208_v7, %v449_v49  ;;  %v209_v14 = vld [vmem:[#allocation4 + $0x76] sm:$0x1]  ;;  %v450_v58 = vld [vmem:[#allocation4 + $0x77] sm:$0x1]  ;;  %1135 = vst [vmem:[#allocation2 + $0x6d] sm:$0x1] %v909_v46  ;;  %v912_v60 = vmax.f32 %v3309_v44, %v3369_v47 }
  0x87   :  { %v210_v31 = vld [vmem:[#allocation4 + $0x77] sm:$0x1]  ;;  %v3381_v62 = vmax.f32 %v209_v14, %v450_v58  ;;  %v451_v63 = vld [vmem:[#allocation4 + $0x78] sm:$0x1]  ;;  %v452_v1 = vld [vmem:[#allocation4 + $0x79] sm:$0x1]  ;;  %v913_v39 = vmax.f32 %v3315_v52, %v3375_v54 }
  0x88   :  { %v211_v32 = vld [vmem:[#allocation4 + $0x78] sm:$0x1]  ;;  %1136 = vst [vmem:[#allocation2 + $0x6e] sm:$0x1] %v910_v26  ;;  %1137 = vst [vmem:[#allocation2 + $0x6f] sm:$0x1] %v911_v53  ;;  %v914_v3 = vmax.f32 %v3317_v18, %v3377_v19  ;;  %v3387_v4 = vmax.f32 %v210_v31, %v451_v63 }
  0x89   :  { %v3389_v40 = vmax.f32 %v211_v32, %v452_v1  ;;  %v212_v38 = vld [vmem:[#allocation4 + $0x79] sm:$0x1]  ;;  %v453_v9 = vld [vmem:[#allocation4 + $0x7a] sm:$0x1]  ;;  %1138 = vst [vmem:[#allocation2 + $0x70] sm:$0x1] %v912_v60  ;;  %v915_v11 = vmax.f32 %v3321_v59, %v3381_v62 }
  0x8a   :  { %v213_v44 = vld [vmem:[#allocation4 + $0x7a] sm:$0x1]  ;;  %v3393_v12 = vmax.f32 %v212_v38, %v453_v9  ;;  %v454_v8 = vld [vmem:[#allocation4 + $0x7b] sm:$0x1]  ;;  %v455_v16 = vld [vmem:[#allocation4 + $0x7c] sm:$0x1]  ;;  %v916_v52 = vmax.f32 %v3327_v2, %v3387_v4 }
  0x8b   :  { %v214_v51 = vld [vmem:[#allocation4 + $0x7b] sm:$0x1]  ;;  %1139 = vst [vmem:[#allocation2 + $0x71] sm:$0x1] %v913_v39  ;;  %1140 = vst [vmem:[#allocation2 + $0x72] sm:$0x1] %v914_v3  ;;  %v917_v18 = vmax.f32 %v3329_v30, %v3389_v40  ;;  %v3399_v13 = vmax.f32 %v213_v44, %v454_v8 }
  0x8c   :  { %v3401_v61 = vmax.f32 %v214_v51, %v455_v16  ;;  %v215_v57 = vld [vmem:[#allocation4 + $0x7c] sm:$0x1]  ;;  %v456_v22 = vld [vmem:[#allocation4 + $0x7d] sm:$0x1]  ;;  %1141 = vst [vmem:[#allocation2 + $0x73] sm:$0x1] %v915_v11  ;;  %v918_v24 = vmax.f32 %v3333_v10, %v3393_v12 }
  0x8d   :  { %v216_v59 = vld [vmem:[#allocation4 + $0x7d] sm:$0x1]  ;;  %v3405_v29 = vmax.f32 %v215_v57, %v456_v22  ;;  %v457_v25 = vld [vmem:[#allocation4 + $0x7e] sm:$0x1]  ;;  %v458_v27 = vld [vmem:[#allocation4 + $0x7f] sm:$0x1]  ;;  %v919_v2 = vmax.f32 %v3339_v17, %v3399_v13 }
  0x8e   :  { %v217_v0 = vld [vmem:[#allocation4 + $0x7e] sm:$0x1]  ;;  %1142 = vst [vmem:[#allocation2 + $0x74] sm:$0x1] %v916_v52  ;;  %1143 = vst [vmem:[#allocation2 + $0x75] sm:$0x1] %v917_v18  ;;  %v920_v30 = vmax.f32 %v3341_v43, %v3401_v61  ;;  %v3411_v34 = vmax.f32 %v216_v59, %v457_v25 }
  0x8f   :  { %v3413_v21 = vmax.f32 %v217_v0, %v458_v27  ;;  %v218_v6 = vld [vmem:[#allocation4 + $0x80] sm:$0x1]  ;;  %v459_v33 = vld [vmem:[#allocation4 + $0x81] sm:$0x1]  ;;  %1144 = vst [vmem:[#allocation2 + $0x76] sm:$0x1] %v918_v24  ;;  %v921_v36 = vmax.f32 %v3345_v23, %v3405_v29 }
  0x90   :  { %v219_v10 = vld [vmem:[#allocation4 + $0x81] sm:$0x1]  ;;  %v3417_v50 = vmax.f32 %v218_v6, %v459_v33  ;;  %v460_v37 = vld [vmem:[#allocation4 + $0x82] sm:$0x1]  ;;  %v461_v41 = vld [vmem:[#allocation4 + $0x83] sm:$0x1]  ;;  %v922_v17 = vmax.f32 %v3351_v28, %v3411_v34 }
  0x91   :  { %v220_v15 = vld [vmem:[#allocation4 + $0x82] sm:$0x1]  ;;  %1145 = vst [vmem:[#allocation2 + $0x77] sm:$0x1] %v919_v2  ;;  %1146 = vst [vmem:[#allocation2 + $0x78] sm:$0x1] %v920_v30  ;;  %v923_v43 = vmax.f32 %v3353_v56, %v3413_v21  ;;  %v3423_v55 = vmax.f32 %v219_v10, %v460_v37 }
  0x92   :  { %v3425_v45 = vmax.f32 %v220_v15, %v461_v41  ;;  %v221_v20 = vld [vmem:[#allocation4 + $0x83] sm:$0x1]  ;;  %v462_v46 = vld [vmem:[#allocation4 + $0x84] sm:$0x1]  ;;  %1147 = vst [vmem:[#allocation2 + $0x79] sm:$0x1] %v921_v36  ;;  %v924_v48 = vmax.f32 %v3357_v35, %v3417_v50 }
  0x93   :  { %v222_v23 = vld [vmem:[#allocation4 + $0x84] sm:$0x1]  ;;  %v3429_v7 = vmax.f32 %v221_v20, %v462_v46  ;;  %v463_v49 = vld [vmem:[#allocation4 + $0x85] sm:$0x1]  ;;  %v464_v53 = vld [vmem:[#allocation4 + $0x86] sm:$0x1]  ;;  %v925_v28 = vmax.f32 %v3363_v42, %v3423_v55 }
  0x94   :  { %v223_v26 = vld [vmem:[#allocation4 + $0x85] sm:$0x1]  ;;  %1148 = vst [vmem:[#allocation2 + $0x7a] sm:$0x1] %v922_v17  ;;  %1149 = vst [vmem:[#allocation2 + $0x7b] sm:$0x1] %v923_v43  ;;  %v926_v56 = vmax.f32 %v3365_v5, %v3425_v45  ;;  %v3435_v14 = vmax.f32 %v222_v23, %v463_v49 }
  0x95   :  { %v3437_v58 = vmax.f32 %v223_v26, %v464_v53  ;;  %v224_v31 = vld [vmem:[#allocation4 + $0x86] sm:$0x1]  ;;  %v465_v60 = vld [vmem:[#allocation4 + $0x87] sm:$0x1]  ;;  %1150 = vst [vmem:[#allocation2 + $0x7f] sm:$0x1] %v924_v48  ;;  %v927_v63 = vmax.f32 %v3369_v47, %v3429_v7 }
  0x96   :  { %v225_v35 = vld [vmem:[#allocation4 + $0x87] sm:$0x1]  ;;  %v3441_v32 = vmax.f32 %v224_v31, %v465_v60  ;;  %v466_v1 = vld [vmem:[#allocation4 + $0x88] sm:$0x1]  ;;  %v467_v3 = vld [vmem:[#allocation4 + $0x89] sm:$0x1]  ;;  %v928_v42 = vmax.f32 %v3375_v54, %v3435_v14 }
  0x97   :  { %v226_v39 = vld [vmem:[#allocation4 + $0x88] sm:$0x1]  ;;  %1151 = vst [vmem:[#allocation2 + $0x80] sm:$0x1] %v925_v28  ;;  %1152 = vst [vmem:[#allocation2 + $0x81] sm:$0x1] %v926_v56  ;;  %v929_v5 = vmax.f32 %v3377_v19, %v3437_v58  ;;  %v3447_v38 = vmax.f32 %v225_v35, %v466_v1 }
  0x98   :  { %v3449_v9 = vmax.f32 %v226_v39, %v467_v3  ;;  %v227_v44 = vld [vmem:[#allocation4 + $0x89] sm:$0x1]  ;;  %v468_v11 = vld [vmem:[#allocation4 + $0x8a] sm:$0x1]  ;;  %1153 = vst [vmem:[#allocation2 + $0x82] sm:$0x1] %v927_v63  ;;  %v930_v8 = vmax.f32 %v3381_v62, %v3441_v32 }
  0x99   :  { %v228_v47 = vld [vmem:[#allocation4 + $0x8a] sm:$0x1]  ;;  %v3453_v51 = vmax.f32 %v227_v44, %v468_v11  ;;  %v469_v16 = vld [vmem:[#allocation4 + $0x8b] sm:$0x1]  ;;  %v470_v18 = vld [vmem:[#allocation4 + $0x8c] sm:$0x1]  ;;  %v931_v54 = vmax.f32 %v3387_v4, %v3447_v38 }
  0x9a   :  { %v229_v52 = vld [vmem:[#allocation4 + $0x8b] sm:$0x1]  ;;  %1154 = vst [vmem:[#allocation2 + $0x83] sm:$0x1] %v928_v42  ;;  %1155 = vst [vmem:[#allocation2 + $0x84] sm:$0x1] %v929_v5  ;;  %v932_v19 = vmax.f32 %v3389_v40, %v3449_v9  ;;  %v3459_v57 = vmax.f32 %v228_v47, %v469_v16 }
  0x9b   :  { %v3461_v22 = vmax.f32 %v229_v52, %v470_v18  ;;  %v230_v59 = vld [vmem:[#allocation4 + $0x8c] sm:$0x1]  ;;  %v471_v24 = vld [vmem:[#allocation4 + $0x8d] sm:$0x1]  ;;  %1156 = vst [vmem:[#allocation2 + $0x85] sm:$0x1] %v930_v8  ;;  %v933_v25 = vmax.f32 %v3393_v12, %v3453_v51 }
  0x9c   :  { %v231_v62 = vld [vmem:[#allocation4 + $0x8d] sm:$0x1]  ;;  %v3465_v0 = vmax.f32 %v230_v59, %v471_v24  ;;  %v472_v27 = vld [vmem:[#allocation4 + $0x8e] sm:$0x1]  ;;  %v473_v30 = vld [vmem:[#allocation4 + $0x8f] sm:$0x1]  ;;  %v934_v4 = vmax.f32 %v3399_v13, %v3459_v57 }
  0x9d   :  { %v232_v2 = vld [vmem:[#allocation4 + $0x8e] sm:$0x1]  ;;  %1157 = vst [vmem:[#allocation2 + $0x86] sm:$0x1] %v931_v54  ;;  %1158 = vst [vmem:[#allocation2 + $0x87] sm:$0x1] %v932_v19  ;;  %v935_v40 = vmax.f32 %v3401_v61, %v3461_v22  ;;  %v3471_v6 = vmax.f32 %v231_v62, %v472_v27 }
  0x9e   :  { %v3473_v33 = vmax.f32 %v232_v2, %v473_v30  ;;  %v233_v10 = vld [vmem:[#allocation4 + $0x90] sm:$0x1]  ;;  %v474_v36 = vld [vmem:[#allocation4 + $0x91] sm:$0x1]  ;;  %1159 = vst [vmem:[#allocation2 + $0x88] sm:$0x1] %v933_v25  ;;  %v936_v37 = vmax.f32 %v3405_v29, %v3465_v0 }
  0x9f   :  { %v234_v12 = vld [vmem:[#allocation4 + $0x91] sm:$0x1]  ;;  %v3477_v15 = vmax.f32 %v233_v10, %v474_v36  ;;  %v475_v41 = vld [vmem:[#allocation4 + $0x92] sm:$0x1]  ;;  %v476_v43 = vld [vmem:[#allocation4 + $0x93] sm:$0x1]  ;;  %v937_v13 = vmax.f32 %v3411_v34, %v3471_v6 }
  0xa0   :  { %v235_v17 = vld [vmem:[#allocation4 + $0x92] sm:$0x1]  ;;  %1160 = vst [vmem:[#allocation2 + $0x89] sm:$0x1] %v934_v4  ;;  %1161 = vst [vmem:[#allocation2 + $0x8a] sm:$0x1] %v935_v40  ;;  %v938_v61 = vmax.f32 %v3413_v21, %v3473_v33  ;;  %v3483_v20 = vmax.f32 %v234_v12, %v475_v41 }
  0xa1   :  { %v3485_v46 = vmax.f32 %v235_v17, %v476_v43  ;;  %v236_v23 = vld [vmem:[#allocation4 + $0x93] sm:$0x1]  ;;  %v477_v48 = vld [vmem:[#allocation4 + $0x94] sm:$0x1]  ;;  %1162 = vst [vmem:[#allocation2 + $0x8b] sm:$0x1] %v936_v37  ;;  %v939_v49 = vmax.f32 %v3417_v50, %v3477_v15 }
  0xa2   :  { %v237_v29 = vld [vmem:[#allocation4 + $0x94] sm:$0x1]  ;;  %v3489_v26 = vmax.f32 %v236_v23, %v477_v48  ;;  %v478_v53 = vld [vmem:[#allocation4 + $0x95] sm:$0x1]  ;;  %v479_v56 = vld [vmem:[#allocation4 + $0x96] sm:$0x1]  ;;  %v940_v34 = vmax.f32 %v3423_v55, %v3483_v20 }
  0xa3   :  { %v238_v28 = vld [vmem:[#allocation4 + $0x95] sm:$0x1]  ;;  %1163 = vst [vmem:[#allocation2 + $0x8c] sm:$0x1] %v937_v13  ;;  %1164 = vst [vmem:[#allocation2 + $0x8d] sm:$0x1] %v938_v61  ;;  %v941_v21 = vmax.f32 %v3425_v45, %v3485_v46  ;;  %v3495_v31 = vmax.f32 %v237_v29, %v478_v53 }
  0xa4   :  { %v3497_v60 = vmax.f32 %v238_v28, %v479_v56  ;;  %v239_v35 = vld [vmem:[#allocation4 + $0x96] sm:$0x1]  ;;  %v480_v63 = vld [vmem:[#allocation4 + $0x97] sm:$0x1]  ;;  %1165 = vst [vmem:[#allocation2 + $0x91] sm:$0x1] %v939_v49  ;;  %v942_v1 = vmax.f32 %v3429_v7, %v3489_v26 }
  0xa5   :  { %v240_v50 = vld [vmem:[#allocation4 + $0x97] sm:$0x1]  ;;  %v3501_v39 = vmax.f32 %v239_v35, %v480_v63  ;;  %v481_v3 = vld [vmem:[#allocation4 + $0x98] sm:$0x1]  ;;  %v482_v5 = vld [vmem:[#allocation4 + $0x99] sm:$0x1]  ;;  %v943_v55 = vmax.f32 %v3435_v14, %v3495_v31 }
  0xa6   :  { %v241_v42 = vld [vmem:[#allocation4 + $0x98] sm:$0x1]  ;;  %1166 = vst [vmem:[#allocation2 + $0x92] sm:$0x1] %v940_v34  ;;  %1167 = vst [vmem:[#allocation2 + $0x93] sm:$0x1] %v941_v21  ;;  %v944_v45 = vmax.f32 %v3437_v58, %v3497_v60  ;;  %v3507_v44 = vmax.f32 %v240_v50, %v481_v3 }
  0xa7   :  { %v3509_v11 = vmax.f32 %v241_v42, %v482_v5  ;;  %v242_v47 = vld [vmem:[#allocation4 + $0x99] sm:$0x1]  ;;  %v483_v8 = vld [vmem:[#allocation4 + $0x9a] sm:$0x1]  ;;  %1168 = vst [vmem:[#allocation2 + $0x94] sm:$0x1] %v942_v1  ;;  %v945_v16 = vmax.f32 %v3441_v32, %v3501_v39 }
  0xa8   :  { %v243_v7 = vld [vmem:[#allocation4 + $0x9a] sm:$0x1]  ;;  %v3513_v52 = vmax.f32 %v242_v47, %v483_v8  ;;  %v484_v18 = vld [vmem:[#allocation4 + $0x9b] sm:$0x1]  ;;  %v485_v19 = vld [vmem:[#allocation4 + $0x9c] sm:$0x1]  ;;  %v946_v14 = vmax.f32 %v3447_v38, %v3507_v44 }
  0xa9   :  { %v244_v54 = vld [vmem:[#allocation4 + $0x9b] sm:$0x1]  ;;  %1169 = vst [vmem:[#allocation2 + $0x95] sm:$0x1] %v943_v55  ;;  %1170 = vst [vmem:[#allocation2 + $0x96] sm:$0x1] %v944_v45  ;;  %v947_v58 = vmax.f32 %v3449_v9, %v3509_v11  ;;  %v3519_v59 = vmax.f32 %v243_v7, %v484_v18 }
  0xaa   :  { %v3521_v24 = vmax.f32 %v244_v54, %v485_v19  ;;  %v245_v62 = vld [vmem:[#allocation4 + $0x9c] sm:$0x1]  ;;  %v486_v25 = vld [vmem:[#allocation4 + $0x9d] sm:$0x1]  ;;  %1171 = vst [vmem:[#allocation2 + $0x97] sm:$0x1] %v945_v16  ;;  %v948_v27 = vmax.f32 %v3453_v51, %v3513_v52 }
  0xab   :  { %v246_v32 = vld [vmem:[#allocation4 + $0x9d] sm:$0x1]  ;;  %v3525_v2 = vmax.f32 %v245_v62, %v486_v25  ;;  %v487_v30 = vld [vmem:[#allocation4 + $0x9e] sm:$0x1]  ;;  %v488_v40 = vld [vmem:[#allocation4 + $0x9f] sm:$0x1]  ;;  %v949_v38 = vmax.f32 %v3459_v57, %v3519_v59 }
  0xac   :  { %v247_v4 = vld [vmem:[#allocation4 + $0x9e] sm:$0x1]  ;;  %1172 = vst [vmem:[#allocation2 + $0x98] sm:$0x1] %v946_v14  ;;  %1173 = vst [vmem:[#allocation2 + $0x99] sm:$0x1] %v947_v58  ;;  %v950_v9 = vmax.f32 %v3461_v22, %v3521_v24  ;;  %v3531_v10 = vmax.f32 %v246_v32, %v487_v30 }
  0xad   :  { %v3533_v36 = vmax.f32 %v247_v4, %v488_v40  ;;  %v248_v12 = vld [vmem:[#allocation4 + $0xa0] sm:$0x1]  ;;  %v489_v37 = vld [vmem:[#allocation4 + $0xa1] sm:$0x1]  ;;  %1174 = vst [vmem:[#allocation2 + $0x9a] sm:$0x1] %v948_v27  ;;  %v951_v41 = vmax.f32 %v3465_v0, %v3525_v2 }
  0xae   :  { %v249_v51 = vld [vmem:[#allocation4 + $0xa1] sm:$0x1]  ;;  %v3537_v17 = vmax.f32 %v248_v12, %v489_v37  ;;  %v490_v43 = vld [vmem:[#allocation4 + $0xa2] sm:$0x1]  ;;  %v491_v61 = vld [vmem:[#allocation4 + $0xa3] sm:$0x1]  ;;  %v952_v57 = vmax.f32 %v3471_v6, %v3531_v10 }
  0xaf   :  { %v250_v13 = vld [vmem:[#allocation4 + $0xa2] sm:$0x1]  ;;  %1175 = vst [vmem:[#allocation2 + $0x9b] sm:$0x1] %v949_v38  ;;  %1176 = vst [vmem:[#allocation2 + $0x9c] sm:$0x1] %v950_v9  ;;  %v953_v22 = vmax.f32 %v3473_v33, %v3533_v36  ;;  %v3543_v23 = vmax.f32 %v249_v51, %v490_v43 }
  0xb0   :  { %v3545_v48 = vmax.f32 %v250_v13, %v491_v61  ;;  %v251_v29 = vld [vmem:[#allocation4 + $0xa3] sm:$0x1]  ;;  %v492_v49 = vld [vmem:[#allocation4 + $0xa4] sm:$0x1]  ;;  %1177 = vst [vmem:[#allocation2 + $0x9d] sm:$0x1] %v951_v41  ;;  %v954_v53 = vmax.f32 %v3477_v15, %v3537_v17 }
  0xb1   :  { %v252_v0 = vld [vmem:[#allocation4 + $0xa4] sm:$0x1]  ;;  %v3549_v28 = vmax.f32 %v251_v29, %v492_v49  ;;  %v493_v56 = vld [vmem:[#allocation4 + $0xa5] sm:$0x1]  ;;  %v494_v21 = vld [vmem:[#allocation4 + $0xa6] sm:$0x1]  ;;  %v955_v6 = vmax.f32 %v3483_v20, %v3543_v23 }
  0xb2   :  { %v253_v34 = vld [vmem:[#allocation4 + $0xa5] sm:$0x1]  ;;  %1178 = vst [vmem:[#allocation2 + $0x9e] sm:$0x1] %v952_v57  ;;  %1179 = vst [vmem:[#allocation2 + $0x9f] sm:$0x1] %v953_v22  ;;  %v956_v33 = vmax.f32 %v3485_v46, %v3545_v48  ;;  %v3555_v35 = vmax.f32 %v252_v0, %v493_v56 }
  0xb3   :  { %v3557_v63 = vmax.f32 %v253_v34, %v494_v21  ;;  %v254_v50 = vld [vmem:[#allocation4 + $0xa6] sm:$0x1]  ;;  %v495_v1 = vld [vmem:[#allocation4 + $0xa7] sm:$0x1]  ;;  %1180 = vst [vmem:[#allocation2 + $0xa3] sm:$0x1] %v954_v53  ;;  %v957_v3 = vmax.f32 %v3489_v26, %v3549_v28 }
  0xb4   :  { %v255_v15 = vld [vmem:[#allocation4 + $0xa7] sm:$0x1]  ;;  %v3561_v42 = vmax.f32 %v254_v50, %v495_v1  ;;  %v496_v5 = vld [vmem:[#allocation4 + $0xa8] sm:$0x1]  ;;  %v497_v45 = vld [vmem:[#allocation4 + $0xa9] sm:$0x1]  ;;  %v958_v20 = vmax.f32 %v3495_v31, %v3555_v35 }
  0xb5   :  { %v256_v55 = vld [vmem:[#allocation4 + $0xa8] sm:$0x1]  ;;  %1181 = vst [vmem:[#allocation2 + $0xa4] sm:$0x1] %v955_v6  ;;  %1182 = vst [vmem:[#allocation2 + $0xa5] sm:$0x1] %v956_v33  ;;  %v959_v46 = vmax.f32 %v3497_v60, %v3557_v63  ;;  %v3567_v47 = vmax.f32 %v255_v15, %v496_v5 }
  0xb6   :  { %v3569_v8 = vmax.f32 %v256_v55, %v497_v45  ;;  %v257_v7 = vld [vmem:[#allocation4 + $0xa9] sm:$0x1]  ;;  %v498_v16 = vld [vmem:[#allocation4 + $0xaa] sm:$0x1]  ;;  %1183 = vst [vmem:[#allocation2 + $0xa6] sm:$0x1] %v957_v3  ;;  %v960_v18 = vmax.f32 %v3501_v39, %v3561_v42 }
  0xb7   :  { %v258_v26 = vld [vmem:[#allocation4 + $0xaa] sm:$0x1]  ;;  %v3573_v54 = vmax.f32 %v257_v7, %v498_v16  ;;  %v499_v19 = vld [vmem:[#allocation4 + $0xab] sm:$0x1]  ;;  %v500_v58 = vld [vmem:[#allocation4 + $0xac] sm:$0x1]  ;;  %v961_v31 = vmax.f32 %v3507_v44, %v3567_v47 }
  0xb8   :  { %v259_v14 = vld [vmem:[#allocation4 + $0xab] sm:$0x1]  ;;  %1184 = vst [vmem:[#allocation2 + $0xa7] sm:$0x1] %v958_v20  ;;  %1185 = vst [vmem:[#allocation2 + $0xa8] sm:$0x1] %v959_v46  ;;  %v962_v60 = vmax.f32 %v3509_v11, %v3569_v8  ;;  %v3579_v62 = vmax.f32 %v258_v26, %v499_v19 }
  0xb9   :  { %v3581_v25 = vmax.f32 %v259_v14, %v500_v58  ;;  %v260_v32 = vld [vmem:[#allocation4 + $0xac] sm:$0x1]  ;;  %v501_v27 = vld [vmem:[#allocation4 + $0xad] sm:$0x1]  ;;  %1186 = vst [vmem:[#allocation2 + $0xa9] sm:$0x1] %v960_v18  ;;  %v963_v30 = vmax.f32 %v3513_v52, %v3573_v54 }
  0xba   :  { %v261_v39 = vld [vmem:[#allocation4 + $0xad] sm:$0x1]  ;;  %v3585_v4 = vmax.f32 %v260_v32, %v501_v27  ;;  %v502_v40 = vld [vmem:[#allocation4 + $0xae] sm:$0x1]  ;;  %v503_v9 = vld [vmem:[#allocation4 + $0xaf] sm:$0x1]  ;;  %v964_v44 = vmax.f32 %v3519_v59, %v3579_v62 }
  0xbb   :  { %v262_v38 = vld [vmem:[#allocation4 + $0xae] sm:$0x1]  ;;  %1187 = vst [vmem:[#allocation2 + $0xaa] sm:$0x1] %v961_v31  ;;  %1188 = vst [vmem:[#allocation2 + $0xab] sm:$0x1] %v962_v60  ;;  %v965_v11 = vmax.f32 %v3521_v24, %v3581_v25  ;;  %v3591_v12 = vmax.f32 %v261_v39, %v502_v40 }
  0xbc   :  { %v3593_v37 = vmax.f32 %v262_v38, %v503_v9  ;;  %v263_v51 = vld [vmem:[#allocation4 + $0xb0] sm:$0x1]  ;;  %v504_v41 = vld [vmem:[#allocation4 + $0xb1] sm:$0x1]  ;;  %1189 = vst [vmem:[#allocation2 + $0xac] sm:$0x1] %v963_v30  ;;  %v966_v43 = vmax.f32 %v3525_v2, %v3585_v4 }
  0xbd   :  { %v264_v52 = vld [vmem:[#allocation4 + $0xb1] sm:$0x1]  ;;  %v3597_v13 = vmax.f32 %v263_v51, %v504_v41  ;;  %v505_v61 = vld [vmem:[#allocation4 + $0xb2] sm:$0x1]  ;;  %v506_v22 = vld [vmem:[#allocation4 + $0xb3] sm:$0x1]  ;;  %v967_v59 = vmax.f32 %v3531_v10, %v3591_v12 }
  0xbe   :  { %v265_v57 = vld [vmem:[#allocation4 + $0xb2] sm:$0x1]  ;;  %1190 = vst [vmem:[#allocation2 + $0xad] sm:$0x1] %v964_v44  ;;  %1191 = vst [vmem:[#allocation2 + $0xae] sm:$0x1] %v965_v11  ;;  %v968_v24 = vmax.f32 %v3533_v36, %v3593_v37  ;;  %v3603_v29 = vmax.f32 %v264_v52, %v505_v61 }
  0xbf   :  { %v3605_v49 = vmax.f32 %v265_v57, %v506_v22  ;;  %v266_v0 = vld [vmem:[#allocation4 + $0xb3] sm:$0x1]  ;;  %v507_v53 = vld [vmem:[#allocation4 + $0xb4] sm:$0x1]  ;;  %1192 = vst [vmem:[#allocation2 + $0xaf] sm:$0x1] %v966_v43  ;;  %v969_v56 = vmax.f32 %v3537_v17, %v3597_v13 }
  0xc0   :  { %v267_v2 = vld [vmem:[#allocation4 + $0xb4] sm:$0x1]  ;;  %v3609_v34 = vmax.f32 %v266_v0, %v507_v53  ;;  %v508_v21 = vld [vmem:[#allocation4 + $0xb5] sm:$0x1]  ;;  %v509_v33 = vld [vmem:[#allocation4 + $0xb6] sm:$0x1]  ;;  %v970_v10 = vmax.f32 %v3543_v23, %v3603_v29 }
  0xc1   :  { %v268_v6 = vld [vmem:[#allocation4 + $0xb5] sm:$0x1]  ;;  %1193 = vst [vmem:[#allocation2 + $0xb0] sm:$0x1] %v967_v59  ;;  %1194 = vst [vmem:[#allocation2 + $0xb1] sm:$0x1] %v968_v24  ;;  %v971_v36 = vmax.f32 %v3545_v48, %v3605_v49  ;;  %v3615_v50 = vmax.f32 %v267_v2, %v508_v21 }
  0xc2   :  { %v3617_v1 = vmax.f32 %v268_v6, %v509_v33  ;;  %v269_v15 = vld [vmem:[#allocation4 + $0xb6] sm:$0x1]  ;;  %v510_v3 = vld [vmem:[#allocation4 + $0xb7] sm:$0x1]  ;;  %1195 = vst [vmem:[#allocation2 + $0xb5] sm:$0x1] %v969_v56  ;;  %v972_v5 = vmax.f32 %v3549_v28, %v3609_v34 }
  0xc3   :  { %v270_v17 = vld [vmem:[#allocation4 + $0xb7] sm:$0x1]  ;;  %v3621_v55 = vmax.f32 %v269_v15, %v510_v3  ;;  %v511_v45 = vld [vmem:[#allocation4 + $0xb8] sm:$0x1]  ;;  %v512_v46 = vld [vmem:[#allocation4 + $0xb9] sm:$0x1]  ;;  %v973_v23 = vmax.f32 %v3555_v35, %v3615_v50 }
  0xc4   :  { %v271_v20 = vld [vmem:[#allocation4 + $0xb8] sm:$0x1]  ;;  %1196 = vst [vmem:[#allocation2 + $0xb6] sm:$0x1] %v970_v10  ;;  %1197 = vst [vmem:[#allocation2 + $0xb7] sm:$0x1] %v971_v36  ;;  %v974_v48 = vmax.f32 %v3557_v63, %v3617_v1  ;;  %v3627_v7 = vmax.f32 %v270_v17, %v511_v45 }
  0xc5   :  { %v3629_v16 = vmax.f32 %v271_v20, %v512_v46  ;;  %v272_v26 = vld [vmem:[#allocation4 + $0xb9] sm:$0x1]  ;;  %v513_v18 = vld [vmem:[#allocation4 + $0xba] sm:$0x1]  ;;  %1198 = vst [vmem:[#allocation2 + $0xb8] sm:$0x1] %v972_v5  ;;  %v975_v19 = vmax.f32 %v3561_v42, %v3621_v55 }
  0xc6   :  { %v273_v28 = vld [vmem:[#allocation4 + $0xba] sm:$0x1]  ;;  %v3633_v14 = vmax.f32 %v272_v26, %v513_v18  ;;  %v514_v58 = vld [vmem:[#allocation4 + $0xbb] sm:$0x1]  ;;  %v515_v60 = vld [vmem:[#allocation4 + $0xbc] sm:$0x1]  ;;  %v976_v35 = vmax.f32 %v3567_v47, %v3627_v7 }
  0xc7   :  { %v274_v31 = vld [vmem:[#allocation4 + $0xbb] sm:$0x1]  ;;  %1199 = vst [vmem:[#allocation2 + $0xb9] sm:$0x1] %v973_v23  ;;  %1200 = vst [vmem:[#allocation2 + $0xba] sm:$0x1] %v974_v48  ;;  %v977_v63 = vmax.f32 %v3569_v8, %v3629_v16  ;;  %v3639_v32 = vmax.f32 %v273_v28, %v514_v58 }
  0xc8   :  { %v3641_v27 = vmax.f32 %v274_v31, %v515_v60  ;;  %v275_v39 = vld [vmem:[#allocation4 + $0xbc] sm:$0x1]  ;;  %v516_v30 = vld [vmem:[#allocation4 + $0xbd] sm:$0x1]  ;;  %1201 = vst [vmem:[#allocation2 + $0xbb] sm:$0x1] %v975_v19  ;;  %v978_v40 = vmax.f32 %v3573_v54, %v3633_v14 }
  0xc9   :  { %v276_v42 = vld [vmem:[#allocation4 + $0xbd] sm:$0x1]  ;;  %v3645_v38 = vmax.f32 %v275_v39, %v516_v30  ;;  %v517_v9 = vld [vmem:[#allocation4 + $0xbe] sm:$0x1]  ;;  %v518_v11 = vld [vmem:[#allocation4 + $0xbf] sm:$0x1]  ;;  %v979_v47 = vmax.f32 %v3579_v62, %v3639_v32 }
  0xca   :  { %v277_v44 = vld [vmem:[#allocation4 + $0xbe] sm:$0x1]  ;;  %1202 = vst [vmem:[#allocation2 + $0xbc] sm:$0x1] %v976_v35  ;;  %1203 = vst [vmem:[#allocation2 + $0xbd] sm:$0x1] %v977_v63  ;;  %v980_v8 = vmax.f32 %v3581_v25, %v3641_v27  ;;  %v3651_v51 = vmax.f32 %v276_v42, %v517_v9 }
  0xcb   :  { %v3653_v41 = vmax.f32 %v277_v44, %v518_v11  ;;  %v278_v52 = vld [vmem:[#allocation4 + $0xc0] sm:$0x1]  ;;  %v519_v43 = vld [vmem:[#allocation4 + $0xc1] sm:$0x1]  ;;  %1204 = vst [vmem:[#allocation2 + $0xbe] sm:$0x1] %v978_v40  ;;  %v981_v61 = vmax.f32 %v3585_v4, %v3645_v38 }
  0xcc   :  { %v279_v54 = vld [vmem:[#allocation4 + $0xc1] sm:$0x1]  ;;  %v3657_v57 = vmax.f32 %v278_v52, %v519_v43  ;;  %v520_v22 = vld [vmem:[#allocation4 + $0xc2] sm:$0x1]  ;;  %v521_v24 = vld [vmem:[#allocation4 + $0xc3] sm:$0x1]  ;;  %v982_v62 = vmax.f32 %v3591_v12, %v3651_v51 }
  0xcd   :  { %v280_v59 = vld [vmem:[#allocation4 + $0xc2] sm:$0x1]  ;;  %1205 = vst [vmem:[#allocation2 + $0xbf] sm:$0x1] %v979_v47  ;;  %1206 = vst [vmem:[#allocation2 + $0xc0] sm:$0x1] %v980_v8  ;;  %v983_v25 = vmax.f32 %v3593_v37, %v3653_v41  ;;  %v3663_v0 = vmax.f32 %v279_v54, %v520_v22 }
  0xce   :  { %v3665_v53 = vmax.f32 %v280_v59, %v521_v24  ;;  %v281_v2 = vld [vmem:[#allocation4 + $0xc3] sm:$0x1]  ;;  %v522_v56 = vld [vmem:[#allocation4 + $0xc4] sm:$0x1]  ;;  %1207 = vst [vmem:[#allocation2 + $0xc1] sm:$0x1] %v981_v61  ;;  %v984_v21 = vmax.f32 %v3597_v13, %v3657_v57 }
  0xcf   :  { %v282_v4 = vld [vmem:[#allocation4 + $0xc4] sm:$0x1]  ;;  %v3669_v6 = vmax.f32 %v281_v2, %v522_v56  ;;  %v523_v33 = vld [vmem:[#allocation4 + $0xc5] sm:$0x1]  ;;  %v524_v36 = vld [vmem:[#allocation4 + $0xc6] sm:$0x1]  ;;  %v985_v12 = vmax.f32 %v3603_v29, %v3663_v0 }
  0xd0   :  { %v283_v10 = vld [vmem:[#allocation4 + $0xc5] sm:$0x1]  ;;  %1208 = vst [vmem:[#allocation2 + $0xc2] sm:$0x1] %v982_v62  ;;  %1209 = vst [vmem:[#allocation2 + $0xc3] sm:$0x1] %v983_v25  ;;  %v986_v37 = vmax.f32 %v3605_v49, %v3665_v53  ;;  %v3675_v15 = vmax.f32 %v282_v4, %v523_v33 }
  0xd1   :  { %v3677_v3 = vmax.f32 %v283_v10, %v524_v36  ;;  %v284_v17 = vld [vmem:[#allocation4 + $0xc6] sm:$0x1]  ;;  %v525_v5 = vld [vmem:[#allocation4 + $0xc7] sm:$0x1]  ;;  %1210 = vst [vmem:[#allocation2 + $0xc7] sm:$0x1] %v984_v21  ;;  %v987_v45 = vmax.f32 %v3609_v34, %v3669_v6 }
  0xd2   :  { %v285_v13 = vld [vmem:[#allocation4 + $0xc7] sm:$0x1]  ;;  %v3681_v20 = vmax.f32 %v284_v17, %v525_v5  ;;  %v526_v46 = vld [vmem:[#allocation4 + $0xc8] sm:$0x1]  ;;  %v527_v48 = vld [vmem:[#allocation4 + $0xc9] sm:$0x1]  ;;  %v988_v29 = vmax.f32 %v3615_v50, %v3675_v15 }
  0xd3   :  { %v286_v23 = vld [vmem:[#allocation4 + $0xc8] sm:$0x1]  ;;  %1211 = vst [vmem:[#allocation2 + $0xc8] sm:$0x1] %v985_v12  ;;  %1212 = vst [vmem:[#allocation2 + $0xc9] sm:$0x1] %v986_v37  ;;  %v989_v49 = vmax.f32 %v3617_v1, %v3677_v3  ;;  %v3687_v26 = vmax.f32 %v285_v13, %v526_v46 }
  0xd4   :  { %v3689_v18 = vmax.f32 %v286_v23, %v527_v48  ;;  %v287_v28 = vld [vmem:[#allocation4 + $0xc9] sm:$0x1]  ;;  %v528_v19 = vld [vmem:[#allocation4 + $0xca] sm:$0x1]  ;;  %1213 = vst [vmem:[#allocation2 + $0xca] sm:$0x1] %v987_v45  ;;  %v990_v58 = vmax.f32 %v3621_v55, %v3681_v20 }
  0xd5   :  { %v288_v34 = vld [vmem:[#allocation4 + $0xca] sm:$0x1]  ;;  %v3693_v31 = vmax.f32 %v287_v28, %v528_v19  ;;  %v529_v60 = vld [vmem:[#allocation4 + $0xcb] sm:$0x1]  ;;  %v530_v63 = vld [vmem:[#allocation4 + $0xcc] sm:$0x1]  ;;  %v991_v50 = vmax.f32 %v3627_v7, %v3687_v26 }
  0xd6   :  { %v289_v35 = vld [vmem:[#allocation4 + $0xcb] sm:$0x1]  ;;  %1214 = vst [vmem:[#allocation2 + $0xcb] sm:$0x1] %v988_v29  ;;  %1215 = vst [vmem:[#allocation2 + $0xcc] sm:$0x1] %v989_v49  ;;  %v992_v1 = vmax.f32 %v3629_v16, %v3689_v18  ;;  %v3699_v39 = vmax.f32 %v288_v34, %v529_v60 }
  0xd7   :  { %v3701_v30 = vmax.f32 %v289_v35, %v530_v63  ;;  %v290_v42 = vld [vmem:[#allocation4 + $0xcc] sm:$0x1]  ;;  %v531_v40 = vld [vmem:[#allocation4 + $0xcd] sm:$0x1]  ;;  %1216 = vst [vmem:[#allocation2 + $0xcd] sm:$0x1] %v990_v58  ;;  %v993_v9 = vmax.f32 %v3633_v14, %v3693_v31 }
  0xd8   :  { %v291_v55 = vld [vmem:[#allocation4 + $0xcd] sm:$0x1]  ;;  %v3705_v44 = vmax.f32 %v290_v42, %v531_v40  ;;  %v532_v11 = vld [vmem:[#allocation4 + $0xce] sm:$0x1]  ;;  %v533_v8 = vld [vmem:[#allocation4 + $0xcf] sm:$0x1]  ;;  %v994_v7 = vmax.f32 %v3639_v32, %v3699_v39 }
  0xd9   :  { %v292_v47 = vld [vmem:[#allocation4 + $0xce] sm:$0x1]  ;;  %1217 = vst [vmem:[#allocation2 + $0xce] sm:$0x1] %v991_v50  ;;  %1218 = vst [vmem:[#allocation2 + $0xcf] sm:$0x1] %v992_v1  ;;  %v995_v16 = vmax.f32 %v3641_v27, %v3701_v30  ;;  %v3711_v52 = vmax.f32 %v291_v55, %v532_v11 }
  0xda   :  { %v3713_v43 = vmax.f32 %v292_v47, %v533_v8  ;;  %v293_v54 = vld [vmem:[#allocation4 + $0xd0] sm:$0x1]  ;;  %v534_v61 = vld [vmem:[#allocation4 + $0xd1] sm:$0x1]  ;;  %1219 = vst [vmem:[#allocation2 + $0xd0] sm:$0x1] %v993_v9  ;;  %v996_v22 = vmax.f32 %v3645_v38, %v3705_v44 }
  0xdb   :  { %v294_v14 = vld [vmem:[#allocation4 + $0xd1] sm:$0x1]  ;;  %v3717_v59 = vmax.f32 %v293_v54, %v534_v61  ;;  %v535_v24 = vld [vmem:[#allocation4 + $0xd2] sm:$0x1]  ;;  %v536_v25 = vld [vmem:[#allocation4 + $0xd3] sm:$0x1]  ;;  %v997_v32 = vmax.f32 %v3651_v51, %v3711_v52 }
  0xdc   :  { %v295_v62 = vld [vmem:[#allocation4 + $0xd2] sm:$0x1]  ;;  %1220 = vst [vmem:[#allocation2 + $0xd1] sm:$0x1] %v994_v7  ;;  %1221 = vst [vmem:[#allocation2 + $0xd2] sm:$0x1] %v995_v16  ;;  %v998_v27 = vmax.f32 %v3653_v41, %v3713_v43  ;;  %v3723_v2 = vmax.f32 %v294_v14, %v535_v24 }
  0xdd   :  { %v3725_v56 = vmax.f32 %v295_v62, %v536_v25  ;;  %v296_v4 = vld [vmem:[#allocation4 + $0xd3] sm:$0x1]  ;;  %v537_v21 = vld [vmem:[#allocation4 + $0xd4] sm:$0x1]  ;;  %1222 = vst [vmem:[#allocation2 + $0xd3] sm:$0x1] %v996_v22  ;;  %v999_v33 = vmax.f32 %v3657_v57, %v3717_v59 }
  0xde   :  { %v297_v38 = vld [vmem:[#allocation4 + $0xd4] sm:$0x1]  ;;  %v3729_v10 = vmax.f32 %v296_v4, %v537_v21  ;;  %v538_v36 = vld [vmem:[#allocation4 + $0xd5] sm:$0x1]  ;;  %v539_v37 = vld [vmem:[#allocation4 + $0xd6] sm:$0x1]  ;;  %v1000_v51 = vmax.f32 %v3663_v0, %v3723_v2 }
  0xdf   :  { %v298_v12 = vld [vmem:[#allocation4 + $0xd5] sm:$0x1]  ;;  %1223 = vst [vmem:[#allocation2 + $0xd4] sm:$0x1] %v997_v32  ;;  %1224 = vst [vmem:[#allocation2 + $0xd5] sm:$0x1] %v998_v27  ;;  %v1001_v41 = vmax.f32 %v3665_v53, %v3725_v56  ;;  %v3735_v17 = vmax.f32 %v297_v38, %v538_v36 }
  0xe0   :  { %v3737_v5 = vmax.f32 %v298_v12, %v539_v37  ;;  %v299_v13 = vld [vmem:[#allocation4 + $0xd6] sm:$0x1]  ;;  %v540_v45 = vld [vmem:[#allocation4 + $0xd7] sm:$0x1]  ;;  %1225 = vst [vmem:[#allocation2 + $0xd9] sm:$0x1] %v999_v33  ;;  %v1002_v46 = vmax.f32 %v3669_v6, %v3729_v10 }
  0xe1   :  { %v300_v57 = vld [vmem:[#allocation4 + $0xd7] sm:$0x1]  ;;  %v3741_v23 = vmax.f32 %v299_v13, %v540_v45  ;;  %v541_v48 = vld [vmem:[#allocation4 + $0xd8] sm:$0x1]  ;;  %v542_v49 = vld [vmem:[#allocation4 + $0xd9] sm:$0x1]  ;;  %v1003_v0 = vmax.f32 %v3675_v15, %v3735_v17 }
  0xe2   :  { %v301_v29 = vld [vmem:[#allocation4 + $0xd8] sm:$0x1]  ;;  %1226 = vst [vmem:[#allocation2 + $0xda] sm:$0x1] %v1000_v51  ;;  %1227 = vst [vmem:[#allocation2 + $0xdb] sm:$0x1] %v1001_v41  ;;  %v1004_v53 = vmax.f32 %v3677_v3, %v3737_v5  ;;  %v3747_v28 = vmax.f32 %v300_v57, %v541_v48 }
  0xe3   :  { %v3749_v19 = vmax.f32 %v301_v29, %v542_v49  ;;  %v302_v34 = vld [vmem:[#allocation4 + $0xd9] sm:$0x1]  ;;  %v543_v58 = vld [vmem:[#allocation4 + $0xda] sm:$0x1]  ;;  %1228 = vst [vmem:[#allocation2 + $0xdc] sm:$0x1] %v1002_v46  ;;  %v1005_v60 = vmax.f32 %v3681_v20, %v3741_v23 }
  0xe4   :  { %v303_v6 = vld [vmem:[#allocation4 + $0xda] sm:$0x1]  ;;  %v3753_v35 = vmax.f32 %v302_v34, %v543_v58  ;;  %v544_v63 = vld [vmem:[#allocation4 + $0xdb] sm:$0x1]  ;;  %v545_v1 = vld [vmem:[#allocation4 + $0xdc] sm:$0x1]  ;;  %v1006_v15 = vmax.f32 %v3687_v26, %v3747_v28 }
  0xe5   :  { %v304_v50 = vld [vmem:[#allocation4 + $0xdb] sm:$0x1]  ;;  %1229 = vst [vmem:[#allocation2 + $0xdd] sm:$0x1] %v1003_v0  ;;  %1230 = vst [vmem:[#allocation2 + $0xde] sm:$0x1] %v1004_v53  ;;  %v1007_v3 = vmax.f32 %v3689_v18, %v3749_v19  ;;  %v3759_v42 = vmax.f32 %v303_v6, %v544_v63 }
  0xe6   :  { %v3761_v40 = vmax.f32 %v304_v50, %v545_v1  ;;  %v305_v55 = vld [vmem:[#allocation4 + $0xdc] sm:$0x1]  ;;  %v546_v9 = vld [vmem:[#allocation4 + $0xdd] sm:$0x1]  ;;  %1231 = vst [vmem:[#allocation2 + $0xdf] sm:$0x1] %v1005_v60  ;;  %v1008_v11 = vmax.f32 %v3693_v31, %v3753_v35 }
  0xe7   :  { %v306_v20 = vld [vmem:[#allocation4 + $0xdd] sm:$0x1]  ;;  %v3765_v47 = vmax.f32 %v305_v55, %v546_v9  ;;  %v547_v8 = vld [vmem:[#allocation4 + $0xde] sm:$0x1]  ;;  %v548_v16 = vld [vmem:[#allocation4 + $0xdf] sm:$0x1]  ;;  %v1009_v26 = vmax.f32 %v3699_v39, %v3759_v42 }
  0xe8   :  { %v307_v7 = vld [vmem:[#allocation4 + $0xde] sm:$0x1]  ;;  %1232 = vst [vmem:[#allocation2 + $0xe0] sm:$0x1] %v1006_v15  ;;  %1233 = vst [vmem:[#allocation2 + $0xe1] sm:$0x1] %v1007_v3  ;;  %v1010_v18 = vmax.f32 %v3701_v30, %v3761_v40  ;;  %v3771_v54 = vmax.f32 %v306_v20, %v547_v8 }
  0xe9   :  { %v3773_v61 = vmax.f32 %v307_v7, %v548_v16  ;;  %v308_v14 = vld [vmem:[#allocation4 + $0xe0] sm:$0x1]  ;;  %v549_v22 = vld [vmem:[#allocation4 + $0xe1] sm:$0x1]  ;;  %1234 = vst [vmem:[#allocation2 + $0xe2] sm:$0x1] %v1008_v11  ;;  %v1011_v24 = vmax.f32 %v3705_v44, %v3765_v47 }
  0xea   :  { %v309_v31 = vld [vmem:[#allocation4 + $0xe1] sm:$0x1]  ;;  %v3777_v62 = vmax.f32 %v308_v14, %v549_v22  ;;  %v550_v25 = vld [vmem:[#allocation4 + $0xe2] sm:$0x1]  ;;  %v551_v27 = vld [vmem:[#allocation4 + $0xe3] sm:$0x1]  ;;  %v1012_v39 = vmax.f32 %v3711_v52, %v3771_v54 }
  0xeb   :  { %v310_v32 = vld [vmem:[#allocation4 + $0xe2] sm:$0x1]  ;;  %1235 = vst [vmem:[#allocation2 + $0xe3] sm:$0x1] %v1009_v26  ;;  %1236 = vst [vmem:[#allocation2 + $0xe4] sm:$0x1] %v1010_v18  ;;  %v1013_v30 = vmax.f32 %v3713_v43, %v3773_v61  ;;  %v3783_v4 = vmax.f32 %v309_v31, %v550_v25 }
  0xec   :  { %v3785_v21 = vmax.f32 %v310_v32, %v551_v27  ;;  %v311_v38 = vld [vmem:[#allocation4 + $0xe3] sm:$0x1]  ;;  %v552_v33 = vld [vmem:[#allocation4 + $0xe4] sm:$0x1]  ;;  %1237 = vst [vmem:[#allocation2 + $0xe5] sm:$0x1] %v1011_v24  ;;  %v1014_v36 = vmax.f32 %v3717_v59, %v3777_v62 }
  0xed   :  { %v312_v44 = vld [vmem:[#allocation4 + $0xe4] sm:$0x1]  ;;  %v3789_v12 = vmax.f32 %v311_v38, %v552_v33  ;;  %v553_v37 = vld [vmem:[#allocation4 + $0xe5] sm:$0x1]  ;;  %v554_v41 = vld [vmem:[#allocation4 + $0xe6] sm:$0x1]  ;;  %v1015_v52 = vmax.f32 %v3723_v2, %v3783_v4 }
  0xee   :  { %v313_v51 = vld [vmem:[#allocation4 + $0xe5] sm:$0x1]  ;;  %1238 = vst [vmem:[#allocation2 + $0xe6] sm:$0x1] %v1012_v39  ;;  %1239 = vst [vmem:[#allocation2 + $0xe7] sm:$0x1] %v1013_v30  ;;  %v1016_v43 = vmax.f32 %v3725_v56, %v3785_v21  ;;  %v3795_v13 = vmax.f32 %v312_v44, %v553_v37 }
  0xef   :  { %v3797_v45 = vmax.f32 %v313_v51, %v554_v41  ;;  %v314_v57 = vld [vmem:[#allocation4 + $0xe6] sm:$0x1]  ;;  %v555_v46 = vld [vmem:[#allocation4 + $0xe7] sm:$0x1]  ;;  %1240 = vst [vmem:[#allocation2 + $0xeb] sm:$0x1] %v1014_v36  ;;  %v1017_v48 = vmax.f32 %v3729_v10, %v3789_v12 }
  0xf0   :  { %v315_v59 = vld [vmem:[#allocation4 + $0xe7] sm:$0x1]  ;;  %v3801_v29 = vmax.f32 %v314_v57, %v555_v46  ;;  %v556_v49 = vld [vmem:[#allocation4 + $0xe8] sm:$0x1]  ;;  %v557_v53 = vld [vmem:[#allocation4 + $0xe9] sm:$0x1]  ;;  %v1018_v2 = vmax.f32 %v3735_v17, %v3795_v13 }
  0xf1   :  { %v316_v0 = vld [vmem:[#allocation4 + $0xe8] sm:$0x1]  ;;  %1241 = vst [vmem:[#allocation2 + $0xec] sm:$0x1] %v1015_v52  ;;  %1242 = vst [vmem:[#allocation2 + $0xed] sm:$0x1] %v1016_v43  ;;  %v1019_v56 = vmax.f32 %v3737_v5, %v3797_v45  ;;  %v3807_v34 = vmax.f32 %v315_v59, %v556_v49 }
  0xf2   :  { %v3809_v58 = vmax.f32 %v316_v0, %v557_v53  ;;  %v317_v6 = vld [vmem:[#allocation4 + $0xe9] sm:$0x1]  ;;  %v558_v60 = vld [vmem:[#allocation4 + $0xea] sm:$0x1]  ;;  %1243 = vst [vmem:[#allocation2 + $0xee] sm:$0x1] %v1017_v48  ;;  %v1020_v63 = vmax.f32 %v3741_v23, %v3801_v29 }
  0xf3   :  { %v318_v10 = vld [vmem:[#allocation4 + $0xea] sm:$0x1]  ;;  %v3813_v50 = vmax.f32 %v317_v6, %v558_v60  ;;  %v559_v1 = vld [vmem:[#allocation4 + $0xeb] sm:$0x1]  ;;  %v560_v3 = vld [vmem:[#allocation4 + $0xec] sm:$0x1]  ;;  %v1021_v17 = vmax.f32 %v3747_v28, %v3807_v34 }
  0xf4   :  { %v319_v15 = vld [vmem:[#allocation4 + $0xeb] sm:$0x1]  ;;  %1244 = vst [vmem:[#allocation2 + $0xef] sm:$0x1] %v1018_v2  ;;  %1245 = vst [vmem:[#allocation2 + $0xf0] sm:$0x1] %v1019_v56  ;;  %v1022_v5 = vmax.f32 %v3749_v19, %v3809_v58  ;;  %v3819_v55 = vmax.f32 %v318_v10, %v559_v1 }
  0xf5   :  { %v3821_v9 = vmax.f32 %v319_v15, %v560_v3  ;;  %v320_v20 = vld [vmem:[#allocation4 + $0xec] sm:$0x1]  ;;  %v561_v11 = vld [vmem:[#allocation4 + $0xed] sm:$0x1]  ;;  %1246 = vst [vmem:[#allocation2 + $0xf1] sm:$0x1] %v1020_v63  ;;  %v1023_v8 = vmax.f32 %v3753_v35, %v3813_v50 }
  0xf6   :  { %v321_v23 = vld [vmem:[#allocation4 + $0xed] sm:$0x1]  ;;  %v3825_v7 = vmax.f32 %v320_v20, %v561_v11  ;;  %v562_v16 = vld [vmem:[#allocation4 + $0xee] sm:$0x1]  ;;  %v563_v18 = vld [vmem:[#allocation4 + $0xef] sm:$0x1]  ;;  %v1024_v28 = vmax.f32 %v3759_v42, %v3819_v55 }
  0xf7   :  { %v322_v26 = vld [vmem:[#allocation4 + $0xee] sm:$0x1]  ;;  %1247 = vst [vmem:[#allocation2 + $0xf2] sm:$0x1] %v1021_v17  ;;  %1248 = vst [vmem:[#allocation2 + $0xf3] sm:$0x1] %v1022_v5  ;;  %v1025_v19 = vmax.f32 %v3761_v40, %v3821_v9  ;;  %v3831_v14 = vmax.f32 %v321_v23, %v562_v16 }
  0xf8   :  { %v3833_v22 = vmax.f32 %v322_v26, %v563_v18  ;;  %v323_v31 = vld [vmem:[#allocation4 + $0xf0] sm:$0x1]  ;;  %v564_v24 = vld [vmem:[#allocation4 + $0xf1] sm:$0x1]  ;;  %1249 = vst [vmem:[#allocation2 + $0xf4] sm:$0x1] %v1023_v8  ;;  %v1026_v25 = vmax.f32 %v3765_v47, %v3825_v7 }
  0xf9   :  { %v324_v35 = vld [vmem:[#allocation4 + $0xf1] sm:$0x1]  ;;  %v804_v32 = vmax.f32 %v323_v31, %v564_v24  ;;  %v565_v27 = vld [vmem:[#allocation4 + $0xf2] sm:$0x1]  ;;  %v566_v30 = vld [vmem:[#allocation4 + $0xf3] sm:$0x1]  ;;  %v1027_v42 = vmax.f32 %v3771_v54, %v3831_v14 }
  0xfa   :  { %v325_v39 = vld [vmem:[#allocation4 + $0xf2] sm:$0x1]  ;;  %1250 = vst [vmem:[#allocation2 + $0xf5] sm:$0x1] %v1024_v28  ;;  %1251 = vst [vmem:[#allocation2 + $0xf6] sm:$0x1] %v1025_v19  ;;  %v1028_v40 = vmax.f32 %v3773_v61, %v3833_v22  ;;  %v805_v38 = vmax.f32 %v324_v35, %v565_v27 }
  0xfb   :  { %v806_v33 = vmax.f32 %v325_v39, %v566_v30  ;;  %v326_v44 = vld [vmem:[#allocation4 + $0xf3] sm:$0x1]  ;;  %v567_v36 = vld [vmem:[#allocation4 + $0xf4] sm:$0x1]  ;;  %1252 = vst [vmem:[#allocation2 + $0xf7] sm:$0x1] %v1026_v25  ;;  %v1029_v47 = vmax.f32 %v3777_v62, %v804_v32 }
  0xfc   :  { %v327_v37 = vld [vmem:[#allocation4 + $0xf4] sm:$0x1]  ;;  %v807_v51 = vmax.f32 %v326_v44, %v567_v36  ;;  %v568_v41 = vld [vmem:[#allocation4 + $0xf5] sm:$0x1]  ;;  %v569_v43 = vld [vmem:[#allocation4 + $0xf6] sm:$0x1]  ;;  %v1030_v57 = vmax.f32 %v3783_v4, %v805_v38 }
  0xfd   :  { %v328_v52 = vld [vmem:[#allocation4 + $0xf5] sm:$0x1]  ;;  %1253 = vst [vmem:[#allocation2 + $0xf8] sm:$0x1] %v1027_v42  ;;  %1254 = vst [vmem:[#allocation2 + $0xf9] sm:$0x1] %v1028_v40  ;;  %v1031_v54 = vmax.f32 %v3785_v21, %v806_v33  ;;  %v808_v46 = vmax.f32 %v327_v37, %v568_v41 }
  0xfe   :  { %v809_v61 = vmax.f32 %v328_v52, %v569_v43  ;;  %v329_v59 = vld [vmem:[#allocation4 + $0xf6] sm:$0x1]  ;;  %v570_v48 = vld [vmem:[#allocation4 + $0xf7] sm:$0x1]  ;;  %1255 = vst [vmem:[#allocation2 + $0xfd] sm:$0x1] %v1029_v47  ;;  %v1032_v0 = vmax.f32 %v3789_v12, %v807_v51 }
  0xff   :  { %v330_v49 = vld [vmem:[#allocation4 + $0xf7] sm:$0x1]  ;;  %v810_v53 = vmax.f32 %v329_v59, %v570_v48  ;;  %v571_v62 = vld [vmem:[#allocation4 + $0xf8] sm:$0x1]  ;;  %v572_v56 = vld [vmem:[#allocation4 + $0xf9] sm:$0x1]  ;;  %v1033_v6 = vmax.f32 %v3795_v13, %v808_v46 }
 0x100   :  { %v331_v2 = vld [vmem:[#allocation4 + $0xf8] sm:$0x1]  ;;  %1256 = vst [vmem:[#allocation2 + $0xfe] sm:$0x1] %v1030_v57  ;;  %1257 = vst [vmem:[#allocation2 + $0xff] sm:$0x1] %v1031_v54  ;;  %v1034_v4 = vmax.f32 %v3797_v45, %v809_v61  ;;  %v811_v60 = vmax.f32 %v330_v49, %v571_v62 }
 0x101   :  { %v812_v21 = vmax.f32 %v331_v2, %v572_v56  ;;  %v332_v10 = vld [vmem:[#allocation4 + $0xf9] sm:$0x1]  ;;  %v573_v63 = vld [vmem:[#allocation4 + $0xfa] sm:$0x1]  ;;  %1258 = vst [vmem:[#allocation2 + $0x100] sm:$0x1] %v1032_v0  ;;  %v1035_v15 = vmax.f32 %v3801_v29, %v810_v53 }
 0x102   :  { %v333_v1 = vld [vmem:[#allocation4 + $0xfa] sm:$0x1]  ;;  %v813_v3 = vmax.f32 %v332_v10, %v573_v63  ;;  %v574_v12 = vld [vmem:[#allocation4 + $0xfb] sm:$0x1]  ;;  %v575_v5 = vld [vmem:[#allocation4 + $0xfc] sm:$0x1]  ;;  %v1036_v20 = vmax.f32 %v3807_v34, %v811_v60 }
 0x103   :  { %v334_v17 = vld [vmem:[#allocation4 + $0xfb] sm:$0x1]  ;;  %1259 = vst [vmem:[#allocation2 + $0x101] sm:$0x1] %v1033_v6  ;;  %1260 = vst [vmem:[#allocation2 + $0x102] sm:$0x1] %v1034_v4  ;;  %v1037_v13 = vmax.f32 %v3809_v58, %v812_v21  ;;  %v814_v11 = vmax.f32 %v333_v1, %v574_v12 }
 0x104   :  { %v815_v45 = vmax.f32 %v334_v17, %v575_v5  ;;  %v335_v23 = vld [vmem:[#allocation4 + $0xfc] sm:$0x1]  ;;  %v576_v8 = vld [vmem:[#allocation4 + $0xfd] sm:$0x1]  ;;  %1261 = vst [vmem:[#allocation2 + $0x103] sm:$0x1] %v1035_v15  ;;  %v1038_v26 = vmax.f32 %v3813_v50, %v813_v3 }
 0x105   :  { %v336_v16 = vld [vmem:[#allocation4 + $0xfd] sm:$0x1]  ;;  %v816_v18 = vmax.f32 %v335_v23, %v576_v8  ;;  %v577_v29 = vld [vmem:[#allocation4 + $0xfe] sm:$0x1]  ;;  %v578_v19 = vld [vmem:[#allocation4 + $0xff] sm:$0x1]  ;;  %v1039_v31 = vmax.f32 %v3819_v55, %v814_v11 }
 0x106   :  { %v337_v28 = vld [vmem:[#allocation4 + $0xfe] sm:$0x1]  ;;  %1262 = vst [vmem:[#allocation2 + $0x104] sm:$0x1] %v1036_v20  ;;  %1263 = vst [vmem:[#allocation2 + $0x105] sm:$0x1] %v1037_v13  ;;  %v1040_v34 = vmax.f32 %v3821_v9, %v815_v45  ;;  %v817_v24 = vmax.f32 %v336_v16, %v577_v29 }
 0x107   :  { %v818_v58 = vmax.f32 %v337_v28, %v578_v19  ;;  %v1270_v35 = vld [vmem:[#allocation2] sm:$0x1]  ;;  %v1510_v25 = vld [vmem:[#allocation2 + $0x1] sm:$0x1]  ;;  %v1871_v32 = vld [vmem:[#allocation2 + $0x2] sm:$0x1]  ;;  %v1041_v27 = vmax.f32 %v3825_v7, %v816_v18 }
 0x108   :  { %1264 = vst [vmem:[#allocation2 + $0x106] sm:$0x1] %v1038_v26  ;;  %v1390_v39 = vmul.f32 0.25, %v1270_v35  ;;  %v1630_v50 = vmul.f32 0.5, %v1510_v25  ;;  %v1271_v30 = vld [vmem:[#allocation2 + $0x2] sm:$0x1]  ;;  %v1042_v42 = vmax.f32 %v3831_v14, %v817_v24 }
 0x109   :  { %1265 = vst [vmem:[#allocation2 + $0x107] sm:$0x1] %v1039_v31  ;;  %1266 = vst [vmem:[#allocation2 + $0x108] sm:$0x1] %v1040_v34  ;;  %v1043_v40 = vmax.f32 %v3833_v22, %v818_v58  ;;  %v1991_v55 = vmul.f32 0.25, %v1871_v32  ;;  %v1391_v38 = vmul.f32 0.25, %v1271_v30 }
 0x10a   :  { %v1511_v9 = vld [vmem:[#allocation2 + $0x3] sm:$0x1]  ;;  %v1872_v33 = vld [vmem:[#allocation2 + $0x4] sm:$0x1]  ;;  %1267 = vst [vmem:[#allocation2 + $0x109] sm:$0x1] %v1041_v27  ;;  %v1750_v44 = vadd.f32 %v1630_v50, %v1390_v39 }
 0x10b   :  { %v1631_v36 = vmul.f32 0.5, %v1511_v9  ;;  %v1992_v37 = vmul.f32 0.25, %v1872_v33  ;;  %v1272_v47 = vld [vmem:[#allocation2 + $0x4] sm:$0x1]  ;;  %v1512_v51 = vld [vmem:[#allocation2 + $0x5] sm:$0x1] }
 0x10c   :  { %1268 = vst [vmem:[#allocation2 + $0x10a] sm:$0x1] %v1042_v42  ;;  %1269 = vst [vmem:[#allocation2 + $0x10b] sm:$0x1] %v1043_v40  ;;  %v1392_v7 = vmul.f32 0.25, %v1272_v47  ;;  %v1632_v41 = vmul.f32 0.5, %v1512_v51  ;;  %v2111_v57 = vadd.f32 %v1991_v55, %v1750_v44 }
 0x10d   :  { %v1873_v52 = vld [vmem:[#allocation2 + $0x6] sm:$0x1]  ;;  %v1751_v14 = vadd.f32 %v1631_v36, %v1391_v38  ;;  %v1513_v46 = vld [vmem:[#allocation2 + $0x7] sm:$0x1]  ;;  %v1874_v61 = vld [vmem:[#allocation2 + $0x8] sm:$0x1] }
 0x10e   :  { %v1273_v43 = vld [vmem:[#allocation2 + $0x6] sm:$0x1]  ;;  %v1993_v54 = vmul.f32 0.25, %v1873_v52  ;;  %v1752_v59 = vadd.f32 %v1632_v41, %v1392_v7  ;;  %v1633_v48 = vmul.f32 0.5, %v1513_v46  ;;  %v1994_v49 = vmul.f32 0.25, %v1874_v61  ;;  %s2934_s13 = sshll.u32 %s2999_s0, 4  ;;  %s2935_s13 = int_to_ptr.vmem [resolvable:$true] %s2934_s13 }
 0x10f   :  { %v1393_v22 = vmul.f32 0.25, %v1273_v43  ;;  %v1274_v0 = vld [vmem:[#allocation2 + $0x8] sm:$0x1]  ;;  %v1514_v53 = vld [vmem:[#allocation2 + $0x9] sm:$0x1]  ;;  %v2112_v62 = vadd.f32 %v1992_v37, %v1751_v14  ;;  %s2971_s14 = scalar_lea.vmem %s2935_s13, 1024  ;;  %p2976_p6 = scmp.lt.s32.totalorder %s2935_s13, %s2935_s13 }
 0x110   :  { %2232 = vst [vmem:[#allocation3 + $0x8] sm:$0x1] %v2111_v57  ;;  %v1394_v2 = vmul.f32 0.25, %v1274_v0  ;;  %v1634_v56 = vmul.f32 0.5, %v1514_v53  ;;  %v1875_v6 = vld [vmem:[#allocation2 + $0xa] sm:$0x1]  ;;  %v2113_v60 = vadd.f32 %v1993_v54, %v1752_v59  ;;  %p2972_p5 = scmp.ne.s32.totalorder %s2935_s13, %s2971_s14  ;;  %p2977_p7 = scmp.lt.s32.totalorder %s2971_s14, %s2971_s14 }
 0x111   :  { %v1275_v4 = vld [vmem:[#allocation2 + $0xa] sm:$0x1]  ;;  %v1753_v21 = vadd.f32 %v1633_v48, %v1393_v22  ;;  %v1995_v10 = vmul.f32 0.25, %v1875_v6  ;;  %v1515_v1 = vld [vmem:[#allocation2 + $0xb] sm:$0x1] }
 0x112   :  { %v1395_v63 = vmul.f32 0.25, %v1275_v4  ;;  %v1876_v15 = vld [vmem:[#allocation2 + $0xc] sm:$0x1]  ;;  %2233 = vst [vmem:[#allocation3 + $0x9] sm:$0x1] %v2112_v62  ;;  %v1754_v3 = vadd.f32 %v1634_v56, %v1394_v2  ;;  %v1635_v12 = vmul.f32 0.5, %v1515_v1  ;;  %p2978_p8 = por %p2977_p7, %p2976_p6 }
 0x113   :  { %v1996_v17 = vmul.f32 0.25, %v1876_v15  ;;  %v1276_v5 = vld [vmem:[#allocation2 + $0xc] sm:$0x1]  ;;  %v1516_v20 = vld [vmem:[#allocation2 + $0xd] sm:$0x1]  ;;  %v2114_v13 = vadd.f32 %v1994_v49, %v1753_v21 }
 0x114   :  { %2234 = vst [vmem:[#allocation3 + $0xa] sm:$0x1] %v2113_v60  ;;  %v1396_v11 = vmul.f32 0.25, %v1276_v5  ;;  %v1636_v45 = vmul.f32 0.5, %v1516_v20  ;;  %v1877_v23 = vld [vmem:[#allocation2 + $0xe] sm:$0x1]  ;;  %v2115_v16 = vadd.f32 %v1995_v10, %v1754_v3  ;;  %v1755_v26 = vadd.f32 %v1635_v12, %v1395_v63  ;;  %p2979_p9 = pnand %p2978_p8, %p2972_p5 }
 0x115   :  { %v1277_v8 = vld [vmem:[#allocation2 + $0xe] sm:$0x1]  ;;  %v1997_v18 = vmul.f32 0.25, %v1877_v23  ;;  %v1517_v28 = vld [vmem:[#allocation2 + $0xf] sm:$0x1] }
 0x116   :  { %v1397_v29 = vmul.f32 0.25, %v1277_v8  ;;  %v1878_v19 = vld [vmem:[#allocation2 + $0x10] sm:$0x1]  ;;  %2235 = vst [vmem:[#allocation3 + $0xb] sm:$0x1] %v2114_v13  ;;  %v1756_v31 = vadd.f32 %v1636_v45, %v1396_v11  ;;  %v1637_v34 = vmul.f32 0.5, %v1517_v28  ;;  %v2116_v25 = vadd.f32 %v1996_v17, %v1755_v26 }
 0x117   :  { %v1998_v24 = vmul.f32 0.25, %v1878_v19  ;;  %v1278_v58 = vld [vmem:[#allocation2 + $0x12] sm:$0x1]  ;;  %v1518_v35 = vld [vmem:[#allocation2 + $0x13] sm:$0x1] }
 0x118   :  { %2236 = vst [vmem:[#allocation3 + $0xc] sm:$0x1] %v2115_v16  ;;  %v1398_v32 = vmul.f32 0.25, %v1278_v58  ;;  %v1638_v27 = vmul.f32 0.5, %v1518_v35  ;;  %v1879_v39 = vld [vmem:[#allocation2 + $0x14] sm:$0x1]  ;;  %v2117_v30 = vadd.f32 %v1997_v18, %v1756_v31  ;;  %v1757_v42 = vadd.f32 %v1637_v34, %v1397_v29 }
 0x119   :  { %v1279_v50 = vld [vmem:[#allocation2 + $0x14] sm:$0x1]  ;;  %v1999_v40 = vmul.f32 0.25, %v1879_v39  ;;  %v1519_v38 = vld [vmem:[#allocation2 + $0x15] sm:$0x1] }
 0x11a   :  { %v1399_v55 = vmul.f32 0.25, %v1279_v50  ;;  %v1880_v9 = vld [vmem:[#allocation2 + $0x16] sm:$0x1]  ;;  %2237 = vst [vmem:[#allocation3 + $0xd] sm:$0x1] %v2116_v25  ;;  %v1758_v33 = vadd.f32 %v1638_v27, %v1398_v32  ;;  %v1639_v44 = vmul.f32 0.5, %v1519_v38  ;;  %v2118_v51 = vadd.f32 %v1998_v24, %v1757_v42 }
 0x11b   :  { %v2000_v36 = vmul.f32 0.25, %v1880_v9  ;;  %v1280_v37 = vld [vmem:[#allocation2 + $0x16] sm:$0x1]  ;;  %v1520_v47 = vld [vmem:[#allocation2 + $0x17] sm:$0x1] }
 0x11c   :  { %2238 = vst [vmem:[#allocation3 + $0xe] sm:$0x1] %v2117_v30  ;;  %v1400_v7 = vmul.f32 0.25, %v1280_v37  ;;  %v1640_v41 = vmul.f32 0.5, %v1520_v47  ;;  %v1881_v52 = vld [vmem:[#allocation2 + $0x18] sm:$0x1]  ;;  %v2119_v57 = vadd.f32 %v1999_v40, %v1758_v33  ;;  %v1759_v14 = vadd.f32 %v1639_v44, %v1399_v55 }
 0x11d   :  { %v1281_v43 = vld [vmem:[#allocation2 + $0x18] sm:$0x1]  ;;  %v2001_v54 = vmul.f32 0.25, %v1881_v52  ;;  %v1521_v46 = vld [vmem:[#allocation2 + $0x19] sm:$0x1] }
 0x11e   :  { %v1401_v22 = vmul.f32 0.25, %v1281_v43  ;;  %v1882_v61 = vld [vmem:[#allocation2 + $0x1a] sm:$0x1]  ;;  %2239 = vst [vmem:[#allocation3 + $0xf] sm:$0x1] %v2118_v51  ;;  %v1760_v59 = vadd.f32 %v1640_v41, %v1400_v7  ;;  %v1641_v48 = vmul.f32 0.5, %v1521_v46  ;;  %v2120_v62 = vadd.f32 %v2000_v36, %v1759_v14 }
 0x11f   :  { %v2002_v49 = vmul.f32 0.25, %v1882_v61  ;;  %v1282_v0 = vld [vmem:[#allocation2 + $0x1a] sm:$0x1]  ;;  %v1522_v53 = vld [vmem:[#allocation2 + $0x1b] sm:$0x1] }
 0x120   :  { %2240 = vst [vmem:[#allocation3 + $0x10] sm:$0x1] %v2119_v57  ;;  %v1402_v2 = vmul.f32 0.25, %v1282_v0  ;;  %v1642_v56 = vmul.f32 0.5, %v1522_v53  ;;  %v1883_v6 = vld [vmem:[#allocation2 + $0x1c] sm:$0x1]  ;;  %v2121_v60 = vadd.f32 %v2001_v54, %v1760_v59  ;;  %v1761_v21 = vadd.f32 %v1641_v48, %v1401_v22 }
 0x121   :  { %v1283_v4 = vld [vmem:[#allocation2 + $0x1c] sm:$0x1]  ;;  %v2003_v10 = vmul.f32 0.25, %v1883_v6  ;;  %v1523_v1 = vld [vmem:[#allocation2 + $0x1d] sm:$0x1] }
 0x122   :  { %v1403_v63 = vmul.f32 0.25, %v1283_v4  ;;  %v1884_v15 = vld [vmem:[#allocation2 + $0x1e] sm:$0x1]  ;;  %2241 = vst [vmem:[#allocation3 + $0x11] sm:$0x1] %v2120_v62  ;;  %v1762_v3 = vadd.f32 %v1642_v56, %v1402_v2  ;;  %v1643_v12 = vmul.f32 0.5, %v1523_v1  ;;  %v2122_v13 = vadd.f32 %v2002_v49, %v1761_v21 }
 0x123   :  { %v2004_v17 = vmul.f32 0.25, %v1884_v15  ;;  %v1284_v5 = vld [vmem:[#allocation2 + $0x1e] sm:$0x1]  ;;  %v1524_v20 = vld [vmem:[#allocation2 + $0x1f] sm:$0x1] }
 0x124   :  { %2242 = vst [vmem:[#allocation3 + $0x12] sm:$0x1] %v2121_v60  ;;  %v1404_v11 = vmul.f32 0.25, %v1284_v5  ;;  %v1644_v45 = vmul.f32 0.5, %v1524_v20  ;;  %v1885_v23 = vld [vmem:[#allocation2 + $0x20] sm:$0x1]  ;;  %v2123_v16 = vadd.f32 %v2003_v10, %v1762_v3  ;;  %v1763_v26 = vadd.f32 %v1643_v12, %v1403_v63 }
 0x125   :  { %v1285_v8 = vld [vmem:[#allocation2 + $0x20] sm:$0x1]  ;;  %v2005_v18 = vmul.f32 0.25, %v1885_v23  ;;  %v1525_v28 = vld [vmem:[#allocation2 + $0x21] sm:$0x1] }
 0x126   :  { %v1405_v29 = vmul.f32 0.25, %v1285_v8  ;;  %v1886_v19 = vld [vmem:[#allocation2 + $0x22] sm:$0x1]  ;;  %2243 = vst [vmem:[#allocation3 + $0x13] sm:$0x1] %v2122_v13  ;;  %v1764_v31 = vadd.f32 %v1644_v45, %v1404_v11  ;;  %v1645_v34 = vmul.f32 0.5, %v1525_v28  ;;  %v2124_v25 = vadd.f32 %v2004_v17, %v1763_v26 }
 0x127   :  { %v2006_v24 = vmul.f32 0.25, %v1886_v19  ;;  %v1286_v58 = vld [vmem:[#allocation2 + $0x24] sm:$0x1]  ;;  %v1526_v35 = vld [vmem:[#allocation2 + $0x25] sm:$0x1] }
 0x128   :  { %2244 = vst [vmem:[#allocation3 + $0x14] sm:$0x1] %v2123_v16  ;;  %v1406_v32 = vmul.f32 0.25, %v1286_v58  ;;  %v1646_v27 = vmul.f32 0.5, %v1526_v35  ;;  %v1887_v39 = vld [vmem:[#allocation2 + $0x26] sm:$0x1]  ;;  %v2125_v30 = vadd.f32 %v2005_v18, %v1764_v31  ;;  %v1765_v42 = vadd.f32 %v1645_v34, %v1405_v29 }
 0x129   :  { %v1287_v50 = vld [vmem:[#allocation2 + $0x26] sm:$0x1]  ;;  %v2007_v40 = vmul.f32 0.25, %v1887_v39  ;;  %v1527_v38 = vld [vmem:[#allocation2 + $0x27] sm:$0x1] }
 0x12a   :  { %v1407_v55 = vmul.f32 0.25, %v1287_v50  ;;  %v1888_v9 = vld [vmem:[#allocation2 + $0x28] sm:$0x1]  ;;  %2245 = vst [vmem:[#allocation3 + $0x15] sm:$0x1] %v2124_v25  ;;  %v1766_v33 = vadd.f32 %v1646_v27, %v1406_v32  ;;  %v1647_v44 = vmul.f32 0.5, %v1527_v38  ;;  %v2126_v51 = vadd.f32 %v2006_v24, %v1765_v42 }
 0x12b   :  { %v2008_v36 = vmul.f32 0.25, %v1888_v9  ;;  %v1288_v37 = vld [vmem:[#allocation2 + $0x28] sm:$0x1]  ;;  %v1528_v47 = vld [vmem:[#allocation2 + $0x29] sm:$0x1] }
 0x12c   :  { %2246 = vst [vmem:[#allocation3 + $0x16] sm:$0x1] %v2125_v30  ;;  %v1408_v7 = vmul.f32 0.25, %v1288_v37  ;;  %v1648_v41 = vmul.f32 0.5, %v1528_v47  ;;  %v1889_v52 = vld [vmem:[#allocation2 + $0x2a] sm:$0x1]  ;;  %v2127_v57 = vadd.f32 %v2007_v40, %v1766_v33  ;;  %v1767_v14 = vadd.f32 %v1647_v44, %v1407_v55 }
 0x12d   :  { %v1289_v43 = vld [vmem:[#allocation2 + $0x2a] sm:$0x1]  ;;  %v2009_v54 = vmul.f32 0.25, %v1889_v52  ;;  %v1529_v46 = vld [vmem:[#allocation2 + $0x2b] sm:$0x1] }
 0x12e   :  { %v1409_v22 = vmul.f32 0.25, %v1289_v43  ;;  %v1890_v61 = vld [vmem:[#allocation2 + $0x2c] sm:$0x1]  ;;  %2247 = vst [vmem:[#allocation3 + $0x17] sm:$0x1] %v2126_v51  ;;  %v1768_v59 = vadd.f32 %v1648_v41, %v1408_v7  ;;  %v1649_v48 = vmul.f32 0.5, %v1529_v46  ;;  %v2128_v62 = vadd.f32 %v2008_v36, %v1767_v14 }
 0x12f   :  { %v2010_v49 = vmul.f32 0.25, %v1890_v61  ;;  %v1290_v0 = vld [vmem:[#allocation2 + $0x2c] sm:$0x1]  ;;  %v1530_v53 = vld [vmem:[#allocation2 + $0x2d] sm:$0x1] }
 0x130   :  { %2248 = vst [vmem:[#allocation3 + $0x18] sm:$0x1] %v2127_v57  ;;  %v1410_v2 = vmul.f32 0.25, %v1290_v0  ;;  %v1650_v56 = vmul.f32 0.5, %v1530_v53  ;;  %v1891_v6 = vld [vmem:[#allocation2 + $0x2e] sm:$0x1]  ;;  %v2129_v60 = vadd.f32 %v2009_v54, %v1768_v59  ;;  %v1769_v21 = vadd.f32 %v1649_v48, %v1409_v22 }
 0x131   :  { %v1291_v4 = vld [vmem:[#allocation2 + $0x2e] sm:$0x1]  ;;  %v2011_v10 = vmul.f32 0.25, %v1891_v6  ;;  %v1531_v1 = vld [vmem:[#allocation2 + $0x2f] sm:$0x1] }
 0x132   :  { %v1411_v63 = vmul.f32 0.25, %v1291_v4  ;;  %v1892_v15 = vld [vmem:[#allocation2 + $0x30] sm:$0x1]  ;;  %2249 = vst [vmem:[#allocation3 + $0x19] sm:$0x1] %v2128_v62  ;;  %v1770_v3 = vadd.f32 %v1650_v56, %v1410_v2  ;;  %v1651_v12 = vmul.f32 0.5, %v1531_v1  ;;  %v2130_v13 = vadd.f32 %v2010_v49, %v1769_v21 }
 0x133   :  { %v2012_v17 = vmul.f32 0.25, %v1892_v15  ;;  %v1292_v5 = vld [vmem:[#allocation2 + $0x30] sm:$0x1]  ;;  %v1532_v20 = vld [vmem:[#allocation2 + $0x31] sm:$0x1] }
 0x134   :  { %2250 = vst [vmem:[#allocation3 + $0x1a] sm:$0x1] %v2129_v60  ;;  %v1412_v11 = vmul.f32 0.25, %v1292_v5  ;;  %v1652_v45 = vmul.f32 0.5, %v1532_v20  ;;  %v1893_v23 = vld [vmem:[#allocation2 + $0x32] sm:$0x1]  ;;  %v2131_v16 = vadd.f32 %v2011_v10, %v1770_v3  ;;  %v1771_v26 = vadd.f32 %v1651_v12, %v1411_v63 }
 0x135   :  { %v1293_v8 = vld [vmem:[#allocation2 + $0x32] sm:$0x1]  ;;  %v2013_v18 = vmul.f32 0.25, %v1893_v23  ;;  %v1533_v28 = vld [vmem:[#allocation2 + $0x33] sm:$0x1] }
 0x136   :  { %v1413_v29 = vmul.f32 0.25, %v1293_v8  ;;  %v1894_v19 = vld [vmem:[#allocation2 + $0x34] sm:$0x1]  ;;  %2251 = vst [vmem:[#allocation3 + $0x1b] sm:$0x1] %v2130_v13  ;;  %v1772_v31 = vadd.f32 %v1652_v45, %v1412_v11  ;;  %v1653_v34 = vmul.f32 0.5, %v1533_v28  ;;  %v2132_v25 = vadd.f32 %v2012_v17, %v1771_v26 }
 0x137   :  { %v2014_v24 = vmul.f32 0.25, %v1894_v19  ;;  %v1294_v58 = vld [vmem:[#allocation2 + $0x36] sm:$0x1]  ;;  %v1534_v35 = vld [vmem:[#allocation2 + $0x37] sm:$0x1] }
 0x138   :  { %2252 = vst [vmem:[#allocation3 + $0x1c] sm:$0x1] %v2131_v16  ;;  %v1414_v32 = vmul.f32 0.25, %v1294_v58  ;;  %v1654_v27 = vmul.f32 0.5, %v1534_v35  ;;  %v1895_v39 = vld [vmem:[#allocation2 + $0x38] sm:$0x1]  ;;  %v2133_v30 = vadd.f32 %v2013_v18, %v1772_v31  ;;  %v1773_v42 = vadd.f32 %v1653_v34, %v1413_v29 }
 0x139   :  { %v1295_v50 = vld [vmem:[#allocation2 + $0x38] sm:$0x1]  ;;  %v2015_v40 = vmul.f32 0.25, %v1895_v39  ;;  %v1535_v38 = vld [vmem:[#allocation2 + $0x39] sm:$0x1] }
 0x13a   :  { %v1415_v55 = vmul.f32 0.25, %v1295_v50  ;;  %v1896_v9 = vld [vmem:[#allocation2 + $0x3a] sm:$0x1]  ;;  %2253 = vst [vmem:[#allocation3 + $0x1d] sm:$0x1] %v2132_v25  ;;  %v1774_v33 = vadd.f32 %v1654_v27, %v1414_v32  ;;  %v1655_v44 = vmul.f32 0.5, %v1535_v38  ;;  %v2134_v51 = vadd.f32 %v2014_v24, %v1773_v42 }
 0x13b   :  { %v2016_v36 = vmul.f32 0.25, %v1896_v9  ;;  %v1296_v37 = vld [vmem:[#allocation2 + $0x3a] sm:$0x1]  ;;  %v1536_v47 = vld [vmem:[#allocation2 + $0x3b] sm:$0x1] }
 0x13c   :  { %2254 = vst [vmem:[#allocation3 + $0x1e] sm:$0x1] %v2133_v30  ;;  %v1416_v7 = vmul.f32 0.25, %v1296_v37  ;;  %v1656_v41 = vmul.f32 0.5, %v1536_v47  ;;  %v1897_v52 = vld [vmem:[#allocation2 + $0x3c] sm:$0x1]  ;;  %v2135_v57 = vadd.f32 %v2015_v40, %v1774_v33  ;;  %v1775_v14 = vadd.f32 %v1655_v44, %v1415_v55 }
 0x13d   :  { %v1297_v43 = vld [vmem:[#allocation2 + $0x3c] sm:$0x1]  ;;  %v2017_v54 = vmul.f32 0.25, %v1897_v52  ;;  %v1537_v46 = vld [vmem:[#allocation2 + $0x3d] sm:$0x1] }
 0x13e   :  { %v1417_v22 = vmul.f32 0.25, %v1297_v43  ;;  %v1898_v61 = vld [vmem:[#allocation2 + $0x3e] sm:$0x1]  ;;  %2255 = vst [vmem:[#allocation3 + $0x1f] sm:$0x1] %v2134_v51  ;;  %v1776_v59 = vadd.f32 %v1656_v41, %v1416_v7  ;;  %v1657_v48 = vmul.f32 0.5, %v1537_v46  ;;  %v2136_v62 = vadd.f32 %v2016_v36, %v1775_v14 }
 0x13f   :  { %v2018_v49 = vmul.f32 0.25, %v1898_v61  ;;  %v1298_v0 = vld [vmem:[#allocation2 + $0x3e] sm:$0x1]  ;;  %v1538_v53 = vld [vmem:[#allocation2 + $0x3f] sm:$0x1] }
 0x140   :  { %2256 = vst [vmem:[#allocation3 + $0x20] sm:$0x1] %v2135_v57  ;;  %v1418_v2 = vmul.f32 0.25, %v1298_v0  ;;  %v1658_v56 = vmul.f32 0.5, %v1538_v53  ;;  %v1899_v6 = vld [vmem:[#allocation2 + $0x40] sm:$0x1]  ;;  %v2137_v60 = vadd.f32 %v2017_v54, %v1776_v59  ;;  %v1777_v21 = vadd.f32 %v1657_v48, %v1417_v22 }
 0x141   :  { %v1299_v4 = vld [vmem:[#allocation2 + $0x40] sm:$0x1]  ;;  %v2019_v10 = vmul.f32 0.25, %v1899_v6  ;;  %v1539_v1 = vld [vmem:[#allocation2 + $0x41] sm:$0x1] }
 0x142   :  { %v1419_v63 = vmul.f32 0.25, %v1299_v4  ;;  %v1900_v15 = vld [vmem:[#allocation2 + $0x42] sm:$0x1]  ;;  %2257 = vst [vmem:[#allocation3 + $0x21] sm:$0x1] %v2136_v62  ;;  %v1778_v3 = vadd.f32 %v1658_v56, %v1418_v2  ;;  %v1659_v12 = vmul.f32 0.5, %v1539_v1  ;;  %v2138_v13 = vadd.f32 %v2018_v49, %v1777_v21 }
 0x143   :  { %v2020_v17 = vmul.f32 0.25, %v1900_v15  ;;  %v1300_v5 = vld [vmem:[#allocation2 + $0x42] sm:$0x1]  ;;  %v1540_v20 = vld [vmem:[#allocation2 + $0x43] sm:$0x1] }
 0x144   :  { %2258 = vst [vmem:[#allocation3 + $0x22] sm:$0x1] %v2137_v60  ;;  %v1420_v11 = vmul.f32 0.25, %v1300_v5  ;;  %v1660_v45 = vmul.f32 0.5, %v1540_v20  ;;  %v1901_v23 = vld [vmem:[#allocation2 + $0x44] sm:$0x1]  ;;  %v2139_v16 = vadd.f32 %v2019_v10, %v1778_v3  ;;  %v1779_v26 = vadd.f32 %v1659_v12, %v1419_v63 }
 0x145   :  { %v1301_v8 = vld [vmem:[#allocation2 + $0x44] sm:$0x1]  ;;  %v2021_v18 = vmul.f32 0.25, %v1901_v23  ;;  %v1541_v28 = vld [vmem:[#allocation2 + $0x45] sm:$0x1] }
 0x146   :  { %v1421_v29 = vmul.f32 0.25, %v1301_v8  ;;  %v1902_v19 = vld [vmem:[#allocation2 + $0x46] sm:$0x1]  ;;  %2259 = vst [vmem:[#allocation3 + $0x23] sm:$0x1] %v2138_v13  ;;  %v1780_v31 = vadd.f32 %v1660_v45, %v1420_v11  ;;  %v1661_v34 = vmul.f32 0.5, %v1541_v28  ;;  %v2140_v25 = vadd.f32 %v2020_v17, %v1779_v26 }
 0x147   :  { %v2022_v24 = vmul.f32 0.25, %v1902_v19  ;;  %v1302_v58 = vld [vmem:[#allocation2 + $0x48] sm:$0x1]  ;;  %v1542_v35 = vld [vmem:[#allocation2 + $0x49] sm:$0x1] }
 0x148   :  { %2260 = vst [vmem:[#allocation3 + $0x24] sm:$0x1] %v2139_v16  ;;  %v1422_v32 = vmul.f32 0.25, %v1302_v58  ;;  %v1662_v27 = vmul.f32 0.5, %v1542_v35  ;;  %v1903_v39 = vld [vmem:[#allocation2 + $0x4a] sm:$0x1]  ;;  %v2141_v30 = vadd.f32 %v2021_v18, %v1780_v31  ;;  %v1781_v42 = vadd.f32 %v1661_v34, %v1421_v29 }
 0x149   :  { %v1303_v50 = vld [vmem:[#allocation2 + $0x4a] sm:$0x1]  ;;  %v2023_v40 = vmul.f32 0.25, %v1903_v39  ;;  %v1543_v38 = vld [vmem:[#allocation2 + $0x4b] sm:$0x1] }
 0x14a   :  { %v1423_v55 = vmul.f32 0.25, %v1303_v50  ;;  %v1904_v9 = vld [vmem:[#allocation2 + $0x4c] sm:$0x1]  ;;  %2261 = vst [vmem:[#allocation3 + $0x25] sm:$0x1] %v2140_v25  ;;  %v1782_v33 = vadd.f32 %v1662_v27, %v1422_v32  ;;  %v1663_v44 = vmul.f32 0.5, %v1543_v38  ;;  %v2142_v51 = vadd.f32 %v2022_v24, %v1781_v42 }
 0x14b   :  { %v2024_v36 = vmul.f32 0.25, %v1904_v9  ;;  %v1304_v37 = vld [vmem:[#allocation2 + $0x4c] sm:$0x1]  ;;  %v1544_v47 = vld [vmem:[#allocation2 + $0x4d] sm:$0x1] }
 0x14c   :  { %2262 = vst [vmem:[#allocation3 + $0x26] sm:$0x1] %v2141_v30  ;;  %v1424_v7 = vmul.f32 0.25, %v1304_v37  ;;  %v1664_v41 = vmul.f32 0.5, %v1544_v47  ;;  %v1905_v52 = vld [vmem:[#allocation2 + $0x4e] sm:$0x1]  ;;  %v2143_v57 = vadd.f32 %v2023_v40, %v1782_v33  ;;  %v1783_v14 = vadd.f32 %v1663_v44, %v1423_v55 }
 0x14d   :  { %v1305_v43 = vld [vmem:[#allocation2 + $0x4e] sm:$0x1]  ;;  %v2025_v54 = vmul.f32 0.25, %v1905_v52  ;;  %v1545_v46 = vld [vmem:[#allocation2 + $0x4f] sm:$0x1] }
 0x14e   :  { %v1425_v22 = vmul.f32 0.25, %v1305_v43  ;;  %v1906_v61 = vld [vmem:[#allocation2 + $0x50] sm:$0x1]  ;;  %2263 = vst [vmem:[#allocation3 + $0x27] sm:$0x1] %v2142_v51  ;;  %v1784_v59 = vadd.f32 %v1664_v41, %v1424_v7  ;;  %v1665_v48 = vmul.f32 0.5, %v1545_v46  ;;  %v2144_v62 = vadd.f32 %v2024_v36, %v1783_v14 }
 0x14f   :  { %v2026_v49 = vmul.f32 0.25, %v1906_v61  ;;  %v1306_v0 = vld [vmem:[#allocation2 + $0x50] sm:$0x1]  ;;  %v1546_v53 = vld [vmem:[#allocation2 + $0x51] sm:$0x1] }
 0x150   :  { %2264 = vst [vmem:[#allocation3 + $0x28] sm:$0x1] %v2143_v57  ;;  %v1426_v2 = vmul.f32 0.25, %v1306_v0  ;;  %v1666_v56 = vmul.f32 0.5, %v1546_v53  ;;  %v1907_v6 = vld [vmem:[#allocation2 + $0x52] sm:$0x1]  ;;  %v2145_v60 = vadd.f32 %v2025_v54, %v1784_v59  ;;  %v1785_v21 = vadd.f32 %v1665_v48, %v1425_v22 }
 0x151   :  { %v1307_v4 = vld [vmem:[#allocation2 + $0x52] sm:$0x1]  ;;  %v2027_v10 = vmul.f32 0.25, %v1907_v6  ;;  %v1547_v1 = vld [vmem:[#allocation2 + $0x53] sm:$0x1] }
 0x152   :  { %v1427_v63 = vmul.f32 0.25, %v1307_v4  ;;  %v1908_v15 = vld [vmem:[#allocation2 + $0x54] sm:$0x1]  ;;  %2265 = vst [vmem:[#allocation3 + $0x29] sm:$0x1] %v2144_v62  ;;  %v1786_v3 = vadd.f32 %v1666_v56, %v1426_v2  ;;  %v1667_v12 = vmul.f32 0.5, %v1547_v1  ;;  %v2146_v13 = vadd.f32 %v2026_v49, %v1785_v21 }
 0x153   :  { %v2028_v17 = vmul.f32 0.25, %v1908_v15  ;;  %v1308_v5 = vld [vmem:[#allocation2 + $0x54] sm:$0x1]  ;;  %v1548_v20 = vld [vmem:[#allocation2 + $0x55] sm:$0x1] }
 0x154   :  { %2266 = vst [vmem:[#allocation3 + $0x2a] sm:$0x1] %v2145_v60  ;;  %v1428_v11 = vmul.f32 0.25, %v1308_v5  ;;  %v1668_v45 = vmul.f32 0.5, %v1548_v20  ;;  %v1909_v23 = vld [vmem:[#allocation2 + $0x56] sm:$0x1]  ;;  %v2147_v16 = vadd.f32 %v2027_v10, %v1786_v3  ;;  %v1787_v26 = vadd.f32 %v1667_v12, %v1427_v63 }
 0x155   :  { %v1309_v8 = vld [vmem:[#allocation2 + $0x56] sm:$0x1]  ;;  %v2029_v18 = vmul.f32 0.25, %v1909_v23  ;;  %v1549_v28 = vld [vmem:[#allocation2 + $0x57] sm:$0x1] }
 0x156   :  { %v1429_v29 = vmul.f32 0.25, %v1309_v8  ;;  %v1910_v19 = vld [vmem:[#allocation2 + $0x58] sm:$0x1]  ;;  %2267 = vst [vmem:[#allocation3 + $0x2b] sm:$0x1] %v2146_v13  ;;  %v1788_v31 = vadd.f32 %v1668_v45, %v1428_v11  ;;  %v1669_v34 = vmul.f32 0.5, %v1549_v28  ;;  %v2148_v25 = vadd.f32 %v2028_v17, %v1787_v26 }
 0x157   :  { %v2030_v24 = vmul.f32 0.25, %v1910_v19  ;;  %v1310_v58 = vld [vmem:[#allocation2 + $0x5a] sm:$0x1]  ;;  %v1550_v35 = vld [vmem:[#allocation2 + $0x5b] sm:$0x1] }
 0x158   :  { %2268 = vst [vmem:[#allocation3 + $0x2c] sm:$0x1] %v2147_v16  ;;  %v1430_v32 = vmul.f32 0.25, %v1310_v58  ;;  %v1670_v27 = vmul.f32 0.5, %v1550_v35  ;;  %v1911_v39 = vld [vmem:[#allocation2 + $0x5c] sm:$0x1]  ;;  %v2149_v30 = vadd.f32 %v2029_v18, %v1788_v31  ;;  %v1789_v42 = vadd.f32 %v1669_v34, %v1429_v29 }
 0x159   :  { %v1311_v50 = vld [vmem:[#allocation2 + $0x5c] sm:$0x1]  ;;  %v2031_v40 = vmul.f32 0.25, %v1911_v39  ;;  %v1551_v38 = vld [vmem:[#allocation2 + $0x5d] sm:$0x1] }
 0x15a   :  { %v1431_v55 = vmul.f32 0.25, %v1311_v50  ;;  %v1912_v9 = vld [vmem:[#allocation2 + $0x5e] sm:$0x1]  ;;  %2269 = vst [vmem:[#allocation3 + $0x2d] sm:$0x1] %v2148_v25  ;;  %v1790_v33 = vadd.f32 %v1670_v27, %v1430_v32  ;;  %v1671_v44 = vmul.f32 0.5, %v1551_v38  ;;  %v2150_v51 = vadd.f32 %v2030_v24, %v1789_v42 }
 0x15b   :  { %v2032_v36 = vmul.f32 0.25, %v1912_v9  ;;  %v1312_v37 = vld [vmem:[#allocation2 + $0x5e] sm:$0x1]  ;;  %v1552_v47 = vld [vmem:[#allocation2 + $0x5f] sm:$0x1] }
 0x15c   :  { %2270 = vst [vmem:[#allocation3 + $0x2e] sm:$0x1] %v2149_v30  ;;  %v1432_v7 = vmul.f32 0.25, %v1312_v37  ;;  %v1672_v41 = vmul.f32 0.5, %v1552_v47  ;;  %v1913_v52 = vld [vmem:[#allocation2 + $0x60] sm:$0x1]  ;;  %v2151_v57 = vadd.f32 %v2031_v40, %v1790_v33  ;;  %v1791_v14 = vadd.f32 %v1671_v44, %v1431_v55 }
 0x15d   :  { %v1313_v43 = vld [vmem:[#allocation2 + $0x60] sm:$0x1]  ;;  %v2033_v54 = vmul.f32 0.25, %v1913_v52  ;;  %v1553_v46 = vld [vmem:[#allocation2 + $0x61] sm:$0x1] }
 0x15e   :  { %v1433_v22 = vmul.f32 0.25, %v1313_v43  ;;  %v1914_v61 = vld [vmem:[#allocation2 + $0x62] sm:$0x1]  ;;  %2271 = vst [vmem:[#allocation3 + $0x2f] sm:$0x1] %v2150_v51  ;;  %v1792_v59 = vadd.f32 %v1672_v41, %v1432_v7  ;;  %v1673_v48 = vmul.f32 0.5, %v1553_v46  ;;  %v2152_v62 = vadd.f32 %v2032_v36, %v1791_v14 }
 0x15f   :  { %v2034_v49 = vmul.f32 0.25, %v1914_v61  ;;  %v1314_v0 = vld [vmem:[#allocation2 + $0x62] sm:$0x1]  ;;  %v1554_v53 = vld [vmem:[#allocation2 + $0x63] sm:$0x1] }
 0x160   :  { %2272 = vst [vmem:[#allocation3 + $0x30] sm:$0x1] %v2151_v57  ;;  %v1434_v2 = vmul.f32 0.25, %v1314_v0  ;;  %v1674_v56 = vmul.f32 0.5, %v1554_v53  ;;  %v1915_v6 = vld [vmem:[#allocation2 + $0x64] sm:$0x1]  ;;  %v2153_v60 = vadd.f32 %v2033_v54, %v1792_v59  ;;  %v1793_v21 = vadd.f32 %v1673_v48, %v1433_v22 }
 0x161   :  { %v1315_v4 = vld [vmem:[#allocation2 + $0x64] sm:$0x1]  ;;  %v2035_v10 = vmul.f32 0.25, %v1915_v6  ;;  %v1555_v1 = vld [vmem:[#allocation2 + $0x65] sm:$0x1] }
 0x162   :  { %v1435_v63 = vmul.f32 0.25, %v1315_v4  ;;  %v1916_v15 = vld [vmem:[#allocation2 + $0x66] sm:$0x1]  ;;  %2273 = vst [vmem:[#allocation3 + $0x31] sm:$0x1] %v2152_v62  ;;  %v1794_v3 = vadd.f32 %v1674_v56, %v1434_v2  ;;  %v1675_v12 = vmul.f32 0.5, %v1555_v1  ;;  %v2154_v13 = vadd.f32 %v2034_v49, %v1793_v21 }
 0x163   :  { %v2036_v17 = vmul.f32 0.25, %v1916_v15  ;;  %v1316_v5 = vld [vmem:[#allocation2 + $0x66] sm:$0x1]  ;;  %v1556_v20 = vld [vmem:[#allocation2 + $0x67] sm:$0x1] }
 0x164   :  { %2274 = vst [vmem:[#allocation3 + $0x32] sm:$0x1] %v2153_v60  ;;  %v1436_v11 = vmul.f32 0.25, %v1316_v5  ;;  %v1676_v45 = vmul.f32 0.5, %v1556_v20  ;;  %v1917_v23 = vld [vmem:[#allocation2 + $0x68] sm:$0x1]  ;;  %v2155_v16 = vadd.f32 %v2035_v10, %v1794_v3  ;;  %v1795_v26 = vadd.f32 %v1675_v12, %v1435_v63 }
 0x165   :  { %v1317_v8 = vld [vmem:[#allocation2 + $0x68] sm:$0x1]  ;;  %v2037_v18 = vmul.f32 0.25, %v1917_v23  ;;  %v1557_v28 = vld [vmem:[#allocation2 + $0x69] sm:$0x1] }
 0x166   :  { %v1437_v29 = vmul.f32 0.25, %v1317_v8  ;;  %v1918_v19 = vld [vmem:[#allocation2 + $0x6a] sm:$0x1]  ;;  %2275 = vst [vmem:[#allocation3 + $0x33] sm:$0x1] %v2154_v13  ;;  %v1796_v31 = vadd.f32 %v1676_v45, %v1436_v11  ;;  %v1677_v34 = vmul.f32 0.5, %v1557_v28  ;;  %v2156_v25 = vadd.f32 %v2036_v17, %v1795_v26 }
 0x167   :  { %v2038_v24 = vmul.f32 0.25, %v1918_v19  ;;  %v1318_v58 = vld [vmem:[#allocation2 + $0x6c] sm:$0x1]  ;;  %v1558_v35 = vld [vmem:[#allocation2 + $0x6d] sm:$0x1] }
 0x168   :  { %2276 = vst [vmem:[#allocation3 + $0x34] sm:$0x1] %v2155_v16  ;;  %v1438_v32 = vmul.f32 0.25, %v1318_v58  ;;  %v1678_v27 = vmul.f32 0.5, %v1558_v35  ;;  %v1919_v39 = vld [vmem:[#allocation2 + $0x6e] sm:$0x1]  ;;  %v2157_v30 = vadd.f32 %v2037_v18, %v1796_v31  ;;  %v1797_v42 = vadd.f32 %v1677_v34, %v1437_v29 }
 0x169   :  { %v1319_v50 = vld [vmem:[#allocation2 + $0x6e] sm:$0x1]  ;;  %v2039_v40 = vmul.f32 0.25, %v1919_v39  ;;  %v1559_v38 = vld [vmem:[#allocation2 + $0x6f] sm:$0x1] }
 0x16a   :  { %v1439_v55 = vmul.f32 0.25, %v1319_v50  ;;  %v1920_v9 = vld [vmem:[#allocation2 + $0x70] sm:$0x1]  ;;  %2277 = vst [vmem:[#allocation3 + $0x35] sm:$0x1] %v2156_v25  ;;  %v1798_v33 = vadd.f32 %v1678_v27, %v1438_v32  ;;  %v1679_v44 = vmul.f32 0.5, %v1559_v38  ;;  %v2158_v51 = vadd.f32 %v2038_v24, %v1797_v42 }
 0x16b   :  { %v2040_v36 = vmul.f32 0.25, %v1920_v9  ;;  %v1320_v37 = vld [vmem:[#allocation2 + $0x70] sm:$0x1]  ;;  %v1560_v47 = vld [vmem:[#allocation2 + $0x71] sm:$0x1] }
 0x16c   :  { %2278 = vst [vmem:[#allocation3 + $0x36] sm:$0x1] %v2157_v30  ;;  %v1440_v7 = vmul.f32 0.25, %v1320_v37  ;;  %v1680_v41 = vmul.f32 0.5, %v1560_v47  ;;  %v1921_v52 = vld [vmem:[#allocation2 + $0x72] sm:$0x1]  ;;  %v2159_v57 = vadd.f32 %v2039_v40, %v1798_v33  ;;  %v1799_v14 = vadd.f32 %v1679_v44, %v1439_v55 }
 0x16d   :  { %v1321_v43 = vld [vmem:[#allocation2 + $0x72] sm:$0x1]  ;;  %v2041_v54 = vmul.f32 0.25, %v1921_v52  ;;  %v1561_v46 = vld [vmem:[#allocation2 + $0x73] sm:$0x1] }
 0x16e   :  { %v1441_v22 = vmul.f32 0.25, %v1321_v43  ;;  %v1922_v61 = vld [vmem:[#allocation2 + $0x74] sm:$0x1]  ;;  %2279 = vst [vmem:[#allocation3 + $0x37] sm:$0x1] %v2158_v51  ;;  %v1800_v59 = vadd.f32 %v1680_v41, %v1440_v7  ;;  %v1681_v48 = vmul.f32 0.5, %v1561_v46  ;;  %v2160_v62 = vadd.f32 %v2040_v36, %v1799_v14 }
 0x16f   :  { %v2042_v49 = vmul.f32 0.25, %v1922_v61  ;;  %v1322_v0 = vld [vmem:[#allocation2 + $0x74] sm:$0x1]  ;;  %v1562_v53 = vld [vmem:[#allocation2 + $0x75] sm:$0x1] }
 0x170   :  { %2280 = vst [vmem:[#allocation3 + $0x38] sm:$0x1] %v2159_v57  ;;  %v1442_v2 = vmul.f32 0.25, %v1322_v0  ;;  %v1682_v56 = vmul.f32 0.5, %v1562_v53  ;;  %v1923_v6 = vld [vmem:[#allocation2 + $0x76] sm:$0x1]  ;;  %v2161_v60 = vadd.f32 %v2041_v54, %v1800_v59  ;;  %v1801_v21 = vadd.f32 %v1681_v48, %v1441_v22 }
 0x171   :  { %v1323_v4 = vld [vmem:[#allocation2 + $0x76] sm:$0x1]  ;;  %v2043_v10 = vmul.f32 0.25, %v1923_v6  ;;  %v1563_v1 = vld [vmem:[#allocation2 + $0x77] sm:$0x1] }
 0x172   :  { %v1443_v63 = vmul.f32 0.25, %v1323_v4  ;;  %v1924_v15 = vld [vmem:[#allocation2 + $0x78] sm:$0x1]  ;;  %2281 = vst [vmem:[#allocation3 + $0x39] sm:$0x1] %v2160_v62  ;;  %v1802_v3 = vadd.f32 %v1682_v56, %v1442_v2  ;;  %v1683_v12 = vmul.f32 0.5, %v1563_v1  ;;  %v2162_v13 = vadd.f32 %v2042_v49, %v1801_v21 }
 0x173   :  { %v2044_v17 = vmul.f32 0.25, %v1924_v15  ;;  %v1324_v5 = vld [vmem:[#allocation2 + $0x78] sm:$0x1]  ;;  %v1564_v20 = vld [vmem:[#allocation2 + $0x79] sm:$0x1] }
 0x174   :  { %2282 = vst [vmem:[#allocation3 + $0x3a] sm:$0x1] %v2161_v60  ;;  %v1444_v11 = vmul.f32 0.25, %v1324_v5  ;;  %v1684_v45 = vmul.f32 0.5, %v1564_v20  ;;  %v1925_v23 = vld [vmem:[#allocation2 + $0x7a] sm:$0x1]  ;;  %v2163_v16 = vadd.f32 %v2043_v10, %v1802_v3  ;;  %v1803_v26 = vadd.f32 %v1683_v12, %v1443_v63 }
 0x175   :  { %v1325_v8 = vld [vmem:[#allocation2 + $0x7a] sm:$0x1]  ;;  %v2045_v18 = vmul.f32 0.25, %v1925_v23  ;;  %v1565_v28 = vld [vmem:[#allocation2 + $0x7b] sm:$0x1] }
 0x176   :  { %v1445_v29 = vmul.f32 0.25, %v1325_v8  ;;  %v1926_v19 = vld [vmem:[#allocation2 + $0x7c] sm:$0x1]  ;;  %2283 = vst [vmem:[#allocation3 + $0x3b] sm:$0x1] %v2162_v13  ;;  %v1804_v31 = vadd.f32 %v1684_v45, %v1444_v11  ;;  %v1685_v34 = vmul.f32 0.5, %v1565_v28  ;;  %v2164_v25 = vadd.f32 %v2044_v17, %v1803_v26 }
 0x177   :  { %v2046_v24 = vmul.f32 0.25, %v1926_v19  ;;  %v1326_v58 = vld [vmem:[#allocation2 + $0x7e] sm:$0x1]  ;;  %v1566_v35 = vld [vmem:[#allocation2 + $0x7f] sm:$0x1] }
 0x178   :  { %2284 = vst [vmem:[#allocation3 + $0x3c] sm:$0x1] %v2163_v16  ;;  %v1446_v32 = vmul.f32 0.25, %v1326_v58  ;;  %v1686_v27 = vmul.f32 0.5, %v1566_v35  ;;  %v1927_v39 = vld [vmem:[#allocation2 + $0x80] sm:$0x1]  ;;  %v2165_v30 = vadd.f32 %v2045_v18, %v1804_v31  ;;  %v1805_v42 = vadd.f32 %v1685_v34, %v1445_v29 }
 0x179   :  { %v1327_v50 = vld [vmem:[#allocation2 + $0x80] sm:$0x1]  ;;  %v2047_v40 = vmul.f32 0.25, %v1927_v39  ;;  %v1567_v38 = vld [vmem:[#allocation2 + $0x81] sm:$0x1] }
 0x17a   :  { %v1447_v55 = vmul.f32 0.25, %v1327_v50  ;;  %v1928_v9 = vld [vmem:[#allocation2 + $0x82] sm:$0x1]  ;;  %2285 = vst [vmem:[#allocation3 + $0x3d] sm:$0x1] %v2164_v25  ;;  %v1806_v33 = vadd.f32 %v1686_v27, %v1446_v32  ;;  %v1687_v44 = vmul.f32 0.5, %v1567_v38  ;;  %v2166_v51 = vadd.f32 %v2046_v24, %v1805_v42 }
 0x17b   :  { %v2048_v36 = vmul.f32 0.25, %v1928_v9  ;;  %v1328_v37 = vld [vmem:[#allocation2 + $0x82] sm:$0x1]  ;;  %v1568_v47 = vld [vmem:[#allocation2 + $0x83] sm:$0x1] }
 0x17c   :  { %2286 = vst [vmem:[#allocation3 + $0x3e] sm:$0x1] %v2165_v30  ;;  %v1448_v7 = vmul.f32 0.25, %v1328_v37  ;;  %v1688_v41 = vmul.f32 0.5, %v1568_v47  ;;  %v1929_v52 = vld [vmem:[#allocation2 + $0x84] sm:$0x1]  ;;  %v2167_v57 = vadd.f32 %v2047_v40, %v1806_v33  ;;  %v1807_v14 = vadd.f32 %v1687_v44, %v1447_v55 }
 0x17d   :  { %v1329_v43 = vld [vmem:[#allocation2 + $0x84] sm:$0x1]  ;;  %v2049_v54 = vmul.f32 0.25, %v1929_v52  ;;  %v1569_v46 = vld [vmem:[#allocation2 + $0x85] sm:$0x1] }
 0x17e   :  { %v1449_v22 = vmul.f32 0.25, %v1329_v43  ;;  %v1930_v61 = vld [vmem:[#allocation2 + $0x86] sm:$0x1]  ;;  %2287 = vst [vmem:[#allocation3 + $0x3f] sm:$0x1] %v2166_v51  ;;  %v1808_v59 = vadd.f32 %v1688_v41, %v1448_v7  ;;  %v1689_v48 = vmul.f32 0.5, %v1569_v46  ;;  %v2168_v62 = vadd.f32 %v2048_v36, %v1807_v14 }
 0x17f   :  { %v2050_v49 = vmul.f32 0.25, %v1930_v61  ;;  %v1330_v0 = vld [vmem:[#allocation2 + $0x86] sm:$0x1]  ;;  %v1570_v53 = vld [vmem:[#allocation2 + $0x87] sm:$0x1] }
 0x180   :  { %2288 = vst [vmem:[#allocation3 + $0x40] sm:$0x1] %v2167_v57  ;;  %v1450_v2 = vmul.f32 0.25, %v1330_v0  ;;  %v1690_v56 = vmul.f32 0.5, %v1570_v53  ;;  %v1931_v6 = vld [vmem:[#allocation2 + $0x88] sm:$0x1]  ;;  %v2169_v60 = vadd.f32 %v2049_v54, %v1808_v59  ;;  %v1809_v21 = vadd.f32 %v1689_v48, %v1449_v22 }
 0x181   :  { %v1331_v4 = vld [vmem:[#allocation2 + $0x88] sm:$0x1]  ;;  %v2051_v10 = vmul.f32 0.25, %v1931_v6  ;;  %v1571_v1 = vld [vmem:[#allocation2 + $0x89] sm:$0x1] }
 0x182   :  { %v1451_v63 = vmul.f32 0.25, %v1331_v4  ;;  %v1932_v15 = vld [vmem:[#allocation2 + $0x8a] sm:$0x1]  ;;  %2289 = vst [vmem:[#allocation3 + $0x41] sm:$0x1] %v2168_v62  ;;  %v1810_v3 = vadd.f32 %v1690_v56, %v1450_v2  ;;  %v1691_v12 = vmul.f32 0.5, %v1571_v1  ;;  %v2170_v13 = vadd.f32 %v2050_v49, %v1809_v21 }
 0x183   :  { %v2052_v17 = vmul.f32 0.25, %v1932_v15  ;;  %v1332_v5 = vld [vmem:[#allocation2 + $0x8a] sm:$0x1]  ;;  %v1572_v20 = vld [vmem:[#allocation2 + $0x8b] sm:$0x1] }
 0x184   :  { %2290 = vst [vmem:[#allocation3 + $0x42] sm:$0x1] %v2169_v60  ;;  %v1452_v11 = vmul.f32 0.25, %v1332_v5  ;;  %v1692_v45 = vmul.f32 0.5, %v1572_v20  ;;  %v1933_v23 = vld [vmem:[#allocation2 + $0x8c] sm:$0x1]  ;;  %v2171_v16 = vadd.f32 %v2051_v10, %v1810_v3  ;;  %v1811_v26 = vadd.f32 %v1691_v12, %v1451_v63 }
 0x185   :  { %v1333_v8 = vld [vmem:[#allocation2 + $0x8c] sm:$0x1]  ;;  %v2053_v18 = vmul.f32 0.25, %v1933_v23  ;;  %v1573_v28 = vld [vmem:[#allocation2 + $0x8d] sm:$0x1] }
 0x186   :  { %v1453_v29 = vmul.f32 0.25, %v1333_v8  ;;  %v1934_v19 = vld [vmem:[#allocation2 + $0x8e] sm:$0x1]  ;;  %2291 = vst [vmem:[#allocation3 + $0x43] sm:$0x1] %v2170_v13  ;;  %v1812_v31 = vadd.f32 %v1692_v45, %v1452_v11  ;;  %v1693_v34 = vmul.f32 0.5, %v1573_v28  ;;  %v2172_v25 = vadd.f32 %v2052_v17, %v1811_v26 }
 0x187   :  { %v2054_v24 = vmul.f32 0.25, %v1934_v19  ;;  %v1334_v58 = vld [vmem:[#allocation2 + $0x90] sm:$0x1]  ;;  %v1574_v35 = vld [vmem:[#allocation2 + $0x91] sm:$0x1] }
 0x188   :  { %2292 = vst [vmem:[#allocation3 + $0x44] sm:$0x1] %v2171_v16  ;;  %v1454_v32 = vmul.f32 0.25, %v1334_v58  ;;  %v1694_v27 = vmul.f32 0.5, %v1574_v35  ;;  %v1935_v39 = vld [vmem:[#allocation2 + $0x92] sm:$0x1]  ;;  %v2173_v30 = vadd.f32 %v2053_v18, %v1812_v31  ;;  %v1813_v42 = vadd.f32 %v1693_v34, %v1453_v29 }
 0x189   :  { %v1335_v50 = vld [vmem:[#allocation2 + $0x92] sm:$0x1]  ;;  %v2055_v40 = vmul.f32 0.25, %v1935_v39  ;;  %v1575_v38 = vld [vmem:[#allocation2 + $0x93] sm:$0x1] }
 0x18a   :  { %v1455_v55 = vmul.f32 0.25, %v1335_v50  ;;  %v1936_v9 = vld [vmem:[#allocation2 + $0x94] sm:$0x1]  ;;  %2293 = vst [vmem:[#allocation3 + $0x45] sm:$0x1] %v2172_v25  ;;  %v1814_v33 = vadd.f32 %v1694_v27, %v1454_v32  ;;  %v1695_v44 = vmul.f32 0.5, %v1575_v38  ;;  %v2174_v51 = vadd.f32 %v2054_v24, %v1813_v42 }
 0x18b   :  { %v2056_v36 = vmul.f32 0.25, %v1936_v9  ;;  %v1336_v37 = vld [vmem:[#allocation2 + $0x94] sm:$0x1]  ;;  %v1576_v47 = vld [vmem:[#allocation2 + $0x95] sm:$0x1] }
 0x18c   :  { %2294 = vst [vmem:[#allocation3 + $0x46] sm:$0x1] %v2173_v30  ;;  %v1456_v7 = vmul.f32 0.25, %v1336_v37  ;;  %v1696_v41 = vmul.f32 0.5, %v1576_v47  ;;  %v1937_v52 = vld [vmem:[#allocation2 + $0x96] sm:$0x1]  ;;  %v2175_v57 = vadd.f32 %v2055_v40, %v1814_v33  ;;  %v1815_v14 = vadd.f32 %v1695_v44, %v1455_v55 }
 0x18d   :  { %v1337_v43 = vld [vmem:[#allocation2 + $0x96] sm:$0x1]  ;;  %v2057_v54 = vmul.f32 0.25, %v1937_v52  ;;  %v1577_v46 = vld [vmem:[#allocation2 + $0x97] sm:$0x1] }
 0x18e   :  { %v1457_v22 = vmul.f32 0.25, %v1337_v43  ;;  %v1938_v61 = vld [vmem:[#allocation2 + $0x98] sm:$0x1]  ;;  %2295 = vst [vmem:[#allocation3 + $0x47] sm:$0x1] %v2174_v51  ;;  %v1816_v59 = vadd.f32 %v1696_v41, %v1456_v7  ;;  %v1697_v48 = vmul.f32 0.5, %v1577_v46  ;;  %v2176_v62 = vadd.f32 %v2056_v36, %v1815_v14 }
 0x18f   :  { %v2058_v49 = vmul.f32 0.25, %v1938_v61  ;;  %v1338_v0 = vld [vmem:[#allocation2 + $0x98] sm:$0x1]  ;;  %v1578_v53 = vld [vmem:[#allocation2 + $0x99] sm:$0x1] }
 0x190   :  { %2296 = vst [vmem:[#allocation3 + $0x48] sm:$0x1] %v2175_v57  ;;  %v1458_v2 = vmul.f32 0.25, %v1338_v0  ;;  %v1698_v56 = vmul.f32 0.5, %v1578_v53  ;;  %v1939_v6 = vld [vmem:[#allocation2 + $0x9a] sm:$0x1]  ;;  %v2177_v60 = vadd.f32 %v2057_v54, %v1816_v59  ;;  %v1817_v21 = vadd.f32 %v1697_v48, %v1457_v22 }
 0x191   :  { %v1339_v4 = vld [vmem:[#allocation2 + $0x9a] sm:$0x1]  ;;  %v2059_v10 = vmul.f32 0.25, %v1939_v6  ;;  %v1579_v1 = vld [vmem:[#allocation2 + $0x9b] sm:$0x1] }
 0x192   :  { %v1459_v63 = vmul.f32 0.25, %v1339_v4  ;;  %v1940_v15 = vld [vmem:[#allocation2 + $0x9c] sm:$0x1]  ;;  %2297 = vst [vmem:[#allocation3 + $0x49] sm:$0x1] %v2176_v62  ;;  %v1818_v3 = vadd.f32 %v1698_v56, %v1458_v2  ;;  %v1699_v12 = vmul.f32 0.5, %v1579_v1  ;;  %v2178_v13 = vadd.f32 %v2058_v49, %v1817_v21 }
 0x193   :  { %v2060_v17 = vmul.f32 0.25, %v1940_v15  ;;  %v1340_v5 = vld [vmem:[#allocation2 + $0x9c] sm:$0x1]  ;;  %v1580_v20 = vld [vmem:[#allocation2 + $0x9d] sm:$0x1] }
 0x194   :  { %2298 = vst [vmem:[#allocation3 + $0x4a] sm:$0x1] %v2177_v60  ;;  %v1460_v11 = vmul.f32 0.25, %v1340_v5  ;;  %v1700_v45 = vmul.f32 0.5, %v1580_v20  ;;  %v1941_v23 = vld [vmem:[#allocation2 + $0x9e] sm:$0x1]  ;;  %v2179_v16 = vadd.f32 %v2059_v10, %v1818_v3  ;;  %v1819_v26 = vadd.f32 %v1699_v12, %v1459_v63 }
 0x195   :  { %v1341_v8 = vld [vmem:[#allocation2 + $0x9e] sm:$0x1]  ;;  %v2061_v18 = vmul.f32 0.25, %v1941_v23  ;;  %v1581_v28 = vld [vmem:[#allocation2 + $0x9f] sm:$0x1] }
 0x196   :  { %v1461_v29 = vmul.f32 0.25, %v1341_v8  ;;  %v1942_v19 = vld [vmem:[#allocation2 + $0xa0] sm:$0x1]  ;;  %2299 = vst [vmem:[#allocation3 + $0x4b] sm:$0x1] %v2178_v13  ;;  %v1820_v31 = vadd.f32 %v1700_v45, %v1460_v11  ;;  %v1701_v34 = vmul.f32 0.5, %v1581_v28  ;;  %v2180_v25 = vadd.f32 %v2060_v17, %v1819_v26 }
 0x197   :  { %v2062_v24 = vmul.f32 0.25, %v1942_v19  ;;  %v1342_v58 = vld [vmem:[#allocation2 + $0xa2] sm:$0x1]  ;;  %v1582_v35 = vld [vmem:[#allocation2 + $0xa3] sm:$0x1] }
 0x198   :  { %2300 = vst [vmem:[#allocation3 + $0x4c] sm:$0x1] %v2179_v16  ;;  %v1462_v32 = vmul.f32 0.25, %v1342_v58  ;;  %v1702_v27 = vmul.f32 0.5, %v1582_v35  ;;  %v1943_v39 = vld [vmem:[#allocation2 + $0xa4] sm:$0x1]  ;;  %v2181_v30 = vadd.f32 %v2061_v18, %v1820_v31  ;;  %v1821_v42 = vadd.f32 %v1701_v34, %v1461_v29 }
 0x199   :  { %v1343_v50 = vld [vmem:[#allocation2 + $0xa4] sm:$0x1]  ;;  %v2063_v40 = vmul.f32 0.25, %v1943_v39  ;;  %v1583_v38 = vld [vmem:[#allocation2 + $0xa5] sm:$0x1] }
 0x19a   :  { %v1463_v55 = vmul.f32 0.25, %v1343_v50  ;;  %v1944_v9 = vld [vmem:[#allocation2 + $0xa6] sm:$0x1]  ;;  %2301 = vst [vmem:[#allocation3 + $0x4d] sm:$0x1] %v2180_v25  ;;  %v1822_v33 = vadd.f32 %v1702_v27, %v1462_v32  ;;  %v1703_v44 = vmul.f32 0.5, %v1583_v38  ;;  %v2182_v51 = vadd.f32 %v2062_v24, %v1821_v42 }
 0x19b   :  { %v2064_v36 = vmul.f32 0.25, %v1944_v9  ;;  %v1344_v37 = vld [vmem:[#allocation2 + $0xa6] sm:$0x1]  ;;  %v1584_v47 = vld [vmem:[#allocation2 + $0xa7] sm:$0x1] }
 0x19c   :  { %2302 = vst [vmem:[#allocation3 + $0x4e] sm:$0x1] %v2181_v30  ;;  %v1464_v7 = vmul.f32 0.25, %v1344_v37  ;;  %v1704_v41 = vmul.f32 0.5, %v1584_v47  ;;  %v1945_v52 = vld [vmem:[#allocation2 + $0xa8] sm:$0x1]  ;;  %v2183_v57 = vadd.f32 %v2063_v40, %v1822_v33  ;;  %v1823_v14 = vadd.f32 %v1703_v44, %v1463_v55 }
 0x19d   :  { %v1345_v43 = vld [vmem:[#allocation2 + $0xa8] sm:$0x1]  ;;  %v2065_v54 = vmul.f32 0.25, %v1945_v52  ;;  %v1585_v46 = vld [vmem:[#allocation2 + $0xa9] sm:$0x1] }
 0x19e   :  { %v1465_v22 = vmul.f32 0.25, %v1345_v43  ;;  %v1946_v61 = vld [vmem:[#allocation2 + $0xaa] sm:$0x1]  ;;  %2303 = vst [vmem:[#allocation3 + $0x4f] sm:$0x1] %v2182_v51  ;;  %v1824_v59 = vadd.f32 %v1704_v41, %v1464_v7  ;;  %v1705_v48 = vmul.f32 0.5, %v1585_v46  ;;  %v2184_v62 = vadd.f32 %v2064_v36, %v1823_v14 }
 0x19f   :  { %v2066_v49 = vmul.f32 0.25, %v1946_v61  ;;  %v1346_v0 = vld [vmem:[#allocation2 + $0xaa] sm:$0x1]  ;;  %v1586_v53 = vld [vmem:[#allocation2 + $0xab] sm:$0x1] }
 0x1a0   :  { %2304 = vst [vmem:[#allocation3 + $0x50] sm:$0x1] %v2183_v57  ;;  %v1466_v2 = vmul.f32 0.25, %v1346_v0  ;;  %v1706_v56 = vmul.f32 0.5, %v1586_v53  ;;  %v1947_v6 = vld [vmem:[#allocation2 + $0xac] sm:$0x1]  ;;  %v2185_v60 = vadd.f32 %v2065_v54, %v1824_v59  ;;  %v1825_v21 = vadd.f32 %v1705_v48, %v1465_v22 }
 0x1a1   :  { %v1347_v4 = vld [vmem:[#allocation2 + $0xac] sm:$0x1]  ;;  %v2067_v10 = vmul.f32 0.25, %v1947_v6  ;;  %v1587_v1 = vld [vmem:[#allocation2 + $0xad] sm:$0x1] }
 0x1a2   :  { %v1467_v63 = vmul.f32 0.25, %v1347_v4  ;;  %v1948_v15 = vld [vmem:[#allocation2 + $0xae] sm:$0x1]  ;;  %2305 = vst [vmem:[#allocation3 + $0x51] sm:$0x1] %v2184_v62  ;;  %v1826_v3 = vadd.f32 %v1706_v56, %v1466_v2  ;;  %v1707_v12 = vmul.f32 0.5, %v1587_v1  ;;  %v2186_v13 = vadd.f32 %v2066_v49, %v1825_v21 }
 0x1a3   :  { %v2068_v17 = vmul.f32 0.25, %v1948_v15  ;;  %v1348_v5 = vld [vmem:[#allocation2 + $0xae] sm:$0x1]  ;;  %v1588_v20 = vld [vmem:[#allocation2 + $0xaf] sm:$0x1] }
 0x1a4   :  { %2306 = vst [vmem:[#allocation3 + $0x52] sm:$0x1] %v2185_v60  ;;  %v1468_v11 = vmul.f32 0.25, %v1348_v5  ;;  %v1708_v45 = vmul.f32 0.5, %v1588_v20  ;;  %v1949_v23 = vld [vmem:[#allocation2 + $0xb0] sm:$0x1]  ;;  %v2187_v16 = vadd.f32 %v2067_v10, %v1826_v3  ;;  %v1827_v26 = vadd.f32 %v1707_v12, %v1467_v63 }
 0x1a5   :  { %v1349_v8 = vld [vmem:[#allocation2 + $0xb0] sm:$0x1]  ;;  %v2069_v18 = vmul.f32 0.25, %v1949_v23  ;;  %v1589_v28 = vld [vmem:[#allocation2 + $0xb1] sm:$0x1] }
 0x1a6   :  { %v1469_v29 = vmul.f32 0.25, %v1349_v8  ;;  %v1950_v19 = vld [vmem:[#allocation2 + $0xb2] sm:$0x1]  ;;  %2307 = vst [vmem:[#allocation3 + $0x53] sm:$0x1] %v2186_v13  ;;  %v1828_v31 = vadd.f32 %v1708_v45, %v1468_v11  ;;  %v1709_v34 = vmul.f32 0.5, %v1589_v28  ;;  %v2188_v25 = vadd.f32 %v2068_v17, %v1827_v26 }
 0x1a7   :  { %v2070_v24 = vmul.f32 0.25, %v1950_v19  ;;  %v1350_v58 = vld [vmem:[#allocation2 + $0xb4] sm:$0x1]  ;;  %v1590_v35 = vld [vmem:[#allocation2 + $0xb5] sm:$0x1] }
 0x1a8   :  { %2308 = vst [vmem:[#allocation3 + $0x54] sm:$0x1] %v2187_v16  ;;  %v1470_v32 = vmul.f32 0.25, %v1350_v58  ;;  %v1710_v27 = vmul.f32 0.5, %v1590_v35  ;;  %v1951_v39 = vld [vmem:[#allocation2 + $0xb6] sm:$0x1]  ;;  %v2189_v30 = vadd.f32 %v2069_v18, %v1828_v31  ;;  %v1829_v42 = vadd.f32 %v1709_v34, %v1469_v29 }
 0x1a9   :  { %v1351_v50 = vld [vmem:[#allocation2 + $0xb6] sm:$0x1]  ;;  %v2071_v40 = vmul.f32 0.25, %v1951_v39  ;;  %v1591_v38 = vld [vmem:[#allocation2 + $0xb7] sm:$0x1] }
 0x1aa   :  { %v1471_v55 = vmul.f32 0.25, %v1351_v50  ;;  %v1952_v9 = vld [vmem:[#allocation2 + $0xb8] sm:$0x1]  ;;  %2309 = vst [vmem:[#allocation3 + $0x55] sm:$0x1] %v2188_v25  ;;  %v1830_v33 = vadd.f32 %v1710_v27, %v1470_v32  ;;  %v1711_v44 = vmul.f32 0.5, %v1591_v38  ;;  %v2190_v51 = vadd.f32 %v2070_v24, %v1829_v42 }
 0x1ab   :  { %v2072_v36 = vmul.f32 0.25, %v1952_v9  ;;  %v1352_v37 = vld [vmem:[#allocation2 + $0xb8] sm:$0x1]  ;;  %v1592_v47 = vld [vmem:[#allocation2 + $0xb9] sm:$0x1] }
 0x1ac   :  { %2310 = vst [vmem:[#allocation3 + $0x56] sm:$0x1] %v2189_v30  ;;  %v1472_v7 = vmul.f32 0.25, %v1352_v37  ;;  %v1712_v41 = vmul.f32 0.5, %v1592_v47  ;;  %v1953_v52 = vld [vmem:[#allocation2 + $0xba] sm:$0x1]  ;;  %v2191_v57 = vadd.f32 %v2071_v40, %v1830_v33  ;;  %v1831_v14 = vadd.f32 %v1711_v44, %v1471_v55 }
 0x1ad   :  { %v1353_v43 = vld [vmem:[#allocation2 + $0xba] sm:$0x1]  ;;  %v2073_v54 = vmul.f32 0.25, %v1953_v52  ;;  %v1593_v46 = vld [vmem:[#allocation2 + $0xbb] sm:$0x1] }
 0x1ae   :  { %v1473_v22 = vmul.f32 0.25, %v1353_v43  ;;  %v1954_v61 = vld [vmem:[#allocation2 + $0xbc] sm:$0x1]  ;;  %2311 = vst [vmem:[#allocation3 + $0x57] sm:$0x1] %v2190_v51  ;;  %v1832_v59 = vadd.f32 %v1712_v41, %v1472_v7  ;;  %v1713_v48 = vmul.f32 0.5, %v1593_v46  ;;  %v2192_v62 = vadd.f32 %v2072_v36, %v1831_v14 }
 0x1af   :  { %v2074_v49 = vmul.f32 0.25, %v1954_v61  ;;  %v1354_v0 = vld [vmem:[#allocation2 + $0xbc] sm:$0x1]  ;;  %v1594_v53 = vld [vmem:[#allocation2 + $0xbd] sm:$0x1] }
 0x1b0   :  { %2312 = vst [vmem:[#allocation3 + $0x58] sm:$0x1] %v2191_v57  ;;  %v1474_v2 = vmul.f32 0.25, %v1354_v0  ;;  %v1714_v56 = vmul.f32 0.5, %v1594_v53  ;;  %v1955_v6 = vld [vmem:[#allocation2 + $0xbe] sm:$0x1]  ;;  %v2193_v60 = vadd.f32 %v2073_v54, %v1832_v59  ;;  %v1833_v21 = vadd.f32 %v1713_v48, %v1473_v22 }
 0x1b1   :  { %v1355_v4 = vld [vmem:[#allocation2 + $0xbe] sm:$0x1]  ;;  %v2075_v10 = vmul.f32 0.25, %v1955_v6  ;;  %v1595_v1 = vld [vmem:[#allocation2 + $0xbf] sm:$0x1] }
 0x1b2   :  { %v1475_v63 = vmul.f32 0.25, %v1355_v4  ;;  %v1956_v15 = vld [vmem:[#allocation2 + $0xc0] sm:$0x1]  ;;  %2313 = vst [vmem:[#allocation3 + $0x59] sm:$0x1] %v2192_v62  ;;  %v1834_v3 = vadd.f32 %v1714_v56, %v1474_v2  ;;  %v1715_v12 = vmul.f32 0.5, %v1595_v1  ;;  %v2194_v13 = vadd.f32 %v2074_v49, %v1833_v21 }
 0x1b3   :  { %v2076_v17 = vmul.f32 0.25, %v1956_v15  ;;  %v1356_v5 = vld [vmem:[#allocation2 + $0xc0] sm:$0x1]  ;;  %v1596_v20 = vld [vmem:[#allocation2 + $0xc1] sm:$0x1] }
 0x1b4   :  { %2314 = vst [vmem:[#allocation3 + $0x5a] sm:$0x1] %v2193_v60  ;;  %v1476_v11 = vmul.f32 0.25, %v1356_v5  ;;  %v1716_v45 = vmul.f32 0.5, %v1596_v20  ;;  %v1957_v23 = vld [vmem:[#allocation2 + $0xc2] sm:$0x1]  ;;  %v2195_v16 = vadd.f32 %v2075_v10, %v1834_v3  ;;  %v1835_v26 = vadd.f32 %v1715_v12, %v1475_v63 }
 0x1b5   :  { %v1357_v8 = vld [vmem:[#allocation2 + $0xc2] sm:$0x1]  ;;  %v2077_v18 = vmul.f32 0.25, %v1957_v23  ;;  %v1597_v28 = vld [vmem:[#allocation2 + $0xc3] sm:$0x1] }
 0x1b6   :  { %v1477_v29 = vmul.f32 0.25, %v1357_v8  ;;  %v1958_v19 = vld [vmem:[#allocation2 + $0xc4] sm:$0x1]  ;;  %2315 = vst [vmem:[#allocation3 + $0x5b] sm:$0x1] %v2194_v13  ;;  %v1836_v31 = vadd.f32 %v1716_v45, %v1476_v11  ;;  %v1717_v34 = vmul.f32 0.5, %v1597_v28  ;;  %v2196_v25 = vadd.f32 %v2076_v17, %v1835_v26 }
 0x1b7   :  { %v2078_v24 = vmul.f32 0.25, %v1958_v19  ;;  %v1358_v58 = vld [vmem:[#allocation2 + $0xc6] sm:$0x1]  ;;  %v1598_v35 = vld [vmem:[#allocation2 + $0xc7] sm:$0x1] }
 0x1b8   :  { %2316 = vst [vmem:[#allocation3 + $0x5c] sm:$0x1] %v2195_v16  ;;  %v1478_v32 = vmul.f32 0.25, %v1358_v58  ;;  %v1718_v27 = vmul.f32 0.5, %v1598_v35  ;;  %v1959_v39 = vld [vmem:[#allocation2 + $0xc8] sm:$0x1]  ;;  %v2197_v30 = vadd.f32 %v2077_v18, %v1836_v31  ;;  %v1837_v42 = vadd.f32 %v1717_v34, %v1477_v29 }
 0x1b9   :  { %v1359_v50 = vld [vmem:[#allocation2 + $0xc8] sm:$0x1]  ;;  %v2079_v40 = vmul.f32 0.25, %v1959_v39  ;;  %v1599_v38 = vld [vmem:[#allocation2 + $0xc9] sm:$0x1] }
 0x1ba   :  { %v1479_v55 = vmul.f32 0.25, %v1359_v50  ;;  %v1960_v9 = vld [vmem:[#allocation2 + $0xca] sm:$0x1]  ;;  %2317 = vst [vmem:[#allocation3 + $0x5d] sm:$0x1] %v2196_v25  ;;  %v1838_v33 = vadd.f32 %v1718_v27, %v1478_v32  ;;  %v1719_v44 = vmul.f32 0.5, %v1599_v38  ;;  %v2198_v51 = vadd.f32 %v2078_v24, %v1837_v42 }
 0x1bb   :  { %v2080_v36 = vmul.f32 0.25, %v1960_v9  ;;  %v1360_v37 = vld [vmem:[#allocation2 + $0xca] sm:$0x1]  ;;  %v1600_v47 = vld [vmem:[#allocation2 + $0xcb] sm:$0x1] }
 0x1bc   :  { %2318 = vst [vmem:[#allocation3 + $0x5e] sm:$0x1] %v2197_v30  ;;  %v1480_v7 = vmul.f32 0.25, %v1360_v37  ;;  %v1720_v41 = vmul.f32 0.5, %v1600_v47  ;;  %v1961_v52 = vld [vmem:[#allocation2 + $0xcc] sm:$0x1]  ;;  %v2199_v57 = vadd.f32 %v2079_v40, %v1838_v33  ;;  %v1839_v14 = vadd.f32 %v1719_v44, %v1479_v55 }
 0x1bd   :  { %v1361_v43 = vld [vmem:[#allocation2 + $0xcc] sm:$0x1]  ;;  %v2081_v54 = vmul.f32 0.25, %v1961_v52  ;;  %v1601_v46 = vld [vmem:[#allocation2 + $0xcd] sm:$0x1] }
 0x1be   :  { %v1481_v22 = vmul.f32 0.25, %v1361_v43  ;;  %v1962_v61 = vld [vmem:[#allocation2 + $0xce] sm:$0x1]  ;;  %2319 = vst [vmem:[#allocation3 + $0x5f] sm:$0x1] %v2198_v51  ;;  %v1840_v59 = vadd.f32 %v1720_v41, %v1480_v7  ;;  %v1721_v48 = vmul.f32 0.5, %v1601_v46  ;;  %v2200_v62 = vadd.f32 %v2080_v36, %v1839_v14 }
 0x1bf   :  { %v2082_v49 = vmul.f32 0.25, %v1962_v61  ;;  %v1362_v0 = vld [vmem:[#allocation2 + $0xce] sm:$0x1]  ;;  %v1602_v53 = vld [vmem:[#allocation2 + $0xcf] sm:$0x1] }
 0x1c0   :  { %2320 = vst [vmem:[#allocation3 + $0x60] sm:$0x1] %v2199_v57  ;;  %v1482_v2 = vmul.f32 0.25, %v1362_v0  ;;  %v1722_v56 = vmul.f32 0.5, %v1602_v53  ;;  %v1963_v6 = vld [vmem:[#allocation2 + $0xd0] sm:$0x1]  ;;  %v2201_v60 = vadd.f32 %v2081_v54, %v1840_v59  ;;  %v1841_v21 = vadd.f32 %v1721_v48, %v1481_v22 }
 0x1c1   :  { %v1363_v4 = vld [vmem:[#allocation2 + $0xd0] sm:$0x1]  ;;  %v2083_v10 = vmul.f32 0.25, %v1963_v6  ;;  %v1603_v1 = vld [vmem:[#allocation2 + $0xd1] sm:$0x1] }
 0x1c2   :  { %v1483_v63 = vmul.f32 0.25, %v1363_v4  ;;  %v1964_v15 = vld [vmem:[#allocation2 + $0xd2] sm:$0x1]  ;;  %2321 = vst [vmem:[#allocation3 + $0x61] sm:$0x1] %v2200_v62  ;;  %v1842_v3 = vadd.f32 %v1722_v56, %v1482_v2  ;;  %v1723_v12 = vmul.f32 0.5, %v1603_v1  ;;  %v2202_v13 = vadd.f32 %v2082_v49, %v1841_v21 }
 0x1c3   :  { %v2084_v17 = vmul.f32 0.25, %v1964_v15  ;;  %v1364_v5 = vld [vmem:[#allocation2 + $0xd2] sm:$0x1]  ;;  %v1604_v20 = vld [vmem:[#allocation2 + $0xd3] sm:$0x1] }
 0x1c4   :  { %2322 = vst [vmem:[#allocation3 + $0x62] sm:$0x1] %v2201_v60  ;;  %v1484_v11 = vmul.f32 0.25, %v1364_v5  ;;  %v1724_v45 = vmul.f32 0.5, %v1604_v20  ;;  %v1965_v23 = vld [vmem:[#allocation2 + $0xd4] sm:$0x1]  ;;  %v2203_v16 = vadd.f32 %v2083_v10, %v1842_v3  ;;  %v1843_v26 = vadd.f32 %v1723_v12, %v1483_v63 }
 0x1c5   :  { %v1365_v8 = vld [vmem:[#allocation2 + $0xd4] sm:$0x1]  ;;  %v2085_v18 = vmul.f32 0.25, %v1965_v23  ;;  %v1605_v28 = vld [vmem:[#allocation2 + $0xd5] sm:$0x1] }
 0x1c6   :  { %v1485_v29 = vmul.f32 0.25, %v1365_v8  ;;  %v1966_v19 = vld [vmem:[#allocation2 + $0xd6] sm:$0x1]  ;;  %2323 = vst [vmem:[#allocation3 + $0x63] sm:$0x1] %v2202_v13  ;;  %v1844_v31 = vadd.f32 %v1724_v45, %v1484_v11  ;;  %v1725_v34 = vmul.f32 0.5, %v1605_v28  ;;  %v2204_v25 = vadd.f32 %v2084_v17, %v1843_v26 }
 0x1c7   :  { %v2086_v24 = vmul.f32 0.25, %v1966_v19  ;;  %v1366_v58 = vld [vmem:[#allocation2 + $0xd8] sm:$0x1]  ;;  %v1606_v35 = vld [vmem:[#allocation2 + $0xd9] sm:$0x1] }
 0x1c8   :  { %2324 = vst [vmem:[#allocation3 + $0x64] sm:$0x1] %v2203_v16  ;;  %v1486_v32 = vmul.f32 0.25, %v1366_v58  ;;  %v1726_v27 = vmul.f32 0.5, %v1606_v35  ;;  %v1967_v39 = vld [vmem:[#allocation2 + $0xda] sm:$0x1]  ;;  %v2205_v30 = vadd.f32 %v2085_v18, %v1844_v31  ;;  %v1845_v42 = vadd.f32 %v1725_v34, %v1485_v29 }
 0x1c9   :  { %v1367_v50 = vld [vmem:[#allocation2 + $0xda] sm:$0x1]  ;;  %v2087_v40 = vmul.f32 0.25, %v1967_v39  ;;  %v1607_v38 = vld [vmem:[#allocation2 + $0xdb] sm:$0x1] }
 0x1ca   :  { %v1487_v55 = vmul.f32 0.25, %v1367_v50  ;;  %v1968_v9 = vld [vmem:[#allocation2 + $0xdc] sm:$0x1]  ;;  %2325 = vst [vmem:[#allocation3 + $0x65] sm:$0x1] %v2204_v25  ;;  %v1846_v33 = vadd.f32 %v1726_v27, %v1486_v32  ;;  %v1727_v44 = vmul.f32 0.5, %v1607_v38  ;;  %v2206_v51 = vadd.f32 %v2086_v24, %v1845_v42 }
 0x1cb   :  { %v2088_v36 = vmul.f32 0.25, %v1968_v9  ;;  %v1368_v37 = vld [vmem:[#allocation2 + $0xdc] sm:$0x1]  ;;  %v1608_v47 = vld [vmem:[#allocation2 + $0xdd] sm:$0x1] }
 0x1cc   :  { %2326 = vst [vmem:[#allocation3 + $0x66] sm:$0x1] %v2205_v30  ;;  %v1488_v7 = vmul.f32 0.25, %v1368_v37  ;;  %v1728_v41 = vmul.f32 0.5, %v1608_v47  ;;  %v1969_v52 = vld [vmem:[#allocation2 + $0xde] sm:$0x1]  ;;  %v2207_v57 = vadd.f32 %v2087_v40, %v1846_v33  ;;  %v1847_v14 = vadd.f32 %v1727_v44, %v1487_v55 }
 0x1cd   :  { %v1369_v43 = vld [vmem:[#allocation2 + $0xde] sm:$0x1]  ;;  %v2089_v54 = vmul.f32 0.25, %v1969_v52  ;;  %v1609_v46 = vld [vmem:[#allocation2 + $0xdf] sm:$0x1] }
 0x1ce   :  { %v1489_v22 = vmul.f32 0.25, %v1369_v43  ;;  %v1970_v61 = vld [vmem:[#allocation2 + $0xe0] sm:$0x1]  ;;  %2327 = vst [vmem:[#allocation3 + $0x67] sm:$0x1] %v2206_v51  ;;  %v1848_v59 = vadd.f32 %v1728_v41, %v1488_v7  ;;  %v1729_v48 = vmul.f32 0.5, %v1609_v46  ;;  %v2208_v62 = vadd.f32 %v2088_v36, %v1847_v14 }
 0x1cf   :  { %v2090_v49 = vmul.f32 0.25, %v1970_v61  ;;  %v1370_v0 = vld [vmem:[#allocation2 + $0xe0] sm:$0x1]  ;;  %v1610_v53 = vld [vmem:[#allocation2 + $0xe1] sm:$0x1] }
 0x1d0   :  { %2328 = vst [vmem:[#allocation3 + $0x68] sm:$0x1] %v2207_v57  ;;  %v1490_v2 = vmul.f32 0.25, %v1370_v0  ;;  %v1730_v56 = vmul.f32 0.5, %v1610_v53  ;;  %v1971_v6 = vld [vmem:[#allocation2 + $0xe2] sm:$0x1]  ;;  %v2209_v60 = vadd.f32 %v2089_v54, %v1848_v59  ;;  %v1849_v21 = vadd.f32 %v1729_v48, %v1489_v22 }
 0x1d1   :  { %v1371_v4 = vld [vmem:[#allocation2 + $0xe2] sm:$0x1]  ;;  %v2091_v10 = vmul.f32 0.25, %v1971_v6  ;;  %v1611_v1 = vld [vmem:[#allocation2 + $0xe3] sm:$0x1] }
 0x1d2   :  { %v1491_v63 = vmul.f32 0.25, %v1371_v4  ;;  %v1972_v15 = vld [vmem:[#allocation2 + $0xe4] sm:$0x1]  ;;  %2329 = vst [vmem:[#allocation3 + $0x69] sm:$0x1] %v2208_v62  ;;  %v1850_v3 = vadd.f32 %v1730_v56, %v1490_v2  ;;  %v1731_v12 = vmul.f32 0.5, %v1611_v1  ;;  %v2210_v13 = vadd.f32 %v2090_v49, %v1849_v21 }
 0x1d3   :  { %v2092_v17 = vmul.f32 0.25, %v1972_v15  ;;  %v1372_v5 = vld [vmem:[#allocation2 + $0xe4] sm:$0x1]  ;;  %v1612_v20 = vld [vmem:[#allocation2 + $0xe5] sm:$0x1] }
 0x1d4   :  { %2330 = vst [vmem:[#allocation3 + $0x6a] sm:$0x1] %v2209_v60  ;;  %v1492_v11 = vmul.f32 0.25, %v1372_v5  ;;  %v1732_v45 = vmul.f32 0.5, %v1612_v20  ;;  %v1973_v23 = vld [vmem:[#allocation2 + $0xe6] sm:$0x1]  ;;  %v2211_v16 = vadd.f32 %v2091_v10, %v1850_v3  ;;  %v1851_v26 = vadd.f32 %v1731_v12, %v1491_v63 }
 0x1d5   :  { %v1373_v8 = vld [vmem:[#allocation2 + $0xe6] sm:$0x1]  ;;  %v2093_v18 = vmul.f32 0.25, %v1973_v23  ;;  %v1613_v28 = vld [vmem:[#allocation2 + $0xe7] sm:$0x1] }
 0x1d6   :  { %v1493_v29 = vmul.f32 0.25, %v1373_v8  ;;  %v1974_v19 = vld [vmem:[#allocation2 + $0xe8] sm:$0x1]  ;;  %2331 = vst [vmem:[#allocation3 + $0x6b] sm:$0x1] %v2210_v13  ;;  %v1852_v31 = vadd.f32 %v1732_v45, %v1492_v11  ;;  %v1733_v34 = vmul.f32 0.5, %v1613_v28  ;;  %v2212_v25 = vadd.f32 %v2092_v17, %v1851_v26 }
 0x1d7   :  { %v2094_v24 = vmul.f32 0.25, %v1974_v19  ;;  %v1374_v58 = vld [vmem:[#allocation2 + $0xea] sm:$0x1]  ;;  %v1614_v35 = vld [vmem:[#allocation2 + $0xeb] sm:$0x1] }
 0x1d8   :  { %2332 = vst [vmem:[#allocation3 + $0x6c] sm:$0x1] %v2211_v16  ;;  %v1494_v32 = vmul.f32 0.25, %v1374_v58  ;;  %v1734_v27 = vmul.f32 0.5, %v1614_v35  ;;  %v1975_v39 = vld [vmem:[#allocation2 + $0xec] sm:$0x1]  ;;  %v2213_v30 = vadd.f32 %v2093_v18, %v1852_v31  ;;  %v1853_v42 = vadd.f32 %v1733_v34, %v1493_v29 }
 0x1d9   :  { %v1375_v50 = vld [vmem:[#allocation2 + $0xec] sm:$0x1]  ;;  %v2095_v40 = vmul.f32 0.25, %v1975_v39  ;;  %v1615_v38 = vld [vmem:[#allocation2 + $0xed] sm:$0x1] }
 0x1da   :  { %v1495_v55 = vmul.f32 0.25, %v1375_v50  ;;  %v1976_v9 = vld [vmem:[#allocation2 + $0xee] sm:$0x1]  ;;  %2333 = vst [vmem:[#allocation3 + $0x6d] sm:$0x1] %v2212_v25  ;;  %v1854_v33 = vadd.f32 %v1734_v27, %v1494_v32  ;;  %v1735_v44 = vmul.f32 0.5, %v1615_v38  ;;  %v2214_v51 = vadd.f32 %v2094_v24, %v1853_v42 }
 0x1db   :  { %v2096_v36 = vmul.f32 0.25, %v1976_v9  ;;  %v1376_v37 = vld [vmem:[#allocation2 + $0xee] sm:$0x1]  ;;  %v1616_v47 = vld [vmem:[#allocation2 + $0xef] sm:$0x1] }
 0x1dc   :  { %2334 = vst [vmem:[#allocation3 + $0x6e] sm:$0x1] %v2213_v30  ;;  %v1496_v7 = vmul.f32 0.25, %v1376_v37  ;;  %v1736_v41 = vmul.f32 0.5, %v1616_v47  ;;  %v1977_v52 = vld [vmem:[#allocation2 + $0xf0] sm:$0x1]  ;;  %v2215_v57 = vadd.f32 %v2095_v40, %v1854_v33  ;;  %v1855_v14 = vadd.f32 %v1735_v44, %v1495_v55 }
 0x1dd   :  { %v1377_v43 = vld [vmem:[#allocation2 + $0xf0] sm:$0x1]  ;;  %v2097_v54 = vmul.f32 0.25, %v1977_v52  ;;  %v1617_v46 = vld [vmem:[#allocation2 + $0xf1] sm:$0x1] }
 0x1de   :  { %v1497_v22 = vmul.f32 0.25, %v1377_v43  ;;  %v1978_v61 = vld [vmem:[#allocation2 + $0xf2] sm:$0x1]  ;;  %2335 = vst [vmem:[#allocation3 + $0x6f] sm:$0x1] %v2214_v51  ;;  %v1856_v59 = vadd.f32 %v1736_v41, %v1496_v7  ;;  %v1737_v48 = vmul.f32 0.5, %v1617_v46  ;;  %v2216_v62 = vadd.f32 %v2096_v36, %v1855_v14 }
 0x1df   :  { %v2098_v49 = vmul.f32 0.25, %v1978_v61  ;;  %v1378_v0 = vld [vmem:[#allocation2 + $0xf2] sm:$0x1]  ;;  %v1618_v53 = vld [vmem:[#allocation2 + $0xf3] sm:$0x1] }
 0x1e0   :  { %2336 = vst [vmem:[#allocation3 + $0x70] sm:$0x1] %v2215_v57  ;;  %v1498_v2 = vmul.f32 0.25, %v1378_v0  ;;  %v1738_v56 = vmul.f32 0.5, %v1618_v53  ;;  %v1979_v6 = vld [vmem:[#allocation2 + $0xf4] sm:$0x1]  ;;  %v2217_v60 = vadd.f32 %v2097_v54, %v1856_v59  ;;  %v1857_v21 = vadd.f32 %v1737_v48, %v1497_v22 }
 0x1e1   :  { %v1379_v4 = vld [vmem:[#allocation2 + $0xf4] sm:$0x1]  ;;  %v2099_v10 = vmul.f32 0.25, %v1979_v6  ;;  %v1619_v1 = vld [vmem:[#allocation2 + $0xf5] sm:$0x1] }
 0x1e2   :  { %v1499_v63 = vmul.f32 0.25, %v1379_v4  ;;  %v1980_v15 = vld [vmem:[#allocation2 + $0xf6] sm:$0x1]  ;;  %2337 = vst [vmem:[#allocation3 + $0x71] sm:$0x1] %v2216_v62  ;;  %v1858_v3 = vadd.f32 %v1738_v56, %v1498_v2  ;;  %v1739_v12 = vmul.f32 0.5, %v1619_v1  ;;  %v2218_v13 = vadd.f32 %v2098_v49, %v1857_v21 }
 0x1e3   :  { %v2100_v17 = vmul.f32 0.25, %v1980_v15  ;;  %v1380_v5 = vld [vmem:[#allocation2 + $0xf6] sm:$0x1]  ;;  %v1620_v20 = vld [vmem:[#allocation2 + $0xf7] sm:$0x1] }
 0x1e4   :  { %2338 = vst [vmem:[#allocation3 + $0x72] sm:$0x1] %v2217_v60  ;;  %v1500_v11 = vmul.f32 0.25, %v1380_v5  ;;  %v1740_v45 = vmul.f32 0.5, %v1620_v20  ;;  %v1981_v23 = vld [vmem:[#allocation2 + $0xf8] sm:$0x1]  ;;  %v2219_v16 = vadd.f32 %v2099_v10, %v1858_v3  ;;  %v1859_v26 = vadd.f32 %v1739_v12, %v1499_v63 }
 0x1e5   :  { %v1381_v8 = vld [vmem:[#allocation2 + $0xf8] sm:$0x1]  ;;  %v2101_v18 = vmul.f32 0.25, %v1981_v23  ;;  %v1621_v28 = vld [vmem:[#allocation2 + $0xf9] sm:$0x1] }
 0x1e6   :  { %v1501_v29 = vmul.f32 0.25, %v1381_v8  ;;  %v1982_v19 = vld [vmem:[#allocation2 + $0xfa] sm:$0x1]  ;;  %2339 = vst [vmem:[#allocation3 + $0x73] sm:$0x1] %v2218_v13  ;;  %v1860_v31 = vadd.f32 %v1740_v45, %v1500_v11  ;;  %v1741_v34 = vmul.f32 0.5, %v1621_v28  ;;  %v2220_v25 = vadd.f32 %v2100_v17, %v1859_v26 }
 0x1e7   :  { %v2102_v24 = vmul.f32 0.25, %v1982_v19  ;;  %v1382_v58 = vld [vmem:[#allocation2 + $0xfc] sm:$0x1]  ;;  %v1622_v35 = vld [vmem:[#allocation2 + $0xfd] sm:$0x1] }
 0x1e8   :  { %2340 = vst [vmem:[#allocation3 + $0x74] sm:$0x1] %v2219_v16  ;;  %v1502_v32 = vmul.f32 0.25, %v1382_v58  ;;  %v1742_v27 = vmul.f32 0.5, %v1622_v35  ;;  %v1983_v39 = vld [vmem:[#allocation2 + $0xfe] sm:$0x1]  ;;  %v2221_v30 = vadd.f32 %v2101_v18, %v1860_v31  ;;  %v1861_v42 = vadd.f32 %v1741_v34, %v1501_v29 }
 0x1e9   :  { %v1383_v50 = vld [vmem:[#allocation2 + $0xfe] sm:$0x1]  ;;  %v2103_v40 = vmul.f32 0.25, %v1983_v39  ;;  %v1623_v38 = vld [vmem:[#allocation2 + $0xff] sm:$0x1] }
 0x1ea   :  { %v1503_v55 = vmul.f32 0.25, %v1383_v50  ;;  %v1984_v9 = vld [vmem:[#allocation2 + $0x100] sm:$0x1]  ;;  %2341 = vst [vmem:[#allocation3 + $0x75] sm:$0x1] %v2220_v25  ;;  %v1862_v33 = vadd.f32 %v1742_v27, %v1502_v32  ;;  %v1743_v44 = vmul.f32 0.5, %v1623_v38  ;;  %v2222_v51 = vadd.f32 %v2102_v24, %v1861_v42 }
 0x1eb   :  { %v2104_v36 = vmul.f32 0.25, %v1984_v9  ;;  %v1384_v37 = vld [vmem:[#allocation2 + $0x100] sm:$0x1]  ;;  %v1624_v47 = vld [vmem:[#allocation2 + $0x101] sm:$0x1] }
 0x1ec   :  { %2342 = vst [vmem:[#allocation3 + $0x76] sm:$0x1] %v2221_v30  ;;  %v1504_v7 = vmul.f32 0.25, %v1384_v37  ;;  %v1744_v41 = vmul.f32 0.5, %v1624_v47  ;;  %v1985_v52 = vld [vmem:[#allocation2 + $0x102] sm:$0x1]  ;;  %v2223_v57 = vadd.f32 %v2103_v40, %v1862_v33  ;;  %v1863_v14 = vadd.f32 %v1743_v44, %v1503_v55 }
 0x1ed   :  { %v1385_v43 = vld [vmem:[#allocation2 + $0x102] sm:$0x1]  ;;  %v2105_v54 = vmul.f32 0.25, %v1985_v52  ;;  %v1625_v46 = vld [vmem:[#allocation2 + $0x103] sm:$0x1] }
 0x1ee   :  { %v1505_v22 = vmul.f32 0.25, %v1385_v43  ;;  %v1986_v61 = vld [vmem:[#allocation2 + $0x104] sm:$0x1]  ;;  %2343 = vst [vmem:[#allocation3 + $0x77] sm:$0x1] %v2222_v51  ;;  %v1864_v59 = vadd.f32 %v1744_v41, %v1504_v7  ;;  %v1745_v48 = vmul.f32 0.5, %v1625_v46  ;;  %v2224_v62 = vadd.f32 %v2104_v36, %v1863_v14 }
 0x1ef   :  { %v2106_v49 = vmul.f32 0.25, %v1986_v61  ;;  %v1386_v0 = vld [vmem:[#allocation2 + $0x104] sm:$0x1]  ;;  %v1626_v53 = vld [vmem:[#allocation2 + $0x105] sm:$0x1] }
 0x1f0   :  { %2344 = vst [vmem:[#allocation3 + $0x78] sm:$0x1] %v2223_v57  ;;  %v1506_v2 = vmul.f32 0.25, %v1386_v0  ;;  %v1746_v56 = vmul.f32 0.5, %v1626_v53  ;;  %v1987_v6 = vld [vmem:[#allocation2 + $0x106] sm:$0x1]  ;;  %v2225_v60 = vadd.f32 %v2105_v54, %v1864_v59  ;;  %v1865_v21 = vadd.f32 %v1745_v48, %v1505_v22 }
 0x1f1   :  { %v1387_v4 = vld [vmem:[#allocation2 + $0x106] sm:$0x1]  ;;  %v2107_v10 = vmul.f32 0.25, %v1987_v6  ;;  %v1627_v1 = vld [vmem:[#allocation2 + $0x107] sm:$0x1] }
 0x1f2   :  { %v1507_v63 = vmul.f32 0.25, %v1387_v4  ;;  %v1988_v15 = vld [vmem:[#allocation2 + $0x108] sm:$0x1]  ;;  %2345 = vst [vmem:[#allocation3 + $0x79] sm:$0x1] %v2224_v62  ;;  %v1866_v3 = vadd.f32 %v1746_v56, %v1506_v2  ;;  %v1747_v12 = vmul.f32 0.5, %v1627_v1  ;;  %v2226_v13 = vadd.f32 %v2106_v49, %v1865_v21 }
 0x1f3   :  { %v2108_v17 = vmul.f32 0.25, %v1988_v15  ;;  %v1388_v5 = vld [vmem:[#allocation2 + $0x108] sm:$0x1]  ;;  %v1628_v20 = vld [vmem:[#allocation2 + $0x109] sm:$0x1] }
 0x1f4   :  { %2346 = vst [vmem:[#allocation3 + $0x7a] sm:$0x1] %v2225_v60  ;;  %v1508_v11 = vmul.f32 0.25, %v1388_v5  ;;  %v1748_v45 = vmul.f32 0.5, %v1628_v20  ;;  %v1989_v23 = vld [vmem:[#allocation2 + $0x10a] sm:$0x1]  ;;  %v2227_v16 = vadd.f32 %v2107_v10, %v1866_v3  ;;  %v1867_v26 = vadd.f32 %v1747_v12, %v1507_v63 }
 0x1f5   :  { %v1389_v8 = vld [vmem:[#allocation2 + $0x10a] sm:$0x1]  ;;  %v2109_v18 = vmul.f32 0.25, %v1989_v23  ;;  %v1629_v28 = vld [vmem:[#allocation2 + $0x10b] sm:$0x1] }
 0x1f6   :  { %v1509_v29 = vmul.f32 0.25, %v1389_v8  ;;  %v1990_v19 = vld [vmem:[#allocation2 + $0x10c] sm:$0x1]  ;;  %2347 = vst [vmem:[#allocation3 + $0x7b] sm:$0x1] %v2226_v13  ;;  %v1868_v31 = vadd.f32 %v1748_v45, %v1508_v11  ;;  %v1749_v34 = vmul.f32 0.5, %v1629_v28  ;;  %v2228_v25 = vadd.f32 %v2108_v17, %v1867_v26 }
 0x1f7   :  { %v2110_v24 = vmul.f32 0.25, %v1990_v19  ;;  %v2352_v58 = vld [vmem:[#allocation3] sm:$0x1]  ;;  %v2480_v35 = vld [vmem:[#allocation3 + $0x8] sm:$0x1] }
 0x1f8   :  { %2348 = vst [vmem:[#allocation3 + $0x7c] sm:$0x1] %v2227_v16  ;;  %v2416_v32 = vmul.f32 0.25, %v2352_v58  ;;  %v2544_v27 = vmul.f32 0.5, %v2480_v35  ;;  %v2673_v39 = vld [vmem:[#allocation3 + $0x10] sm:$0x1]  ;;  %v2229_v30 = vadd.f32 %v2109_v18, %v1868_v31  ;;  %v1869_v42 = vadd.f32 %v1749_v34, %v1509_v29 }
 0x1f9   :  { %v2353_v50 = vld [vmem:[#allocation3 + $0x1] sm:$0x1]  ;;  %v2737_v40 = vmul.f32 0.25, %v2673_v39  ;;  %v2481_v38 = vld [vmem:[#allocation3 + $0x9] sm:$0x1] }
 0x1fa   :  { %v2417_v55 = vmul.f32 0.25, %v2353_v50  ;;  %v2674_v9 = vld [vmem:[#allocation3 + $0x11] sm:$0x1]  ;;  %2349 = vst [vmem:[#allocation3 + $0x7d] sm:$0x1] %v2228_v25  ;;  %v2608_v33 = vadd.f32 %v2544_v27, %v2416_v32  ;;  %v2545_v44 = vmul.f32 0.5, %v2481_v38  ;;  %v2230_v51 = vadd.f32 %v2110_v24, %v1869_v42 }
 0x1fb   :  { %v2738_v36 = vmul.f32 0.25, %v2674_v9  ;;  %v2354_v37 = vld [vmem:[#allocation3 + $0x2] sm:$0x1]  ;;  %v2482_v47 = vld [vmem:[#allocation3 + $0xa] sm:$0x1] }
 0x1fc   :  { %2350 = vst [vmem:[#allocation3 + $0x7e] sm:$0x1] %v2229_v30  ;;  %v2418_v7 = vmul.f32 0.25, %v2354_v37  ;;  %v2546_v41 = vmul.f32 0.5, %v2482_v47  ;;  %v2675_v52 = vld [vmem:[#allocation3 + $0x12] sm:$0x1]  ;;  %v2801_v57 = vadd.f32 %v2737_v40, %v2608_v33  ;;  %v2609_v14 = vadd.f32 %v2545_v44, %v2417_v55 }
 0x1fd   :  { %v2355_v43 = vld [vmem:[#allocation3 + $0x3] sm:$0x1]  ;;  %v2739_v54 = vmul.f32 0.25, %v2675_v52  ;;  %v2483_v46 = vld [vmem:[#allocation3 + $0xb] sm:$0x1] }
 0x1fe   :  { %v2419_v22 = vmul.f32 0.25, %v2355_v43  ;;  %v2676_v61 = vld [vmem:[#allocation3 + $0x13] sm:$0x1]  ;;  %2351 = vst [vmem:[#allocation3 + $0x7f] sm:$0x1] %v2230_v51  ;;  %v2610_v59 = vadd.f32 %v2546_v41, %v2418_v7  ;;  %v2547_v48 = vmul.f32 0.5, %v2483_v46  ;;  %v2802_v62 = vadd.f32 %v2738_v36, %v2609_v14 }
 0x1ff   :  { %v2740_v49 = vmul.f32 0.25, %v2676_v61  ;;  %v2356_v0 = vld [vmem:[#allocation3 + $0x4] sm:$0x1]  ;;  %v2484_v53 = vld [vmem:[#allocation3 + $0xc] sm:$0x1] }
 0x200   :  { %2865 = vst [vmem:[#allocation7] sm:$0x1] %v2801_v57  ;;  %v2420_v2 = vmul.f32 0.25, %v2356_v0  ;;  %v2548_v56 = vmul.f32 0.5, %v2484_v53  ;;  %v2677_v6 = vld [vmem:[#allocation3 + $0x14] sm:$0x1]  ;;  %v2803_v60 = vadd.f32 %v2739_v54, %v2610_v59  ;;  %v2611_v21 = vadd.f32 %v2547_v48, %v2419_v22 }
 0x201   :  { %v2357_v4 = vld [vmem:[#allocation3 + $0x5] sm:$0x1]  ;;  %v2741_v10 = vmul.f32 0.25, %v2677_v6  ;;  %v2485_v1 = vld [vmem:[#allocation3 + $0xd] sm:$0x1] }
 0x202   :  { %v2421_v63 = vmul.f32 0.25, %v2357_v4  ;;  %v2678_v15 = vld [vmem:[#allocation3 + $0x15] sm:$0x1]  ;;  %2866 = vst [vmem:[#allocation7 + $0x1] sm:$0x1] %v2802_v62  ;;  %v2612_v3 = vadd.f32 %v2548_v56, %v2420_v2  ;;  %v2549_v12 = vmul.f32 0.5, %v2485_v1  ;;  %v2804_v13 = vadd.f32 %v2740_v49, %v2611_v21 }
 0x203   :  { %v2742_v17 = vmul.f32 0.25, %v2678_v15  ;;  %v2358_v5 = vld [vmem:[#allocation3 + $0x6] sm:$0x1]  ;;  %v2486_v20 = vld [vmem:[#allocation3 + $0xe] sm:$0x1] }
 0x204   :  { %2867 = vst [vmem:[#allocation7 + $0x2] sm:$0x1] %v2803_v60  ;;  %v2422_v11 = vmul.f32 0.25, %v2358_v5  ;;  %v2550_v45 = vmul.f32 0.5, %v2486_v20  ;;  %v2679_v23 = vld [vmem:[#allocation3 + $0x16] sm:$0x1]  ;;  %v2805_v16 = vadd.f32 %v2741_v10, %v2612_v3  ;;  %v2613_v26 = vadd.f32 %v2549_v12, %v2421_v63 }
 0x205   :  { %v2359_v8 = vld [vmem:[#allocation3 + $0x7] sm:$0x1]  ;;  %v2743_v18 = vmul.f32 0.25, %v2679_v23  ;;  %v2487_v28 = vld [vmem:[#allocation3 + $0xf] sm:$0x1] }
 0x206   :  { %v2423_v29 = vmul.f32 0.25, %v2359_v8  ;;  %v2680_v19 = vld [vmem:[#allocation3 + $0x17] sm:$0x1]  ;;  %2868 = vst [vmem:[#allocation7 + $0x3] sm:$0x1] %v2804_v13  ;;  %v2614_v31 = vadd.f32 %v2550_v45, %v2422_v11  ;;  %v2551_v34 = vmul.f32 0.5, %v2487_v28  ;;  %v2806_v25 = vadd.f32 %v2742_v17, %v2613_v26 }
 0x207   :  { %v2744_v24 = vmul.f32 0.25, %v2680_v19  ;;  %v2360_v58 = vld [vmem:[#allocation3 + $0x10] sm:$0x1]  ;;  %v2488_v35 = vld [vmem:[#allocation3 + $0x18] sm:$0x1] }
 0x208   :  { %2869 = vst [vmem:[#allocation7 + $0x4] sm:$0x1] %v2805_v16  ;;  %v2424_v32 = vmul.f32 0.25, %v2360_v58  ;;  %v2552_v27 = vmul.f32 0.5, %v2488_v35  ;;  %v2681_v39 = vld [vmem:[#allocation3 + $0x20] sm:$0x1]  ;;  %v2807_v30 = vadd.f32 %v2743_v18, %v2614_v31  ;;  %v2615_v42 = vadd.f32 %v2551_v34, %v2423_v29 }
 0x209   :  { %v2361_v50 = vld [vmem:[#allocation3 + $0x11] sm:$0x1]  ;;  %v2745_v40 = vmul.f32 0.25, %v2681_v39  ;;  %v2489_v38 = vld [vmem:[#allocation3 + $0x19] sm:$0x1] }
 0x20a   :  { %v2425_v55 = vmul.f32 0.25, %v2361_v50  ;;  %v2682_v9 = vld [vmem:[#allocation3 + $0x21] sm:$0x1]  ;;  %2870 = vst [vmem:[#allocation7 + $0x5] sm:$0x1] %v2806_v25  ;;  %v2616_v33 = vadd.f32 %v2552_v27, %v2424_v32  ;;  %v2553_v44 = vmul.f32 0.5, %v2489_v38  ;;  %v2808_v51 = vadd.f32 %v2744_v24, %v2615_v42 }
 0x20b   :  { %v2746_v36 = vmul.f32 0.25, %v2682_v9  ;;  %v2362_v37 = vld [vmem:[#allocation3 + $0x12] sm:$0x1]  ;;  %v2490_v47 = vld [vmem:[#allocation3 + $0x1a] sm:$0x1] }
 0x20c   :  { %2871 = vst [vmem:[#allocation7 + $0x6] sm:$0x1] %v2807_v30  ;;  %v2426_v7 = vmul.f32 0.25, %v2362_v37  ;;  %v2554_v41 = vmul.f32 0.5, %v2490_v47  ;;  %v2683_v52 = vld [vmem:[#allocation3 + $0x22] sm:$0x1]  ;;  %v2809_v57 = vadd.f32 %v2745_v40, %v2616_v33  ;;  %v2617_v14 = vadd.f32 %v2553_v44, %v2425_v55 }
 0x20d   :  { %v2363_v43 = vld [vmem:[#allocation3 + $0x13] sm:$0x1]  ;;  %v2747_v54 = vmul.f32 0.25, %v2683_v52  ;;  %v2491_v46 = vld [vmem:[#allocation3 + $0x1b] sm:$0x1] }
 0x20e   :  { %v2427_v22 = vmul.f32 0.25, %v2363_v43  ;;  %v2684_v61 = vld [vmem:[#allocation3 + $0x23] sm:$0x1]  ;;  %2872 = vst [vmem:[#allocation7 + $0x7] sm:$0x1] %v2808_v51  ;;  %v2618_v59 = vadd.f32 %v2554_v41, %v2426_v7  ;;  %v2555_v48 = vmul.f32 0.5, %v2491_v46  ;;  %v2810_v62 = vadd.f32 %v2746_v36, %v2617_v14 }
 0x20f   :  { %v2748_v49 = vmul.f32 0.25, %v2684_v61  ;;  %v2364_v0 = vld [vmem:[#allocation3 + $0x14] sm:$0x1]  ;;  %v2492_v53 = vld [vmem:[#allocation3 + $0x1c] sm:$0x1] }
 0x210   :  { %2873 = vst [vmem:[#allocation7 + $0x8] sm:$0x1] %v2809_v57  ;;  %v2428_v2 = vmul.f32 0.25, %v2364_v0  ;;  %v2556_v56 = vmul.f32 0.5, %v2492_v53  ;;  %v2685_v6 = vld [vmem:[#allocation3 + $0x24] sm:$0x1]  ;;  %v2811_v60 = vadd.f32 %v2747_v54, %v2618_v59  ;;  %v2619_v21 = vadd.f32 %v2555_v48, %v2427_v22 }
 0x211   :  { %v2365_v4 = vld [vmem:[#allocation3 + $0x15] sm:$0x1]  ;;  %v2749_v10 = vmul.f32 0.25, %v2685_v6  ;;  %v2493_v1 = vld [vmem:[#allocation3 + $0x1d] sm:$0x1] }
 0x212   :  { %v2429_v63 = vmul.f32 0.25, %v2365_v4  ;;  %v2686_v15 = vld [vmem:[#allocation3 + $0x25] sm:$0x1]  ;;  %2874 = vst [vmem:[#allocation7 + $0x9] sm:$0x1] %v2810_v62  ;;  %v2620_v3 = vadd.f32 %v2556_v56, %v2428_v2  ;;  %v2557_v12 = vmul.f32 0.5, %v2493_v1  ;;  %v2812_v13 = vadd.f32 %v2748_v49, %v2619_v21 }
 0x213   :  { %v2750_v17 = vmul.f32 0.25, %v2686_v15  ;;  %v2366_v5 = vld [vmem:[#allocation3 + $0x16] sm:$0x1]  ;;  %v2494_v20 = vld [vmem:[#allocation3 + $0x1e] sm:$0x1] }
 0x214   :  { %2875 = vst [vmem:[#allocation7 + $0xa] sm:$0x1] %v2811_v60  ;;  %v2430_v11 = vmul.f32 0.25, %v2366_v5  ;;  %v2558_v45 = vmul.f32 0.5, %v2494_v20  ;;  %v2687_v23 = vld [vmem:[#allocation3 + $0x26] sm:$0x1]  ;;  %v2813_v16 = vadd.f32 %v2749_v10, %v2620_v3  ;;  %v2621_v26 = vadd.f32 %v2557_v12, %v2429_v63 }
 0x215   :  { %v2367_v8 = vld [vmem:[#allocation3 + $0x17] sm:$0x1]  ;;  %v2751_v18 = vmul.f32 0.25, %v2687_v23  ;;  %v2495_v28 = vld [vmem:[#allocation3 + $0x1f] sm:$0x1] }
 0x216   :  { %v2431_v29 = vmul.f32 0.25, %v2367_v8  ;;  %v2688_v19 = vld [vmem:[#allocation3 + $0x27] sm:$0x1]  ;;  %2876 = vst [vmem:[#allocation7 + $0xb] sm:$0x1] %v2812_v13  ;;  %v2622_v31 = vadd.f32 %v2558_v45, %v2430_v11  ;;  %v2559_v34 = vmul.f32 0.5, %v2495_v28  ;;  %v2814_v25 = vadd.f32 %v2750_v17, %v2621_v26 }
 0x217   :  { %v2752_v24 = vmul.f32 0.25, %v2688_v19  ;;  %v2368_v58 = vld [vmem:[#allocation3 + $0x20] sm:$0x1]  ;;  %v2496_v35 = vld [vmem:[#allocation3 + $0x28] sm:$0x1] }
 0x218   :  { %2877 = vst [vmem:[#allocation7 + $0xc] sm:$0x1] %v2813_v16  ;;  %v2432_v32 = vmul.f32 0.25, %v2368_v58  ;;  %v2560_v27 = vmul.f32 0.5, %v2496_v35  ;;  %v2689_v39 = vld [vmem:[#allocation3 + $0x30] sm:$0x1]  ;;  %v2815_v30 = vadd.f32 %v2751_v18, %v2622_v31  ;;  %v2623_v42 = vadd.f32 %v2559_v34, %v2431_v29 }
 0x219   :  { %v2369_v50 = vld [vmem:[#allocation3 + $0x21] sm:$0x1]  ;;  %v2753_v40 = vmul.f32 0.25, %v2689_v39  ;;  %v2497_v38 = vld [vmem:[#allocation3 + $0x29] sm:$0x1] }
 0x21a   :  { %v2433_v55 = vmul.f32 0.25, %v2369_v50  ;;  %v2690_v9 = vld [vmem:[#allocation3 + $0x31] sm:$0x1]  ;;  %2878 = vst [vmem:[#allocation7 + $0xd] sm:$0x1] %v2814_v25  ;;  %v2624_v33 = vadd.f32 %v2560_v27, %v2432_v32  ;;  %v2561_v44 = vmul.f32 0.5, %v2497_v38  ;;  %v2816_v51 = vadd.f32 %v2752_v24, %v2623_v42 }
 0x21b   :  { %v2754_v36 = vmul.f32 0.25, %v2690_v9  ;;  %v2370_v37 = vld [vmem:[#allocation3 + $0x22] sm:$0x1]  ;;  %v2498_v47 = vld [vmem:[#allocation3 + $0x2a] sm:$0x1] }
 0x21c   :  { %2879 = vst [vmem:[#allocation7 + $0xe] sm:$0x1] %v2815_v30  ;;  %v2434_v7 = vmul.f32 0.25, %v2370_v37  ;;  %v2562_v41 = vmul.f32 0.5, %v2498_v47  ;;  %v2691_v52 = vld [vmem:[#allocation3 + $0x32] sm:$0x1]  ;;  %v2817_v57 = vadd.f32 %v2753_v40, %v2624_v33  ;;  %v2625_v14 = vadd.f32 %v2561_v44, %v2433_v55 }
 0x21d   :  { %v2371_v43 = vld [vmem:[#allocation3 + $0x23] sm:$0x1]  ;;  %v2755_v54 = vmul.f32 0.25, %v2691_v52  ;;  %v2499_v46 = vld [vmem:[#allocation3 + $0x2b] sm:$0x1] }
 0x21e   :  { %v2435_v22 = vmul.f32 0.25, %v2371_v43  ;;  %v2692_v61 = vld [vmem:[#allocation3 + $0x33] sm:$0x1]  ;;  %2880 = vst [vmem:[#allocation7 + $0xf] sm:$0x1] %v2816_v51  ;;  %v2626_v59 = vadd.f32 %v2562_v41, %v2434_v7  ;;  %v2563_v48 = vmul.f32 0.5, %v2499_v46  ;;  %v2818_v62 = vadd.f32 %v2754_v36, %v2625_v14 }
 0x21f   :  { %v2756_v49 = vmul.f32 0.25, %v2692_v61  ;;  %v2372_v0 = vld [vmem:[#allocation3 + $0x24] sm:$0x1]  ;;  %v2500_v53 = vld [vmem:[#allocation3 + $0x2c] sm:$0x1] }
 0x220   :  { %2881 = vst [vmem:[#allocation7 + $0x10] sm:$0x1] %v2817_v57  ;;  %v2436_v2 = vmul.f32 0.25, %v2372_v0  ;;  %v2564_v56 = vmul.f32 0.5, %v2500_v53  ;;  %v2693_v6 = vld [vmem:[#allocation3 + $0x34] sm:$0x1]  ;;  %v2819_v60 = vadd.f32 %v2755_v54, %v2626_v59  ;;  %v2627_v21 = vadd.f32 %v2563_v48, %v2435_v22 }
 0x221   :  { %v2373_v4 = vld [vmem:[#allocation3 + $0x25] sm:$0x1]  ;;  %v2757_v10 = vmul.f32 0.25, %v2693_v6  ;;  %v2501_v1 = vld [vmem:[#allocation3 + $0x2d] sm:$0x1] }
 0x222   :  { %v2437_v63 = vmul.f32 0.25, %v2373_v4  ;;  %v2694_v15 = vld [vmem:[#allocation3 + $0x35] sm:$0x1]  ;;  %2882 = vst [vmem:[#allocation7 + $0x11] sm:$0x1] %v2818_v62  ;;  %v2628_v3 = vadd.f32 %v2564_v56, %v2436_v2  ;;  %v2565_v12 = vmul.f32 0.5, %v2501_v1  ;;  %v2820_v13 = vadd.f32 %v2756_v49, %v2627_v21 }
 0x223   :  { %v2758_v17 = vmul.f32 0.25, %v2694_v15  ;;  %v2374_v5 = vld [vmem:[#allocation3 + $0x26] sm:$0x1]  ;;  %v2502_v20 = vld [vmem:[#allocation3 + $0x2e] sm:$0x1] }
 0x224   :  { %2883 = vst [vmem:[#allocation7 + $0x12] sm:$0x1] %v2819_v60  ;;  %v2438_v11 = vmul.f32 0.25, %v2374_v5  ;;  %v2566_v45 = vmul.f32 0.5, %v2502_v20  ;;  %v2695_v23 = vld [vmem:[#allocation3 + $0x36] sm:$0x1]  ;;  %v2821_v16 = vadd.f32 %v2757_v10, %v2628_v3  ;;  %v2629_v26 = vadd.f32 %v2565_v12, %v2437_v63 }
 0x225   :  { %v2375_v8 = vld [vmem:[#allocation3 + $0x27] sm:$0x1]  ;;  %v2759_v18 = vmul.f32 0.25, %v2695_v23  ;;  %v2503_v28 = vld [vmem:[#allocation3 + $0x2f] sm:$0x1] }
 0x226   :  { %v2439_v29 = vmul.f32 0.25, %v2375_v8  ;;  %v2696_v19 = vld [vmem:[#allocation3 + $0x37] sm:$0x1]  ;;  %2884 = vst [vmem:[#allocation7 + $0x13] sm:$0x1] %v2820_v13  ;;  %v2630_v31 = vadd.f32 %v2566_v45, %v2438_v11  ;;  %v2567_v34 = vmul.f32 0.5, %v2503_v28  ;;  %v2822_v25 = vadd.f32 %v2758_v17, %v2629_v26 }
 0x227   :  { %v2760_v24 = vmul.f32 0.25, %v2696_v19  ;;  %v2376_v58 = vld [vmem:[#allocation3 + $0x30] sm:$0x1]  ;;  %v2504_v35 = vld [vmem:[#allocation3 + $0x38] sm:$0x1] }
 0x228   :  { %2885 = vst [vmem:[#allocation7 + $0x14] sm:$0x1] %v2821_v16  ;;  %v2440_v32 = vmul.f32 0.25, %v2376_v58  ;;  %v2568_v27 = vmul.f32 0.5, %v2504_v35  ;;  %v2697_v39 = vld [vmem:[#allocation3 + $0x40] sm:$0x1]  ;;  %v2823_v30 = vadd.f32 %v2759_v18, %v2630_v31  ;;  %v2631_v42 = vadd.f32 %v2567_v34, %v2439_v29 }
 0x229   :  { %v2377_v50 = vld [vmem:[#allocation3 + $0x31] sm:$0x1]  ;;  %v2761_v40 = vmul.f32 0.25, %v2697_v39  ;;  %v2505_v38 = vld [vmem:[#allocation3 + $0x39] sm:$0x1] }
 0x22a   :  { %v2441_v55 = vmul.f32 0.25, %v2377_v50  ;;  %v2698_v9 = vld [vmem:[#allocation3 + $0x41] sm:$0x1]  ;;  %2886 = vst [vmem:[#allocation7 + $0x15] sm:$0x1] %v2822_v25  ;;  %v2632_v33 = vadd.f32 %v2568_v27, %v2440_v32  ;;  %v2569_v44 = vmul.f32 0.5, %v2505_v38  ;;  %v2824_v51 = vadd.f32 %v2760_v24, %v2631_v42 }
 0x22b   :  { %v2762_v36 = vmul.f32 0.25, %v2698_v9  ;;  %v2378_v37 = vld [vmem:[#allocation3 + $0x32] sm:$0x1]  ;;  %v2506_v47 = vld [vmem:[#allocation3 + $0x3a] sm:$0x1] }
 0x22c   :  { %2887 = vst [vmem:[#allocation7 + $0x16] sm:$0x1] %v2823_v30  ;;  %v2442_v7 = vmul.f32 0.25, %v2378_v37  ;;  %v2570_v41 = vmul.f32 0.5, %v2506_v47  ;;  %v2699_v52 = vld [vmem:[#allocation3 + $0x42] sm:$0x1]  ;;  %v2825_v57 = vadd.f32 %v2761_v40, %v2632_v33  ;;  %v2633_v14 = vadd.f32 %v2569_v44, %v2441_v55 }
 0x22d   :  { %v2379_v43 = vld [vmem:[#allocation3 + $0x33] sm:$0x1]  ;;  %v2763_v54 = vmul.f32 0.25, %v2699_v52  ;;  %v2507_v46 = vld [vmem:[#allocation3 + $0x3b] sm:$0x1] }
 0x22e   :  { %v2443_v22 = vmul.f32 0.25, %v2379_v43  ;;  %v2700_v61 = vld [vmem:[#allocation3 + $0x43] sm:$0x1]  ;;  %2888 = vst [vmem:[#allocation7 + $0x17] sm:$0x1] %v2824_v51  ;;  %v2634_v59 = vadd.f32 %v2570_v41, %v2442_v7  ;;  %v2571_v48 = vmul.f32 0.5, %v2507_v46  ;;  %v2826_v62 = vadd.f32 %v2762_v36, %v2633_v14 }
 0x22f   :  { %v2764_v49 = vmul.f32 0.25, %v2700_v61  ;;  %v2380_v0 = vld [vmem:[#allocation3 + $0x34] sm:$0x1]  ;;  %v2508_v53 = vld [vmem:[#allocation3 + $0x3c] sm:$0x1] }
 0x230   :  { %2889 = vst [vmem:[#allocation7 + $0x18] sm:$0x1] %v2825_v57  ;;  %v2444_v2 = vmul.f32 0.25, %v2380_v0  ;;  %v2572_v56 = vmul.f32 0.5, %v2508_v53  ;;  %v2701_v6 = vld [vmem:[#allocation3 + $0x44] sm:$0x1]  ;;  %v2827_v60 = vadd.f32 %v2763_v54, %v2634_v59  ;;  %v2635_v21 = vadd.f32 %v2571_v48, %v2443_v22 }
 0x231   :  { %v2381_v4 = vld [vmem:[#allocation3 + $0x35] sm:$0x1]  ;;  %v2765_v10 = vmul.f32 0.25, %v2701_v6  ;;  %v2509_v1 = vld [vmem:[#allocation3 + $0x3d] sm:$0x1] }
 0x232   :  { %v2445_v63 = vmul.f32 0.25, %v2381_v4  ;;  %v2702_v15 = vld [vmem:[#allocation3 + $0x45] sm:$0x1]  ;;  %2890 = vst [vmem:[#allocation7 + $0x19] sm:$0x1] %v2826_v62  ;;  %v2636_v3 = vadd.f32 %v2572_v56, %v2444_v2  ;;  %v2573_v12 = vmul.f32 0.5, %v2509_v1  ;;  %v2828_v13 = vadd.f32 %v2764_v49, %v2635_v21 }
 0x233   :  { %v2766_v17 = vmul.f32 0.25, %v2702_v15  ;;  %v2382_v5 = vld [vmem:[#allocation3 + $0x36] sm:$0x1]  ;;  %v2510_v20 = vld [vmem:[#allocation3 + $0x3e] sm:$0x1] }
 0x234   :  { %2891 = vst [vmem:[#allocation7 + $0x1a] sm:$0x1] %v2827_v60  ;;  %v2446_v11 = vmul.f32 0.25, %v2382_v5  ;;  %v2574_v45 = vmul.f32 0.5, %v2510_v20  ;;  %v2703_v23 = vld [vmem:[#allocation3 + $0x46] sm:$0x1]  ;;  %v2829_v16 = vadd.f32 %v2765_v10, %v2636_v3  ;;  %v2637_v26 = vadd.f32 %v2573_v12, %v2445_v63 }
 0x235   :  { %v2383_v8 = vld [vmem:[#allocation3 + $0x37] sm:$0x1]  ;;  %v2767_v18 = vmul.f32 0.25, %v2703_v23  ;;  %v2511_v28 = vld [vmem:[#allocation3 + $0x3f] sm:$0x1] }
 0x236   :  { %v2447_v29 = vmul.f32 0.25, %v2383_v8  ;;  %v2704_v19 = vld [vmem:[#allocation3 + $0x47] sm:$0x1]  ;;  %2892 = vst [vmem:[#allocation7 + $0x1b] sm:$0x1] %v2828_v13  ;;  %v2638_v31 = vadd.f32 %v2574_v45, %v2446_v11  ;;  %v2575_v34 = vmul.f32 0.5, %v2511_v28  ;;  %v2830_v25 = vadd.f32 %v2766_v17, %v2637_v26 }
 0x237   :  { %v2768_v24 = vmul.f32 0.25, %v2704_v19  ;;  %v2384_v58 = vld [vmem:[#allocation3 + $0x40] sm:$0x1]  ;;  %v2512_v35 = vld [vmem:[#allocation3 + $0x48] sm:$0x1] }
 0x238   :  { %2893 = vst [vmem:[#allocation7 + $0x1c] sm:$0x1] %v2829_v16  ;;  %v2448_v32 = vmul.f32 0.25, %v2384_v58  ;;  %v2576_v27 = vmul.f32 0.5, %v2512_v35  ;;  %v2705_v39 = vld [vmem:[#allocation3 + $0x50] sm:$0x1]  ;;  %v2831_v30 = vadd.f32 %v2767_v18, %v2638_v31  ;;  %v2639_v42 = vadd.f32 %v2575_v34, %v2447_v29 }
 0x239   :  { %v2385_v50 = vld [vmem:[#allocation3 + $0x41] sm:$0x1]  ;;  %v2769_v40 = vmul.f32 0.25, %v2705_v39  ;;  %v2513_v38 = vld [vmem:[#allocation3 + $0x49] sm:$0x1] }
 0x23a   :  { %v2449_v55 = vmul.f32 0.25, %v2385_v50  ;;  %v2706_v9 = vld [vmem:[#allocation3 + $0x51] sm:$0x1]  ;;  %2894 = vst [vmem:[#allocation7 + $0x1d] sm:$0x1] %v2830_v25  ;;  %v2640_v33 = vadd.f32 %v2576_v27, %v2448_v32  ;;  %v2577_v44 = vmul.f32 0.5, %v2513_v38  ;;  %v2832_v51 = vadd.f32 %v2768_v24, %v2639_v42 }
 0x23b   :  { %v2770_v36 = vmul.f32 0.25, %v2706_v9  ;;  %v2386_v37 = vld [vmem:[#allocation3 + $0x42] sm:$0x1]  ;;  %v2514_v47 = vld [vmem:[#allocation3 + $0x4a] sm:$0x1] }
 0x23c   :  { %2895 = vst [vmem:[#allocation7 + $0x1e] sm:$0x1] %v2831_v30  ;;  %v2450_v7 = vmul.f32 0.25, %v2386_v37  ;;  %v2578_v41 = vmul.f32 0.5, %v2514_v47  ;;  %v2707_v52 = vld [vmem:[#allocation3 + $0x52] sm:$0x1]  ;;  %v2833_v57 = vadd.f32 %v2769_v40, %v2640_v33  ;;  %v2641_v14 = vadd.f32 %v2577_v44, %v2449_v55 }
 0x23d   :  { %v2387_v43 = vld [vmem:[#allocation3 + $0x43] sm:$0x1]  ;;  %v2771_v54 = vmul.f32 0.25, %v2707_v52  ;;  %v2515_v46 = vld [vmem:[#allocation3 + $0x4b] sm:$0x1] }
 0x23e   :  { %v2451_v22 = vmul.f32 0.25, %v2387_v43  ;;  %v2708_v61 = vld [vmem:[#allocation3 + $0x53] sm:$0x1]  ;;  %2896 = vst [vmem:[#allocation7 + $0x1f] sm:$0x1] %v2832_v51  ;;  %v2642_v59 = vadd.f32 %v2578_v41, %v2450_v7  ;;  %v2579_v48 = vmul.f32 0.5, %v2515_v46  ;;  %v2834_v62 = vadd.f32 %v2770_v36, %v2641_v14 }
 0x23f   :  { %v2772_v49 = vmul.f32 0.25, %v2708_v61  ;;  %v2388_v0 = vld [vmem:[#allocation3 + $0x44] sm:$0x1]  ;;  %v2516_v53 = vld [vmem:[#allocation3 + $0x4c] sm:$0x1] }
 0x240   :  { %2897 = vst [vmem:[#allocation7 + $0x20] sm:$0x1] %v2833_v57  ;;  %v2452_v2 = vmul.f32 0.25, %v2388_v0  ;;  %v2580_v56 = vmul.f32 0.5, %v2516_v53  ;;  %v2709_v6 = vld [vmem:[#allocation3 + $0x54] sm:$0x1]  ;;  %v2835_v60 = vadd.f32 %v2771_v54, %v2642_v59  ;;  %v2643_v21 = vadd.f32 %v2579_v48, %v2451_v22 }
 0x241   :  { %v2389_v4 = vld [vmem:[#allocation3 + $0x45] sm:$0x1]  ;;  %v2773_v10 = vmul.f32 0.25, %v2709_v6  ;;  %v2517_v1 = vld [vmem:[#allocation3 + $0x4d] sm:$0x1] }
 0x242   :  { %v2453_v63 = vmul.f32 0.25, %v2389_v4  ;;  %v2710_v15 = vld [vmem:[#allocation3 + $0x55] sm:$0x1]  ;;  %2898 = vst [vmem:[#allocation7 + $0x21] sm:$0x1] %v2834_v62  ;;  %v2644_v3 = vadd.f32 %v2580_v56, %v2452_v2  ;;  %v2581_v12 = vmul.f32 0.5, %v2517_v1  ;;  %v2836_v13 = vadd.f32 %v2772_v49, %v2643_v21 }
 0x243   :  { %v2774_v17 = vmul.f32 0.25, %v2710_v15  ;;  %v2390_v5 = vld [vmem:[#allocation3 + $0x46] sm:$0x1]  ;;  %v2518_v20 = vld [vmem:[#allocation3 + $0x4e] sm:$0x1] }
 0x244   :  { %2899 = vst [vmem:[#allocation7 + $0x22] sm:$0x1] %v2835_v60  ;;  %v2454_v11 = vmul.f32 0.25, %v2390_v5  ;;  %v2582_v45 = vmul.f32 0.5, %v2518_v20  ;;  %v2711_v23 = vld [vmem:[#allocation3 + $0x56] sm:$0x1]  ;;  %v2837_v16 = vadd.f32 %v2773_v10, %v2644_v3  ;;  %v2645_v26 = vadd.f32 %v2581_v12, %v2453_v63 }
 0x245   :  { %v2391_v8 = vld [vmem:[#allocation3 + $0x47] sm:$0x1]  ;;  %v2775_v18 = vmul.f32 0.25, %v2711_v23  ;;  %v2519_v28 = vld [vmem:[#allocation3 + $0x4f] sm:$0x1] }
 0x246   :  { %v2455_v29 = vmul.f32 0.25, %v2391_v8  ;;  %v2712_v19 = vld [vmem:[#allocation3 + $0x57] sm:$0x1]  ;;  %2900 = vst [vmem:[#allocation7 + $0x23] sm:$0x1] %v2836_v13  ;;  %v2646_v31 = vadd.f32 %v2582_v45, %v2454_v11  ;;  %v2583_v34 = vmul.f32 0.5, %v2519_v28  ;;  %v2838_v25 = vadd.f32 %v2774_v17, %v2645_v26 }
 0x247   :  { %v2776_v24 = vmul.f32 0.25, %v2712_v19  ;;  %v2392_v58 = vld [vmem:[#allocation3 + $0x50] sm:$0x1]  ;;  %v2520_v35 = vld [vmem:[#allocation3 + $0x58] sm:$0x1] }
 0x248   :  { %2901 = vst [vmem:[#allocation7 + $0x24] sm:$0x1] %v2837_v16  ;;  %v2456_v32 = vmul.f32 0.25, %v2392_v58  ;;  %v2584_v27 = vmul.f32 0.5, %v2520_v35  ;;  %v2713_v39 = vld [vmem:[#allocation3 + $0x60] sm:$0x1]  ;;  %v2839_v30 = vadd.f32 %v2775_v18, %v2646_v31  ;;  %v2647_v42 = vadd.f32 %v2583_v34, %v2455_v29 }
 0x249   :  { %v2393_v50 = vld [vmem:[#allocation3 + $0x51] sm:$0x1]  ;;  %v2777_v40 = vmul.f32 0.25, %v2713_v39  ;;  %v2521_v38 = vld [vmem:[#allocation3 + $0x59] sm:$0x1] }
 0x24a   :  { %v2457_v55 = vmul.f32 0.25, %v2393_v50  ;;  %v2714_v9 = vld [vmem:[#allocation3 + $0x61] sm:$0x1]  ;;  %2902 = vst [vmem:[#allocation7 + $0x25] sm:$0x1] %v2838_v25  ;;  %v2648_v33 = vadd.f32 %v2584_v27, %v2456_v32  ;;  %v2585_v44 = vmul.f32 0.5, %v2521_v38  ;;  %v2840_v51 = vadd.f32 %v2776_v24, %v2647_v42 }
 0x24b   :  { %v2778_v36 = vmul.f32 0.25, %v2714_v9  ;;  %v2394_v37 = vld [vmem:[#allocation3 + $0x52] sm:$0x1]  ;;  %v2522_v47 = vld [vmem:[#allocation3 + $0x5a] sm:$0x1] }
 0x24c   :  { %2903 = vst [vmem:[#allocation7 + $0x26] sm:$0x1] %v2839_v30  ;;  %v2458_v7 = vmul.f32 0.25, %v2394_v37  ;;  %v2586_v41 = vmul.f32 0.5, %v2522_v47  ;;  %v2715_v52 = vld [vmem:[#allocation3 + $0x62] sm:$0x1]  ;;  %v2841_v57 = vadd.f32 %v2777_v40, %v2648_v33  ;;  %v2649_v14 = vadd.f32 %v2585_v44, %v2457_v55 }
 0x24d   :  { %v2395_v43 = vld [vmem:[#allocation3 + $0x53] sm:$0x1]  ;;  %v2779_v54 = vmul.f32 0.25, %v2715_v52  ;;  %v2523_v46 = vld [vmem:[#allocation3 + $0x5b] sm:$0x1] }
 0x24e   :  { %v2459_v22 = vmul.f32 0.25, %v2395_v43  ;;  %v2716_v61 = vld [vmem:[#allocation3 + $0x63] sm:$0x1]  ;;  %2904 = vst [vmem:[#allocation7 + $0x27] sm:$0x1] %v2840_v51  ;;  %v2650_v59 = vadd.f32 %v2586_v41, %v2458_v7  ;;  %v2587_v48 = vmul.f32 0.5, %v2523_v46  ;;  %v2842_v62 = vadd.f32 %v2778_v36, %v2649_v14 }
 0x24f   :  { %v2780_v49 = vmul.f32 0.25, %v2716_v61  ;;  %v2396_v0 = vld [vmem:[#allocation3 + $0x54] sm:$0x1]  ;;  %v2524_v53 = vld [vmem:[#allocation3 + $0x5c] sm:$0x1] }
 0x250   :  { %2905 = vst [vmem:[#allocation7 + $0x28] sm:$0x1] %v2841_v57  ;;  %v2460_v2 = vmul.f32 0.25, %v2396_v0  ;;  %v2588_v56 = vmul.f32 0.5, %v2524_v53  ;;  %v2717_v6 = vld [vmem:[#allocation3 + $0x64] sm:$0x1]  ;;  %v2843_v60 = vadd.f32 %v2779_v54, %v2650_v59  ;;  %v2651_v21 = vadd.f32 %v2587_v48, %v2459_v22 }
 0x251   :  { %v2397_v4 = vld [vmem:[#allocation3 + $0x55] sm:$0x1]  ;;  %v2781_v10 = vmul.f32 0.25, %v2717_v6  ;;  %v2525_v1 = vld [vmem:[#allocation3 + $0x5d] sm:$0x1] }
 0x252   :  { %v2461_v63 = vmul.f32 0.25, %v2397_v4  ;;  %v2718_v15 = vld [vmem:[#allocation3 + $0x65] sm:$0x1]  ;;  %2906 = vst [vmem:[#allocation7 + $0x29] sm:$0x1] %v2842_v62  ;;  %v2652_v3 = vadd.f32 %v2588_v56, %v2460_v2  ;;  %v2589_v12 = vmul.f32 0.5, %v2525_v1  ;;  %v2844_v13 = vadd.f32 %v2780_v49, %v2651_v21 }
 0x253   :  { %v2782_v17 = vmul.f32 0.25, %v2718_v15  ;;  %v2398_v5 = vld [vmem:[#allocation3 + $0x56] sm:$0x1]  ;;  %v2526_v20 = vld [vmem:[#allocation3 + $0x5e] sm:$0x1] }
 0x254   :  { %2907 = vst [vmem:[#allocation7 + $0x2a] sm:$0x1] %v2843_v60  ;;  %v2462_v11 = vmul.f32 0.25, %v2398_v5  ;;  %v2590_v45 = vmul.f32 0.5, %v2526_v20  ;;  %v2719_v23 = vld [vmem:[#allocation3 + $0x66] sm:$0x1]  ;;  %v2845_v16 = vadd.f32 %v2781_v10, %v2652_v3  ;;  %v2653_v26 = vadd.f32 %v2589_v12, %v2461_v63 }
 0x255   :  { %v2399_v8 = vld [vmem:[#allocation3 + $0x57] sm:$0x1]  ;;  %v2783_v18 = vmul.f32 0.25, %v2719_v23  ;;  %v2527_v28 = vld [vmem:[#allocation3 + $0x5f] sm:$0x1] }
 0x256   :  { %v2463_v29 = vmul.f32 0.25, %v2399_v8  ;;  %v2720_v19 = vld [vmem:[#allocation3 + $0x67] sm:$0x1]  ;;  %2908 = vst [vmem:[#allocation7 + $0x2b] sm:$0x1] %v2844_v13  ;;  %v2654_v31 = vadd.f32 %v2590_v45, %v2462_v11  ;;  %v2591_v34 = vmul.f32 0.5, %v2527_v28  ;;  %v2846_v25 = vadd.f32 %v2782_v17, %v2653_v26 }
 0x257   :  { %v2784_v24 = vmul.f32 0.25, %v2720_v19  ;;  %v2400_v58 = vld [vmem:[#allocation3 + $0x60] sm:$0x1]  ;;  %v2528_v35 = vld [vmem:[#allocation3 + $0x68] sm:$0x1] }
 0x258   :  { %2909 = vst [vmem:[#allocation7 + $0x2c] sm:$0x1] %v2845_v16  ;;  %v2464_v32 = vmul.f32 0.25, %v2400_v58  ;;  %v2592_v27 = vmul.f32 0.5, %v2528_v35  ;;  %v2721_v39 = vld [vmem:[#allocation3 + $0x70] sm:$0x1]  ;;  %v2847_v30 = vadd.f32 %v2783_v18, %v2654_v31  ;;  %v2655_v42 = vadd.f32 %v2591_v34, %v2463_v29 }
 0x259   :  { %v2401_v50 = vld [vmem:[#allocation3 + $0x61] sm:$0x1]  ;;  %v2785_v40 = vmul.f32 0.25, %v2721_v39  ;;  %v2529_v38 = vld [vmem:[#allocation3 + $0x69] sm:$0x1] }
 0x25a   :  { %v2465_v55 = vmul.f32 0.25, %v2401_v50  ;;  %v2722_v9 = vld [vmem:[#allocation3 + $0x71] sm:$0x1]  ;;  %2910 = vst [vmem:[#allocation7 + $0x2d] sm:$0x1] %v2846_v25  ;;  %v2656_v33 = vadd.f32 %v2592_v27, %v2464_v32  ;;  %v2593_v44 = vmul.f32 0.5, %v2529_v38  ;;  %v2848_v51 = vadd.f32 %v2784_v24, %v2655_v42 }
 0x25b   :  { %v2786_v36 = vmul.f32 0.25, %v2722_v9  ;;  %v2402_v37 = vld [vmem:[#allocation3 + $0x62] sm:$0x1]  ;;  %v2530_v47 = vld [vmem:[#allocation3 + $0x6a] sm:$0x1] }
 0x25c   :  { %2911 = vst [vmem:[#allocation7 + $0x2e] sm:$0x1] %v2847_v30  ;;  %v2466_v7 = vmul.f32 0.25, %v2402_v37  ;;  %v2594_v41 = vmul.f32 0.5, %v2530_v47  ;;  %v2723_v52 = vld [vmem:[#allocation3 + $0x72] sm:$0x1]  ;;  %v2849_v57 = vadd.f32 %v2785_v40, %v2656_v33  ;;  %v2657_v14 = vadd.f32 %v2593_v44, %v2465_v55 }
 0x25d   :  { %v2403_v43 = vld [vmem:[#allocation3 + $0x63] sm:$0x1]  ;;  %v2787_v54 = vmul.f32 0.25, %v2723_v52  ;;  %v2531_v46 = vld [vmem:[#allocation3 + $0x6b] sm:$0x1] }
 0x25e   :  { %v2467_v22 = vmul.f32 0.25, %v2403_v43  ;;  %v2724_v61 = vld [vmem:[#allocation3 + $0x73] sm:$0x1]  ;;  %2912 = vst [vmem:[#allocation7 + $0x2f] sm:$0x1] %v2848_v51  ;;  %v2658_v59 = vadd.f32 %v2594_v41, %v2466_v7  ;;  %v2595_v48 = vmul.f32 0.5, %v2531_v46  ;;  %v2850_v62 = vadd.f32 %v2786_v36, %v2657_v14 }
 0x25f   :  { %v2788_v49 = vmul.f32 0.25, %v2724_v61  ;;  %v2404_v0 = vld [vmem:[#allocation3 + $0x64] sm:$0x1]  ;;  %v2532_v53 = vld [vmem:[#allocation3 + $0x6c] sm:$0x1] }
 0x260   :  { %2913 = vst [vmem:[#allocation7 + $0x30] sm:$0x1] %v2849_v57  ;;  %v2468_v2 = vmul.f32 0.25, %v2404_v0  ;;  %v2596_v56 = vmul.f32 0.5, %v2532_v53  ;;  %v2725_v6 = vld [vmem:[#allocation3 + $0x74] sm:$0x1]  ;;  %v2851_v60 = vadd.f32 %v2787_v54, %v2658_v59  ;;  %v2659_v21 = vadd.f32 %v2595_v48, %v2467_v22 }
 0x261   :  { %v2405_v4 = vld [vmem:[#allocation3 + $0x65] sm:$0x1]  ;;  %v2789_v10 = vmul.f32 0.25, %v2725_v6  ;;  %v2533_v1 = vld [vmem:[#allocation3 + $0x6d] sm:$0x1] }
 0x262   :  { %v2469_v63 = vmul.f32 0.25, %v2405_v4  ;;  %v2726_v15 = vld [vmem:[#allocation3 + $0x75] sm:$0x1]  ;;  %2914 = vst [vmem:[#allocation7 + $0x31] sm:$0x1] %v2850_v62  ;;  %v2660_v3 = vadd.f32 %v2596_v56, %v2468_v2  ;;  %v2597_v12 = vmul.f32 0.5, %v2533_v1  ;;  %v2852_v13 = vadd.f32 %v2788_v49, %v2659_v21 }
 0x263   :  { %v2790_v17 = vmul.f32 0.25, %v2726_v15  ;;  %v2406_v5 = vld [vmem:[#allocation3 + $0x66] sm:$0x1]  ;;  %v2534_v20 = vld [vmem:[#allocation3 + $0x6e] sm:$0x1] }
 0x264   :  { %2915 = vst [vmem:[#allocation7 + $0x32] sm:$0x1] %v2851_v60  ;;  %v2470_v11 = vmul.f32 0.25, %v2406_v5  ;;  %v2598_v45 = vmul.f32 0.5, %v2534_v20  ;;  %v2727_v23 = vld [vmem:[#allocation3 + $0x76] sm:$0x1]  ;;  %v2853_v16 = vadd.f32 %v2789_v10, %v2660_v3  ;;  %v2661_v26 = vadd.f32 %v2597_v12, %v2469_v63 }
 0x265   :  { %v2407_v8 = vld [vmem:[#allocation3 + $0x67] sm:$0x1]  ;;  %v2791_v18 = vmul.f32 0.25, %v2727_v23  ;;  %v2535_v28 = vld [vmem:[#allocation3 + $0x6f] sm:$0x1] }
 0x266   :  { %v2471_v29 = vmul.f32 0.25, %v2407_v8  ;;  %v2728_v19 = vld [vmem:[#allocation3 + $0x77] sm:$0x1]  ;;  %2916 = vst [vmem:[#allocation7 + $0x33] sm:$0x1] %v2852_v13  ;;  %v2662_v31 = vadd.f32 %v2598_v45, %v2470_v11  ;;  %v2599_v34 = vmul.f32 0.5, %v2535_v28  ;;  %v2854_v25 = vadd.f32 %v2790_v17, %v2661_v26 }
 0x267   :  { %v2792_v24 = vmul.f32 0.25, %v2728_v19  ;;  %v2408_v58 = vld [vmem:[#allocation3 + $0x70] sm:$0x1]  ;;  %v2536_v35 = vld [vmem:[#allocation3 + $0x78] sm:$0x1] }
 0x268   :  { %2917 = vst [vmem:[#allocation7 + $0x34] sm:$0x1] %v2853_v16  ;;  %v2472_v32 = vmul.f32 0.25, %v2408_v58  ;;  %v2600_v27 = vmul.f32 0.5, %v2536_v35  ;;  %v2729_v39 = vld [vmem:[#allocation3 + $0x80] sm:$0x1]  ;;  %v2855_v30 = vadd.f32 %v2791_v18, %v2662_v31  ;;  %v2663_v42 = vadd.f32 %v2599_v34, %v2471_v29 }
 0x269   :  { %v2409_v50 = vld [vmem:[#allocation3 + $0x71] sm:$0x1]  ;;  %v2793_v40 = vmul.f32 0.25, %v2729_v39  ;;  %v2537_v38 = vld [vmem:[#allocation3 + $0x79] sm:$0x1] }
 0x26a   :  { %v2473_v55 = vmul.f32 0.25, %v2409_v50  ;;  %v2730_v9 = vld [vmem:[#allocation3 + $0x81] sm:$0x1]  ;;  %2918 = vst [vmem:[#allocation7 + $0x35] sm:$0x1] %v2854_v25  ;;  %v2664_v33 = vadd.f32 %v2600_v27, %v2472_v32  ;;  %v2601_v44 = vmul.f32 0.5, %v2537_v38  ;;  %v2856_v51 = vadd.f32 %v2792_v24, %v2663_v42 }
 0x26b   :  { %v2794_v36 = vmul.f32 0.25, %v2730_v9  ;;  %v2410_v37 = vld [vmem:[#allocation3 + $0x72] sm:$0x1]  ;;  %v2538_v47 = vld [vmem:[#allocation3 + $0x7a] sm:$0x1] }
 0x26c   :  { %2919 = vst [vmem:[#allocation7 + $0x36] sm:$0x1] %v2855_v30  ;;  %v2474_v7 = vmul.f32 0.25, %v2410_v37  ;;  %v2602_v41 = vmul.f32 0.5, %v2538_v47  ;;  %v2731_v52 = vld [vmem:[#allocation3 + $0x82] sm:$0x1]  ;;  %v2857_v57 = vadd.f32 %v2793_v40, %v2664_v33  ;;  %v2665_v14 = vadd.f32 %v2601_v44, %v2473_v55 }
 0x26d   :  { %v2411_v43 = vld [vmem:[#allocation3 + $0x73] sm:$0x1]  ;;  %v2795_v54 = vmul.f32 0.25, %v2731_v52  ;;  %v2539_v46 = vld [vmem:[#allocation3 + $0x7b] sm:$0x1] }
 0x26e   :  { %v2475_v22 = vmul.f32 0.25, %v2411_v43  ;;  %v2732_v61 = vld [vmem:[#allocation3 + $0x83] sm:$0x1]  ;;  %2920 = vst [vmem:[#allocation7 + $0x37] sm:$0x1] %v2856_v51  ;;  %v2666_v59 = vadd.f32 %v2602_v41, %v2474_v7  ;;  %v2603_v48 = vmul.f32 0.5, %v2539_v46  ;;  %v2858_v62 = vadd.f32 %v2794_v36, %v2665_v14 }
 0x26f   :  { %v2796_v49 = vmul.f32 0.25, %v2732_v61  ;;  %v2412_v0 = vld [vmem:[#allocation3 + $0x74] sm:$0x1]  ;;  %v2540_v53 = vld [vmem:[#allocation3 + $0x7c] sm:$0x1] }
 0x270   :  { %2921 = vst [vmem:[#allocation7 + $0x38] sm:$0x1] %v2857_v57  ;;  %v2476_v2 = vmul.f32 0.25, %v2412_v0  ;;  %v2604_v56 = vmul.f32 0.5, %v2540_v53  ;;  %v2733_v6 = vld [vmem:[#allocation3 + $0x84] sm:$0x1]  ;;  %v2859_v60 = vadd.f32 %v2795_v54, %v2666_v59  ;;  %v2667_v21 = vadd.f32 %v2603_v48, %v2475_v22 }
 0x271   :  { %v2413_v4 = vld [vmem:[#allocation3 + $0x75] sm:$0x1]  ;;  %v2797_v10 = vmul.f32 0.25, %v2733_v6  ;;  %v2541_v1 = vld [vmem:[#allocation3 + $0x7d] sm:$0x1] }
 0x272   :  { %v2477_v63 = vmul.f32 0.25, %v2413_v4  ;;  %v2734_v15 = vld [vmem:[#allocation3 + $0x85] sm:$0x1]  ;;  %2922 = vst [vmem:[#allocation7 + $0x39] sm:$0x1] %v2858_v62  ;;  %v2668_v3 = vadd.f32 %v2604_v56, %v2476_v2  ;;  %v2605_v12 = vmul.f32 0.5, %v2541_v1  ;;  %v2860_v13 = vadd.f32 %v2796_v49, %v2667_v21 }
 0x273   :  { %v2798_v17 = vmul.f32 0.25, %v2734_v15  ;;  %v2414_v5 = vld [vmem:[#allocation3 + $0x76] sm:$0x1]  ;;  %v2542_v20 = vld [vmem:[#allocation3 + $0x7e] sm:$0x1] }
 0x274   :  { %2923 = vst [vmem:[#allocation7 + $0x3a] sm:$0x1] %v2859_v60  ;;  %v2478_v11 = vmul.f32 0.25, %v2414_v5  ;;  %v2606_v45 = vmul.f32 0.5, %v2542_v20  ;;  %v2735_v23 = vld [vmem:[#allocation3 + $0x86] sm:$0x1]  ;;  %v2861_v16 = vadd.f32 %v2797_v10, %v2668_v3  ;;  %v2669_v26 = vadd.f32 %v2605_v12, %v2477_v63 }
 0x275   :  { %v2415_v8 = vld [vmem:[#allocation3 + $0x77] sm:$0x1]  ;;  %v2799_v18 = vmul.f32 0.25, %v2735_v23  ;;  %v2543_v28 = vld [vmem:[#allocation3 + $0x7f] sm:$0x1] }
 0x276   :  { %v2479_v29 = vmul.f32 0.25, %v2415_v8  ;;  %v2736_v19 = vld [vmem:[#allocation3 + $0x87] sm:$0x1]  ;;  %2924 = vst [vmem:[#allocation7 + $0x3b] sm:$0x1] %v2860_v13  ;;  %v2670_v31 = vadd.f32 %v2606_v45, %v2478_v11  ;;  %v2607_v34 = vmul.f32 0.5, %v2543_v28  ;;  %v2862_v58 = vadd.f32 %v2798_v17, %v2669_v26 }
 0x277   :  { %v2800_v24 = vmul.f32 0.25, %v2736_v19  ;;  %2925 = vst [vmem:[#allocation7 + $0x3c] sm:$0x1] %v2861_v16 }
 0x278   :  { %v2863_v35 = vadd.f32 %v2799_v18, %v2670_v31  ;;  %v2671_v25 = vadd.f32 %v2607_v34, %v2479_v29  ;;  %2926 = vst [vmem:[#allocation7 + $0x3d] sm:$0x1] %v2862_v58 }
 0x27a   :  { %2927 = vst [vmem:[#allocation7 + $0x3e] sm:$0x1] %v2863_v35  ;;  %v2864_v32 = vadd.f32 %v2800_v24, %v2671_v25 }
 0x27c   :  { %2928 = vst [vmem:[#allocation7 + $0x3f] sm:$0x1] %v2864_v32 }
 0x27d   :  { %2982 = shalt.err (!%p2979_p9)
}
 0x27e   :  { %2940 = dma.vmem_to_hbm [thread:$0]  %s2935_s13, 1024, %s3863_s1, [#allocation6], %s2996_s9, %s2996_s9, %s2997_s10  }
 0x27f   :  { %2993 = dma.done.wait [#allocation6], 1024  }
 0x280   :  { %2994 = vsyncadd [#allocation6], 4294966272 }
 0x281   :  { %2944 = vsyncpa [#allocation5], 1 }
 0x282   :  { %2945 = vsyncpa [#allocation6], 1 }

</bundles_post_ra>
